<compile_context>
chip_gen: v5e
topology: v5e:2x2
jax: 0.10.0
libtpu: 0.0.40
codegen_flags: <defaults>
</compile_context>

<pallas_src>
import functools

import jax
import jax.numpy as jnp
from jax.experimental import pallas as pl
from jax.experimental.pallas import tpu as pltpu

BN_EPS = 1e-5
VMEM_LIMIT_BYTES = 32 * 1024 * 1024   # explicit scoped-VMEM budget, safe on v5e..v7x


# --------------------------------------------------------------------------
# Pallas kernels
# --------------------------------------------------------------------------
def _stem_kernel(p_ref, w_ref, s_ref, b_ref, o_ref, *, conv_h, conv_w,
                 pool_k, pool_s, pool_pad, pool_oh, pool_ow):
    """Fused stem: (im2col'd 7x7/s2 conv) + folded BN + ReLU + MaxPool2d(3,2,1).

    One batch element per grid step; one MXU contraction for the whole conv.
    """
    # Conv as a single matmul: (OH*OW, Kpad) x (Kpad, Cout) -> f32.
    y = jnp.dot(p_ref[...], w_ref[...], preferred_element_type=jnp.float32)
    y = y * s_ref[...] + b_ref[...]
    y = jnp.maximum(y, 0.0)                                  # (conv_h*conv_w, C)

    # MaxPool on the row-major (conv_h, conv_w) map held in registers/VMEM.
    # Out-of-range taps are skipped (equivalent to -inf padding).
    out_rows = []
    for oh in range(pool_oh):
        rmax = None
        for di in range(pool_k):
            r = oh * pool_s + di - pool_pad
            if 0 <= r < conv_h:
                row = y[r * conv_w:(r + 1) * conv_w, :]      # (conv_w, C)
                rmax = row if rmax is None else jnp.maximum(rmax, row)
        for ow in range(pool_ow):
            cmax = None
            for dj in range(pool_k):
                c = ow * pool_s + dj - pool_pad
                if 0 <= c < conv_w:
                    v = rmax[c:c + 1, :]                     # (1, C)
                    cmax = v if cmax is None else jnp.maximum(cmax, v)
            out_rows.append(cmax)
    # Single lane-dense whole-tile store.
    o_ref[...] = jnp.concatenate(out_rows, axis=0)           # (pool_oh*pool_ow, C)


def _fill_im2col(lhs_ref, src_ref, *, kh_sz, kw_sz, stride, oh_sz, ow_sz, cin):
    """Build the (OH*OW, KH*KW*Cin) im2col matrix in a VMEM scratch.

    src_ref is the spatially zero-padded (Hp, Wp, C) plane (bf16).  All indices
    are static; stride-2 taps are deinterleaved here (once per conv), never via
    strided ref slices.
    """
    for oh in range(oh_sz):
        for kh in range(kh_sz):
            ih = oh * stride + kh
            for kw in range(kw_sz):
                c0 = (kh * kw_sz + kw) * cin
                if stride == 1:
                    tap = src_ref[ih:ih + 1, kw:kw + ow_sz, :]          # (1, OW, C)
                    lhs_ref[oh * ow_sz:(oh + 1) * ow_sz, c0:c0 + cin] = (
                        tap.reshape(ow_sz, cin))
                else:
                    for ow in range(ow_sz):
                        iw = ow * stride + kw
                        tap = src_ref[ih:ih + 1, iw:iw + 1, :]          # (1, 1, C)
                        m = oh * ow_sz + ow
                        lhs_ref[m:m + 1, c0:c0 + cin] = tap.reshape(1, cin)


def _basic_block_kernel(*refs, h, w, stride, has_down):
    """Whole BasicBlock fused, one batch element per grid step.

    conv3x3(stride)+BN+ReLU -> conv3x3(1)+BN -> (+ identity / 1x1-downsample)
    -> ReLU.  Each conv is one MXU contraction (M = OH*OW); intermediates live
    in VMEM scratch; spatial padding is done in-kernel.
    """
    if has_down:
        (x_ref, w1_ref, s1_ref, b1_ref, w2_ref, s2_ref, b2_ref,
         wd_ref, sd_ref, bd_ref, o_ref, xpad_ref, midpad_ref, lhs_ref) = refs
    else:
        (x_ref, w1_ref, s1_ref, b1_ref, w2_ref, s2_ref, b2_ref,
         o_ref, xpad_ref, midpad_ref, lhs_ref) = refs
        wd_ref = sd_ref = bd_ref = None

    cin = x_ref.shape[-1]
    oh = (h - 1) // stride + 1
    ow = (w - 1) // stride + 1

    # ---- conv1 input: zero-padded (pad=1) copy of x in VMEM ----
    xpad_ref[...] = jnp.zeros_like(xpad_ref)
    xv = x_ref[...]                                           # (h*w, C) f32
    xb = xv.astype(jnp.bfloat16)
    for r in range(h):
        xpad_ref[r + 1:r + 2, 1:1 + w, :] = xb[r * w:(r + 1) * w, :].reshape(1, w, cin)

    # ---- conv1 (3x3, stride) + BN + ReLU : one MXU contraction ----
    _fill_im2col(lhs_ref, xpad_ref, kh_sz=3, kw_sz=3, stride=stride,
                 oh_sz=oh, ow_sz=ow, cin=cin)
    y1 = jnp.dot(lhs_ref[...], w1_ref[...], preferred_element_type=jnp.float32)
    y1 = jnp.maximum(y1 * s1_ref[...] + b1_ref[...], 0.0)     # (oh*ow, C)

    # ---- conv2 input: zero-padded copy of y1 in VMEM ----
    midpad_ref[...] = jnp.zeros_like(midpad_ref)
    y1b = y1.astype(jnp.bfloat16)
    for r in range(oh):
        midpad_ref[r + 1:r + 2, 1:1 + ow, :] = y1b[r * ow:(r + 1) * ow, :].reshape(1, ow, cin)

    # ---- conv2 (3x3, stride 1) + BN : one MXU contraction ----
    _fill_im2col(lhs_ref, midpad_ref, kh_sz=3, kw_sz=3, stride=1,
                 oh_sz=oh, ow_sz=ow, cin=cin)
    y2 = jnp.dot(lhs_ref[...], w2_ref[...], preferred_element_type=jnp.float32)
    y2 = y2 * s2_ref[...] + b2_ref[...]

    # ---- identity / downsample path (residual carried in f32) ----
    if has_down:
        # 1x1 conv, stride `stride`, no padding: gather the strided rows of x.
        rows = []
        for r in range(oh):
            for c in range(ow):
                m = (r * stride) * w + (c * stride)
                rows.append(xv[m:m + 1, :])
        lhs_d = jnp.concatenate(rows, axis=0).astype(jnp.bfloat16)      # (oh*ow, C)
        ident = jnp.dot(lhs_d, wd_ref[...], preferred_element_type=jnp.float32)
        ident = ident * sd_ref[...] + bd_ref[...]
    else:
        ident = xv                                              # f32 residual

    # Single lane-dense whole-tile store.
    o_ref[...] = jnp.maximum(y2 + ident, 0.0)


# --------------------------------------------------------------------------
# Pallas wrappers
# --------------------------------------------------------------------------
def stem_forward(x_nhwc, w_oihw, scale, bias):
    """conv1(7x7, s2, p3) + BN + ReLU + MaxPool2d(3,2,1), fused in one call.

    Returns (features_flat (N, POH*POW, Cout) f32, POH, POW).
    """
    N, H, W, Cin = x_nhwc.shape
    Cout, _, KH, KW = w_oihw.shape
    stride, pad = 2, 3
    OH = (H + 2 * pad - KH) // stride + 1
    OW = (W + 2 * pad - KW) // stride + 1

    # Wrapper-side im2col for the narrow-channel stem (Cin=num_bands is tiny).
    xp = jnp.pad(x_nhwc, ((0, 0), (pad, pad), (pad, pad), (0, 0)))
    taps = []
    for kh in range(KH):
        for kw in range(KW):
            taps.append(xp[:, kh:kh + stride * (OH - 1) + 1:stride,
                              kw:kw + stride * (OW - 1) + 1:stride, :])
    K = KH * KW * Cin
    patches = jnp.concatenate(taps, axis=-1).reshape(N, OH * OW, K)
    Kp = ((K + 127) // 128) * 128                   # lane-align the contraction dim
    if Kp != K:
        patches = jnp.pad(patches, ((0, 0), (0, 0), (0, Kp - K)))
    patches = patches.astype(jnp.bfloat16)

    # Weight (Cout, Cin, KH, KW) -> (K, Cout) with (kh, kw, cin) ordering.
    wk = jnp.transpose(w_oihw, (2, 3, 1, 0)).reshape(K, Cout)
    if Kp != K:
        wk = jnp.pad(wk, ((0, Kp - K), (0, 0)))
    wk = wk.astype(jnp.bfloat16)
    s2 = scale.reshape(1, Cout).astype(jnp.float32)
    b2 = bias.reshape(1, Cout).astype(jnp.float32)

    pool_k, pool_s, pool_pad = 3, 2, 1
    POH = (OH + 2 * pool_pad - pool_k) // pool_s + 1
    POW = (OW + 2 * pool_pad - pool_k) // pool_s + 1

    out = pl.pallas_call(
        functools.partial(_stem_kernel, conv_h=OH, conv_w=OW,
                          pool_k=pool_k, pool_s=pool_s, pool_pad=pool_pad,
                          pool_oh=POH, pool_ow=POW),
        grid=(N,),
        in_specs=[
            pl.BlockSpec((None, OH * OW, Kp), lambda n: (n, 0, 0)),
            pl.BlockSpec((Kp, Cout), lambda n: (0, 0)),
            pl.BlockSpec((1, Cout), lambda n: (0, 0)),
            pl.BlockSpec((1, Cout), lambda n: (0, 0)),
        ],
        out_specs=pl.BlockSpec((None, POH * POW, Cout), lambda n: (n, 0, 0)),
        out_shape=jax.ShapeDtypeStruct((N, POH * POW, Cout), jnp.float32),
        compiler_params=pltpu.CompilerParams(
            dimension_semantics=("parallel",),
            vmem_limit_bytes=VMEM_LIMIT_BYTES),
    )(patches, wk, s2, b2)
    return out, POH, POW


def basic_block_forward(x_flat, h, w, p):
    """Fused BasicBlock on a flat (N, h*w, C) f32 feature map."""
    N, hw, C = x_flat.shape
    assert hw == h * w
    stride = p["stride"]
    has_down = "down_w" in p
    oh = (h - 1) // stride + 1
    ow = (w - 1) // stride + 1

    def reshape_w(w_oihw):
        cout, cin, kh, kw = w_oihw.shape
        return (jnp.transpose(w_oihw, (2, 3, 1, 0))
                .reshape(kh * kw * cin, cout).astype(jnp.bfloat16))

    w1 = reshape_w(p["conv1_w"])
    w2 = reshape_w(p["conv2_w"])
    s1 = p["bn1_scale"].reshape(1, C).astype(jnp.float32)
    b1 = p["bn1_bias"].reshape(1, C).astype(jnp.float32)
    s2 = p["bn2_scale"].reshape(1, C).astype(jnp.float32)
    b2 = p["bn2_bias"].reshape(1, C).astype(jnp.float32)

    args = [x_flat, w1, s1, b1, w2, s2, b2]
    in_specs = [
        pl.BlockSpec((None, hw, C), lambda n: (n, 0, 0)),
        pl.BlockSpec(w1.shape, lambda n: (0, 0)),
        pl.BlockSpec((1, C), lambda n: (0, 0)),
        pl.BlockSpec((1, C), lambda n: (0, 0)),
        pl.BlockSpec(w2.shape, lambda n: (0, 0)),
        pl.BlockSpec((1, C), lambda n: (0, 0)),
        pl.BlockSpec((1, C), lambda n: (0, 0)),
    ]
    if has_down:
        wd = reshape_w(p["down_w"])                 # (C, C)
        sd = p["dbn_scale"].reshape(1, C).astype(jnp.float32)
        bd = p["dbn_bias"].reshape(1, C).astype(jnp.float32)
        args += [wd, sd, bd]
        in_specs += [pl.BlockSpec(wd.shape, lambda n: (0, 0)),
                     pl.BlockSpec((1, C), lambda n: (0, 0)),
                     pl.BlockSpec((1, C), lambda n: (0, 0))]

    out = pl.pallas_call(
        functools.partial(_basic_block_kernel, h=h, w=w, stride=stride,
                          has_down=has_down),
        grid=(N,),
        in_specs=in_specs,
        out_specs=pl.BlockSpec((None, oh * ow, C), lambda n: (n, 0, 0)),
        out_shape=jax.ShapeDtypeStruct((N, oh * ow, C), jnp.float32),
        scratch_shapes=[
            pltpu.VMEM((h + 2, w + 2, C), jnp.bfloat16),     # padded conv1 input
            pltpu.VMEM((oh + 2, ow + 2, C), jnp.bfloat16),   # padded conv2 input
            pltpu.VMEM((oh * ow, 9 * C), jnp.bfloat16),      # shared im2col lhs
        ],
        compiler_params=pltpu.CompilerParams(
            dimension_semantics=("parallel",),
            vmem_limit_bytes=VMEM_LIMIT_BYTES),
    )(*args)
    return out, oh, ow


# --------------------------------------------------------------------------
# Model: parameters + forward (BasicBlock variant, width_per_group=128)
# --------------------------------------------------------------------------
def _kaiming(key, cout, cin, kh, kw):
    # kaiming_normal_, mode='fan_out', nonlinearity='relu'
    fan_out = cout * kh * kw
    std = (2.0 / fan_out) ** 0.5
    return jax.random.normal(key, (cout, cin, kh, kw), jnp.float32) * std


def _make_bn(c):
    gamma = jnp.ones((c,), jnp.float32)
    beta = jnp.zeros((c,), jnp.float32)
    rmean = jnp.zeros((c,), jnp.float32)
    rvar = jnp.ones((c,), jnp.float32)
    scale = gamma / jnp.sqrt(rvar + BN_EPS)          # folded in f32
    bias = beta - rmean * scale
    return scale, bias


def init_params(key, num_bands, layers=(1, 1)):
    keys = iter(jax.random.split(key, 64))
    P = {}
    P["conv1_w"] = _kaiming(next(keys), 128, num_bands, 7, 7)
    P["bn1_scale"], P["bn1_bias"] = _make_bn(128)

    inplanes = 128

    def make_layer(planes, blocks, stride):
        nonlocal inplanes
        blk_list = []
        for b in range(blocks):
            s = stride if b == 0 else 1
            needs_down = (b == 0) and (s != 1 or inplanes != planes)
            blk = {"stride": s}
            blk["conv1_w"] = _kaiming(next(keys), planes, inplanes, 3, 3)
            blk["bn1_scale"], blk["bn1_bias"] = _make_bn(planes)
            blk["conv2_w"] = _kaiming(next(keys), planes, planes, 3, 3)
            blk["bn2_scale"], blk["bn2_bias"] = _make_bn(planes)
            if needs_down:
                blk["down_w"] = _kaiming(next(keys), planes, inplanes, 1, 1)
                blk["dbn_scale"], blk["dbn_bias"] = _make_bn(planes)
            inplanes = planes
            blk_list.append(blk)
        return blk_list

    P["layer1"] = make_layer(128, layers[0], 1)
    P["layer2"] = make_layer(128, layers[1], 2)
    return P


def align_resnet_forward(x_nchw, params):
    """AlignResNet._forward_impl with crop_list=None, roi_region=None."""
    x = jnp.transpose(x_nchw, (0, 2, 3, 1)).astype(jnp.float32)      # NCHW -> NHWC
    feat, h, w = stem_forward(x, params["conv1_w"],
                              params["bn1_scale"], params["bn1_bias"])
    for blk in params["layer1"]:
        feat, h, w = basic_block_forward(feat, h, w, blk)
    for blk in params["layer2"]:
        feat, h, w = basic_block_forward(feat, h, w, blk)
    N, _, C = feat.shape
    out = feat.reshape(N, h, w, C)
    # TODO(synk): self.layer3 / self.layer4 are used in _forward_impl but never
    # constructed in __init__ (and the RoIAlign / avgpool / fc branch depends on
    # them + torchvision RoIAlign); the well-defined portion ends at layer2.
    return jnp.transpose(out, (0, 3, 1, 2)).astype(jnp.float32)      # back to NCHW


# --------------------------------------------------------------------------
if __name__ == "__main__":
    key = jax.random.PRNGKey(0)
    kx, kp = jax.random.split(key)

    num_bands = 4                     # free variable `num_bands` in the module
    x = jax.random.normal(kx, (2, num_bands, 16, 16), jnp.float32)   # NCHW input

    params = init_params(kp, num_bands, layers=(1, 1))
    fwd = jax.jit(lambda xx: align_resnet_forward(xx, params))
    out = jax.block_until_ready(fwd(x))

    # 16x16 -> conv1(s2) 8x8 -> maxpool(s2) 4x4 -> layer1 4x4 -> layer2(s2) 2x2
    assert out.shape == (2, 128, 2, 2), out.shape
    assert bool(jnp.all(jnp.isfinite(out)))
    print("KERNEL_OK")
</pallas_src>

<mosaic_0001>
module attributes {stable_mosaic.version = 11 : i64} {
  func.func @_stem_kernel(%arg0: i32, %arg1: memref<1x64x256xbf16, #tpu.memory_space<vmem>>, %arg2: memref<256x128xbf16, #tpu.memory_space<vmem>>, %arg3: memref<1x128xf32, #tpu.memory_space<vmem>>, %arg4: memref<1x128xf32, #tpu.memory_space<vmem>>, %arg5: memref<1x16x128xf32, #tpu.memory_space<vmem>>) attributes {dimension_semantics = [#tpu.dimension_semantics<parallel>], iteration_bounds = array<i64: 2>, scalar_prefetch = 0 : i64, scratch_operands = 0 : i64, tpu.core_type = #tpu.core_type<tc>, window_params = [{transform_indices = @transform_0, window_bounds = array<i64: 1, 64, 256>}, {pipeline_mode = #tpu.pipeline_mode<synchronous>, transform_indices = @transform_1, window_bounds = array<i64: 256, 128>}, {pipeline_mode = #tpu.pipeline_mode<synchronous>, transform_indices = @transform_2, window_bounds = array<i64: 1, 128>}, {pipeline_mode = #tpu.pipeline_mode<synchronous>, transform_indices = @transform_3, window_bounds = array<i64: 1, 128>}, {transform_indices = @transform_4, window_bounds = array<i64: 1, 16, 128>}]} {
    %c0 = arith.constant 0 : index
    %c0_0 = arith.constant 0 : index
    %c0_1 = arith.constant 0 : index
    %0 = vector.load %arg1[%c0, %c0_0, %c0_1] : memref<1x64x256xbf16, #tpu.memory_space<vmem>>, vector<1x64x256xbf16>
    %1 = vector.shape_cast %0 : vector<1x64x256xbf16> to vector<64x256xbf16>
    %c0_2 = arith.constant 0 : index
    %c0_3 = arith.constant 0 : index
    %2 = vector.load %arg2[%c0_2, %c0_3] : memref<256x128xbf16, #tpu.memory_space<vmem>>, vector<256x128xbf16>
    %cst = arith.constant dense<0.000000e+00> : vector<64x128xf32>
    %3 = tpu.matmul %1, %2, %cst {dimension_numbers = #tpu.dot_dimension_numbers<[1], [0], [0], [1], [0, 0, 1, 1], [], []>} : vector<64x256xbf16>, vector<256x128xbf16>, vector<64x128xf32> -> vector<64x128xf32>
    %c0_4 = arith.constant 0 : index
    %c0_5 = arith.constant 0 : index
    %4 = vector.load %arg3[%c0_4, %c0_5] : memref<1x128xf32, #tpu.memory_space<vmem>>, vector<1x128xf32>
    %5 = vector.broadcast %4 : vector<1x128xf32> to vector<64x128xf32>
    %6 = arith.mulf %3, %5 : vector<64x128xf32>
    %c0_6 = arith.constant 0 : index
    %c0_7 = arith.constant 0 : index
    %7 = vector.load %arg4[%c0_6, %c0_7] : memref<1x128xf32, #tpu.memory_space<vmem>>, vector<1x128xf32>
    %8 = vector.broadcast %7 : vector<1x128xf32> to vector<64x128xf32>
    %9 = arith.addf %6, %8 : vector<64x128xf32>
    %cst_8 = arith.constant 0.000000e+00 : f32
    %10 = vector.broadcast %cst_8 : f32 to vector<64x128xf32>
    %11 = arith.maximumf %9, %10 : vector<64x128xf32>
    %12 = vector.extract_strided_slice %11 {offsets = [0, 0], sizes = [8, 128], strides = [1, 1]} : vector<64x128xf32> to vector<8x128xf32>
    %13 = vector.extract_strided_slice %11 {offsets = [8, 0], sizes = [8, 128], strides = [1, 1]} : vector<64x128xf32> to vector<8x128xf32>
    %14 = arith.maximumf %12, %13 : vector<8x128xf32>
    %15 = vector.extract_strided_slice %14 {offsets = [0, 0], sizes = [1, 128], strides = [1, 1]} : vector<8x128xf32> to vector<1x128xf32>
    %16 = vector.extract_strided_slice %14 {offsets = [1, 0], sizes = [1, 128], strides = [1, 1]} : vector<8x128xf32> to vector<1x128xf32>
    %17 = arith.maximumf %15, %16 : vector<1x128xf32>
    %18 = vector.extract_strided_slice %14 {offsets = [1, 0], sizes = [1, 128], strides = [1, 1]} : vector<8x128xf32> to vector<1x128xf32>
    %19 = vector.extract_strided_slice %14 {offsets = [2, 0], sizes = [1, 128], strides = [1, 1]} : vector<8x128xf32> to vector<1x128xf32>
    %20 = arith.maximumf %18, %19 : vector<1x128xf32>
    %21 = vector.extract_strided_slice %14 {offsets = [3, 0], sizes = [1, 128], strides = [1, 1]} : vector<8x128xf32> to vector<1x128xf32>
    %22 = arith.maximumf %20, %21 : vector<1x128xf32>
    %23 = vector.extract_strided_slice %14 {offsets = [3, 0], sizes = [1, 128], strides = [1, 1]} : vector<8x128xf32> to vector<1x128xf32>
    %24 = vector.extract_strided_slice %14 {offsets = [4, 0], sizes = [1, 128], strides = [1, 1]} : vector<8x128xf32> to vector<1x128xf32>
    %25 = arith.maximumf %23, %24 : vector<1x128xf32>
    %26 = vector.extract_strided_slice %14 {offsets = [5, 0], sizes = [1, 128], strides = [1, 1]} : vector<8x128xf32> to vector<1x128xf32>
    %27 = arith.maximumf %25, %26 : vector<1x128xf32>
    %28 = vector.extract_strided_slice %14 {offsets = [5, 0], sizes = [1, 128], strides = [1, 1]} : vector<8x128xf32> to vector<1x128xf32>
    %29 = vector.extract_strided_slice %14 {offsets = [6, 0], sizes = [1, 128], strides = [1, 1]} : vector<8x128xf32> to vector<1x128xf32>
    %30 = arith.maximumf %28, %29 : vector<1x128xf32>
    %31 = vector.extract_strided_slice %14 {offsets = [7, 0], sizes = [1, 128], strides = [1, 1]} : vector<8x128xf32> to vector<1x128xf32>
    %32 = arith.maximumf %30, %31 : vector<1x128xf32>
    %33 = vector.extract_strided_slice %11 {offsets = [8, 0], sizes = [8, 128], strides = [1, 1]} : vector<64x128xf32> to vector<8x128xf32>
    %34 = vector.extract_strided_slice %11 {offsets = [16, 0], sizes = [8, 128], strides = [1, 1]} : vector<64x128xf32> to vector<8x128xf32>
    %35 = arith.maximumf %33, %34 : vector<8x128xf32>
    %36 = vector.extract_strided_slice %11 {offsets = [24, 0], sizes = [8, 128], strides = [1, 1]} : vector<64x128xf32> to vector<8x128xf32>
    %37 = arith.maximumf %35, %36 : vector<8x128xf32>
    %38 = vector.extract_strided_slice %37 {offsets = [0, 0], sizes = [1, 128], strides = [1, 1]} : vector<8x128xf32> to vector<1x128xf32>
    %39 = vector.extract_strided_slice %37 {offsets = [1, 0], sizes = [1, 128], strides = [1, 1]} : vector<8x128xf32> to vector<1x128xf32>
    %40 = arith.maximumf %38, %39 : vector<1x128xf32>
    %41 = vector.extract_strided_slice %37 {offsets = [1, 0], sizes = [1, 128], strides = [1, 1]} : vector<8x128xf32> to vector<1x128xf32>
    %42 = vector.extract_strided_slice %37 {offsets = [2, 0], sizes = [1, 128], strides = [1, 1]} : vector<8x128xf32> to vector<1x128xf32>
    %43 = arith.maximumf %41, %42 : vector<1x128xf32>
    %44 = vector.extract_strided_slice %37 {offsets = [3, 0], sizes = [1, 128], strides = [1, 1]} : vector<8x128xf32> to vector<1x128xf32>
    %45 = arith.maximumf %43, %44 : vector<1x128xf32>
    %46 = vector.extract_strided_slice %37 {offsets = [3, 0], sizes = [1, 128], strides = [1, 1]} : vector<8x128xf32> to vector<1x128xf32>
    %47 = vector.extract_strided_slice %37 {offsets = [4, 0], sizes = [1, 128], strides = [1, 1]} : vector<8x128xf32> to vector<1x128xf32>
    %48 = arith.maximumf %46, %47 : vector<1x128xf32>
    %49 = vector.extract_strided_slice %37 {offsets = [5, 0], sizes = [1, 128], strides = [1, 1]} : vector<8x128xf32> to vector<1x128xf32>
    %50 = arith.maximumf %48, %49 : vector<1x128xf32>
    %51 = vector.extract_strided_slice %37 {offsets = [5, 0], sizes = [1, 128], strides = [1, 1]} : vector<8x128xf32> to vector<1x128xf32>
    %52 = vector.extract_strided_slice %37 {offsets = [6, 0], sizes = [1, 128], strides = [1, 1]} : vector<8x128xf32> to vector<1x128xf32>
    %53 = arith.maximumf %51, %52 : vector<1x128xf32>
    %54 = vector.extract_strided_slice %37 {offsets = [7, 0], sizes = [1, 128], strides = [1, 1]} : vector<8x128xf32> to vector<1x128xf32>
    %55 = arith.maximumf %53, %54 : vector<1x128xf32>
    %56 = vector.extract_strided_slice %11 {offsets = [24, 0], sizes = [8, 128], strides = [1, 1]} : vector<64x128xf32> to vector<8x128xf32>
    %57 = vector.extract_strided_slice %11 {offsets = [32, 0], sizes = [8, 128], strides = [1, 1]} : vector<64x128xf32> to vector<8x128xf32>
    %58 = arith.maximumf %56, %57 : vector<8x128xf32>
    %59 = vector.extract_strided_slice %11 {offsets = [40, 0], sizes = [8, 128], strides = [1, 1]} : vector<64x128xf32> to vector<8x128xf32>
    %60 = arith.maximumf %58, %59 : vector<8x128xf32>
    %61 = vector.extract_strided_slice %60 {offsets = [0, 0], sizes = [1, 128], strides = [1, 1]} : vector<8x128xf32> to vector<1x128xf32>
    %62 = vector.extract_strided_slice %60 {offsets = [1, 0], sizes = [1, 128], strides = [1, 1]} : vector<8x128xf32> to vector<1x128xf32>
    %63 = arith.maximumf %61, %62 : vector<1x128xf32>
    %64 = vector.extract_strided_slice %60 {offsets = [1, 0], sizes = [1, 128], strides = [1, 1]} : vector<8x128xf32> to vector<1x128xf32>
    %65 = vector.extract_strided_slice %60 {offsets = [2, 0], sizes = [1, 128], strides = [1, 1]} : vector<8x128xf32> to vector<1x128xf32>
    %66 = arith.maximumf %64, %65 : vector<1x128xf32>
    %67 = vector.extract_strided_slice %60 {offsets = [3, 0], sizes = [1, 128], strides = [1, 1]} : vector<8x128xf32> to vector<1x128xf32>
    %68 = arith.maximumf %66, %67 : vector<1x128xf32>
    %69 = vector.extract_strided_slice %60 {offsets = [3, 0], sizes = [1, 128], strides = [1, 1]} : vector<8x128xf32> to vector<1x128xf32>
    %70 = vector.extract_strided_slice %60 {offsets = [4, 0], sizes = [1, 128], strides = [1, 1]} : vector<8x128xf32> to vector<1x128xf32>
    %71 = arith.maximumf %69, %70 : vector<1x128xf32>
    %72 = vector.extract_strided_slice %60 {offsets = [5, 0], sizes = [1, 128], strides = [1, 1]} : vector<8x128xf32> to vector<1x128xf32>
    %73 = arith.maximumf %71, %72 : vector<1x128xf32>
    %74 = vector.extract_strided_slice %60 {offsets = [5, 0], sizes = [1, 128], strides = [1, 1]} : vector<8x128xf32> to vector<1x128xf32>
    %75 = vector.extract_strided_slice %60 {offsets = [6, 0], sizes = [1, 128], strides = [1, 1]} : vector<8x128xf32> to vector<1x128xf32>
    %76 = arith.maximumf %74, %75 : vector<1x128xf32>
    %77 = vector.extract_strided_slice %60 {offsets = [7, 0], sizes = [1, 128], strides = [1, 1]} : vector<8x128xf32> to vector<1x128xf32>
    %78 = arith.maximumf %76, %77 : vector<1x128xf32>
    %79 = vector.extract_strided_slice %11 {offsets = [40, 0], sizes = [8, 128], strides = [1, 1]} : vector<64x128xf32> to vector<8x128xf32>
    %80 = vector.extract_strided_slice %11 {offsets = [48, 0], sizes = [8, 128], strides = [1, 1]} : vector<64x128xf32> to vector<8x128xf32>
    %81 = arith.maximumf %79, %80 : vector<8x128xf32>
    %82 = vector.extract_strided_slice %11 {offsets = [56, 0], sizes = [8, 128], strides = [1, 1]} : vector<64x128xf32> to vector<8x128xf32>
    %83 = arith.maximumf %81, %82 : vector<8x128xf32>
    %84 = vector.extract_strided_slice %83 {offsets = [0, 0], sizes = [1, 128], strides = [1, 1]} : vector<8x128xf32> to vector<1x128xf32>
    %85 = vector.extract_strided_slice %83 {offsets = [1, 0], sizes = [1, 128], strides = [1, 1]} : vector<8x128xf32> to vector<1x128xf32>
    %86 = arith.maximumf %84, %85 : vector<1x128xf32>
    %87 = vector.extract_strided_slice %83 {offsets = [1, 0], sizes = [1, 128], strides = [1, 1]} : vector<8x128xf32> to vector<1x128xf32>
    %88 = vector.extract_strided_slice %83 {offsets = [2, 0], sizes = [1, 128], strides = [1, 1]} : vector<8x128xf32> to vector<1x128xf32>
    %89 = arith.maximumf %87, %88 : vector<1x128xf32>
    %90 = vector.extract_strided_slice %83 {offsets = [3, 0], sizes = [1, 128], strides = [1, 1]} : vector<8x128xf32> to vector<1x128xf32>
    %91 = arith.maximumf %89, %90 : vector<1x128xf32>
    %92 = vector.extract_strided_slice %83 {offsets = [3, 0], sizes = [1, 128], strides = [1, 1]} : vector<8x128xf32> to vector<1x128xf32>
    %93 = vector.extract_strided_slice %83 {offsets = [4, 0], sizes = [1, 128], strides = [1, 1]} : vector<8x128xf32> to vector<1x128xf32>
    %94 = arith.maximumf %92, %93 : vector<1x128xf32>
    %95 = vector.extract_strided_slice %83 {offsets = [5, 0], sizes = [1, 128], strides = [1, 1]} : vector<8x128xf32> to vector<1x128xf32>
    %96 = arith.maximumf %94, %95 : vector<1x128xf32>
    %97 = vector.extract_strided_slice %83 {offsets = [5, 0], sizes = [1, 128], strides = [1, 1]} : vector<8x128xf32> to vector<1x128xf32>
    %98 = vector.extract_strided_slice %83 {offsets = [6, 0], sizes = [1, 128], strides = [1, 1]} : vector<8x128xf32> to vector<1x128xf32>
    %99 = arith.maximumf %97, %98 : vector<1x128xf32>
    %100 = vector.extract_strided_slice %83 {offsets = [7, 0], sizes = [1, 128], strides = [1, 1]} : vector<8x128xf32> to vector<1x128xf32>
    %101 = arith.maximumf %99, %100 : vector<1x128xf32>
    %102 = tpu.concatenate %17, %22, %27, %32, %40, %45, %50, %55, %63, %68, %73, %78, %86, %91, %96, %101 in 0 : vector<1x128xf32>, vector<1x128xf32>, vector<1x128xf32>, vector<1x128xf32>, vector<1x128xf32>, vector<1x128xf32>, vector<1x128xf32>, vector<1x128xf32>, vector<1x128xf32>, vector<1x128xf32>, vector<1x128xf32>, vector<1x128xf32>, vector<1x128xf32>, vector<1x128xf32>, vector<1x128xf32>, vector<1x128xf32> -> vector<16x128xf32>
    %c0_9 = arith.constant 0 : index
    %c0_10 = arith.constant 0 : index
    %c0_11 = arith.constant 0 : index
    %103 = vector.load %arg5[%c0_9, %c0_10, %c0_11] : memref<1x16x128xf32, #tpu.memory_space<vmem>>, vector<1x16x128xf32>
    %104 = vector.shape_cast %103 : vector<1x16x128xf32> to vector<16x128xf32>
    %105 = vector.shape_cast %102 : vector<16x128xf32> to vector<1x16x128xf32>
    tpu.vector_store %arg5[%c0_9, %c0_10, %c0_11], %105 {strides = array<i32>} : memref<1x16x128xf32, #tpu.memory_space<vmem>>, vector<1x16x128xf32>,
    return
  }
  func.func @transform_0(%arg0: i32) -> (i32, i32, i32) {
    %c0_i32 = arith.constant 0 : i32
    %c0_i32_0 = arith.constant 0 : i32
    %c0_i32_1 = arith.constant 0 : i32
    return %arg0, %c0_i32, %c0_i32_0 : i32, i32, i32
  }
  func.func @transform_1(%arg0: i32) -> (i32, i32) {
    %c0_i32 = arith.constant 0 : i32
    %c0_i32_0 = arith.constant 0 : i32
    %c0_i32_1 = arith.constant 0 : i32
    return %c0_i32, %c0_i32_0 : i32, i32
  }
  func.func @transform_2(%arg0: i32) -> (i32, i32) {
    %c0_i32 = arith.constant 0 : i32
    %c0_i32_0 = arith.constant 0 : i32
    %c0_i32_1 = arith.constant 0 : i32
    return %c0_i32, %c0_i32_0 : i32, i32
  }
  func.func @transform_3(%arg0: i32) -> (i32, i32) {
    %c0_i32 = arith.constant 0 : i32
    %c0_i32_0 = arith.constant 0 : i32
    %c0_i32_1 = arith.constant 0 : i32
    return %c0_i32, %c0_i32_0 : i32, i32
  }
  func.func @transform_4(%arg0: i32) -> (i32, i32, i32) {
    %c0_i32 = arith.constant 0 : i32
    %c0_i32_0 = arith.constant 0 : i32
    %c0_i32_1 = arith.constant 0 : i32
    return %arg0, %c0_i32, %c0_i32_0 : i32, i32, i32
  }
}

module attributes {stable_mosaic.version = 11 : i64} {
  func.func @_basic_block_kernel(%arg0: i32, %arg1: memref<1x16x128xf32, #tpu.memory_space<vmem>>, %arg2: memref<1152x128xbf16, #tpu.memory_space<vmem>>, %arg3: memref<1x128xf32, #tpu.memory_space<vmem>>, %arg4: memref<1x128xf32, #tpu.memory_space<vmem>>, %arg5: memref<1152x128xbf16, #tpu.memory_space<vmem>>, %arg6: memref<1x128xf32, #tpu.memory_space<vmem>>, %arg7: memref<1x128xf32, #tpu.memory_space<vmem>>, %arg8: memref<128x128xbf16, #tpu.memory_space<vmem>>, %arg9: memref<1x128xf32, #tpu.memory_space<vmem>>, %arg10: memref<1x128xf32, #tpu.memory_space<vmem>>, %arg11: memref<1x4x128xf32, #tpu.memory_space<vmem>>, %arg12: memref<6x6x128xbf16, #tpu.memory_space<vmem>>, %arg13: memref<4x4x128xbf16, #tpu.memory_space<vmem>>, %arg14: memref<4x1152xbf16, #tpu.memory_space<vmem>>) attributes {dimension_semantics = [#tpu.dimension_semantics<parallel>], iteration_bounds = array<i64: 2>, scalar_prefetch = 0 : i64, scratch_operands = 3 : i64, tpu.core_type = #tpu.core_type<tc>, window_params = [{transform_indices = @transform_0, window_bounds = array<i64: 1, 16, 128>}, {pipeline_mode = #tpu.pipeline_mode<synchronous>, transform_indices = @transform_1, window_bounds = array<i64: 1152, 128>}, {pipeline_mode = #tpu.pipeline_mode<synchronous>, transform_indices = @transform_2, window_bounds = array<i64: 1, 128>}, {pipeline_mode = #tpu.pipeline_mode<synchronous>, transform_indices = @transform_3, window_bounds = array<i64: 1, 128>}, {pipeline_mode = #tpu.pipeline_mode<synchronous>, transform_indices = @transform_4, window_bounds = array<i64: 1152, 128>}, {pipeline_mode = #tpu.pipeline_mode<synchronous>, transform_indices = @transform_5, window_bounds = array<i64: 1, 128>}, {pipeline_mode = #tpu.pipeline_mode<synchronous>, transform_indices = @transform_6, window_bounds = array<i64: 1, 128>}, {pipeline_mode = #tpu.pipeline_mode<synchronous>, transform_indices = @transform_7, window_bounds = array<i64: 128, 128>}, {pipeline_mode = #tpu.pipeline_mode<synchronous>, transform_indices = @transform_8, window_bounds = array<i64: 1, 128>}, {pipeline_mode = #tpu.pipeline_mode<synchronous>, transform_indices = @transform_9, window_bounds = array<i64: 1, 128>}, {transform_indices = @transform_10, window_bounds = array<i64: 1, 4, 128>}]} {
    %cst = arith.constant 0.000000e+00 : bf16
    %0 = vector.broadcast %cst : bf16 to vector<6x6x128xbf16>
    %c0 = arith.constant 0 : index
    %c0_0 = arith.constant 0 : index
    %c0_1 = arith.constant 0 : index
    %1 = vector.load %arg12[%c0, %c0_0, %c0_1] : memref<6x6x128xbf16, #tpu.memory_space<vmem>>, vector<6x6x128xbf16>
    tpu.vector_store %arg12[%c0, %c0_0, %c0_1], %0 {strides = array<i32>} : memref<6x6x128xbf16, #tpu.memory_space<vmem>>, vector<6x6x128xbf16>,
    %c0_2 = arith.constant 0 : index
    %c0_3 = arith.constant 0 : index
    %c0_4 = arith.constant 0 : index
    %2 = vector.load %arg1[%c0_2, %c0_3, %c0_4] : memref<1x16x128xf32, #tpu.memory_space<vmem>>, vector<1x16x128xf32>
    %3 = vector.shape_cast %2 : vector<1x16x128xf32> to vector<16x128xf32>
    %4 = arith.truncf %3 : vector<16x128xf32> to vector<16x128xbf16>
    %5 = vector.extract_strided_slice %4 {offsets = [0, 0], sizes = [4, 128], strides = [1, 1]} : vector<16x128xbf16> to vector<4x128xbf16>
    %6 = vector.shape_cast %5 : vector<4x128xbf16> to vector<1x4x128xbf16>
    %c1 = arith.constant 1 : index
    %c1_5 = arith.constant 1 : index
    %c0_6 = arith.constant 0 : index
    %7 = vector.load %arg12[%c1, %c1_5, %c0_6] : memref<6x6x128xbf16, #tpu.memory_space<vmem>>, vector<1x4x128xbf16>
    tpu.vector_store %arg12[%c1, %c1_5, %c0_6], %6 {strides = array<i32>} : memref<6x6x128xbf16, #tpu.memory_space<vmem>>, vector<1x4x128xbf16>,
    %8 = vector.extract_strided_slice %4 {offsets = [4, 0], sizes = [4, 128], strides = [1, 1]} : vector<16x128xbf16> to vector<4x128xbf16>
    %9 = vector.shape_cast %8 : vector<4x128xbf16> to vector<1x4x128xbf16>
    %c2 = arith.constant 2 : index
    %c1_7 = arith.constant 1 : index
    %c0_8 = arith.constant 0 : index
    %10 = vector.load %arg12[%c2, %c1_7, %c0_8] : memref<6x6x128xbf16, #tpu.memory_space<vmem>>, vector<1x4x128xbf16>
    tpu.vector_store %arg12[%c2, %c1_7, %c0_8], %9 {strides = array<i32>} : memref<6x6x128xbf16, #tpu.memory_space<vmem>>, vector<1x4x128xbf16>,
    %11 = vector.extract_strided_slice %4 {offsets = [8, 0], sizes = [4, 128], strides = [1, 1]} : vector<16x128xbf16> to vector<4x128xbf16>
    %12 = vector.shape_cast %11 : vector<4x128xbf16> to vector<1x4x128xbf16>
    %c3 = arith.constant 3 : index
    %c1_9 = arith.constant 1 : index
    %c0_10 = arith.constant 0 : index
    %13 = vector.load %arg12[%c3, %c1_9, %c0_10] : memref<6x6x128xbf16, #tpu.memory_space<vmem>>, vector<1x4x128xbf16>
    tpu.vector_store %arg12[%c3, %c1_9, %c0_10], %12 {strides = array<i32>} : memref<6x6x128xbf16, #tpu.memory_space<vmem>>, vector<1x4x128xbf16>,
    %14 = vector.extract_strided_slice %4 {offsets = [12, 0], sizes = [4, 128], strides = [1, 1]} : vector<16x128xbf16> to vector<4x128xbf16>
    %15 = vector.shape_cast %14 : vector<4x128xbf16> to vector<1x4x128xbf16>
    %c4 = arith.constant 4 : index
    %c1_11 = arith.constant 1 : index
    %c0_12 = arith.constant 0 : index
    %16 = vector.load %arg12[%c4, %c1_11, %c0_12] : memref<6x6x128xbf16, #tpu.memory_space<vmem>>, vector<1x4x128xbf16>
    tpu.vector_store %arg12[%c4, %c1_11, %c0_12], %15 {strides = array<i32>} : memref<6x6x128xbf16, #tpu.memory_space<vmem>>, vector<1x4x128xbf16>,
    %c0_13 = arith.constant 0 : index
    %c0_14 = arith.constant 0 : index
    %c0_15 = arith.constant 0 : index
    %17 = vector.load %arg12[%c0_13, %c0_14, %c0_15] : memref<6x6x128xbf16, #tpu.memory_space<vmem>>, vector<1x1x128xbf16>
    %18 = vector.shape_cast %17 : vector<1x1x128xbf16> to vector<1x128xbf16>
    %c0_16 = arith.constant 0 : index
    %c0_17 = arith.constant 0 : index
    %19 = vector.load %arg14[%c0_16, %c0_17] : memref<4x1152xbf16, #tpu.memory_space<vmem>>, vector<1x128xbf16>
    tpu.vector_store %arg14[%c0_16, %c0_17], %18 {strides = array<i32>} : memref<4x1152xbf16, #tpu.memory_space<vmem>>, vector<1x128xbf16>,
    %c0_18 = arith.constant 0 : index
    %c2_19 = arith.constant 2 : index
    %c0_20 = arith.constant 0 : index
    %20 = vector.load %arg12[%c0_18, %c2_19, %c0_20] : memref<6x6x128xbf16, #tpu.memory_space<vmem>>, vector<1x1x128xbf16>
    %21 = vector.shape_cast %20 : vector<1x1x128xbf16> to vector<1x128xbf16>
    %c1_21 = arith.constant 1 : index
    %c0_22 = arith.constant 0 : index
    %22 = vector.load %arg14[%c1_21, %c0_22] : memref<4x1152xbf16, #tpu.memory_space<vmem>>, vector<1x128xbf16>
    tpu.vector_store %arg14[%c1_21, %c0_22], %21 {strides = array<i32>} : memref<4x1152xbf16, #tpu.memory_space<vmem>>, vector<1x128xbf16>,
    %c0_23 = arith.constant 0 : index
    %c1_24 = arith.constant 1 : index
    %c0_25 = arith.constant 0 : index
    %23 = vector.load %arg12[%c0_23, %c1_24, %c0_25] : memref<6x6x128xbf16, #tpu.memory_space<vmem>>, vector<1x1x128xbf16>
    %24 = vector.shape_cast %23 : vector<1x1x128xbf16> to vector<1x128xbf16>
    %c0_26 = arith.constant 0 : index
    %c128 = arith.constant 128 : index
    %25 = vector.load %arg14[%c0_26, %c128] : memref<4x1152xbf16, #tpu.memory_space<vmem>>, vector<1x128xbf16>
    tpu.vector_store %arg14[%c0_26, %c128], %24 {strides = array<i32>} : memref<4x1152xbf16, #tpu.memory_space<vmem>>, vector<1x128xbf16>,
    %c0_27 = arith.constant 0 : index
    %c3_28 = arith.constant 3 : index
    %c0_29 = arith.constant 0 : index
    %26 = vector.load %arg12[%c0_27, %c3_28, %c0_29] : memref<6x6x128xbf16, #tpu.memory_space<vmem>>, vector<1x1x128xbf16>
    %27 = vector.shape_cast %26 : vector<1x1x128xbf16> to vector<1x128xbf16>
    %c1_30 = arith.constant 1 : index
    %c128_31 = arith.constant 128 : index
    %28 = vector.load %arg14[%c1_30, %c128_31] : memref<4x1152xbf16, #tpu.memory_space<vmem>>, vector<1x128xbf16>
    tpu.vector_store %arg14[%c1_30, %c128_31], %27 {strides = array<i32>} : memref<4x1152xbf16, #tpu.memory_space<vmem>>, vector<1x128xbf16>,
    %c0_32 = arith.constant 0 : index
    %c2_33 = arith.constant 2 : index
    %c0_34 = arith.constant 0 : index
    %29 = vector.load %arg12[%c0_32, %c2_33, %c0_34] : memref<6x6x128xbf16, #tpu.memory_space<vmem>>, vector<1x1x128xbf16>
    %30 = vector.shape_cast %29 : vector<1x1x128xbf16> to vector<1x128xbf16>
    %c0_35 = arith.constant 0 : index
    %c256 = arith.constant 256 : index
    %31 = vector.load %arg14[%c0_35, %c256] : memref<4x1152xbf16, #tpu.memory_space<vmem>>, vector<1x128xbf16>
    tpu.vector_store %arg14[%c0_35, %c256], %30 {strides = array<i32>} : memref<4x1152xbf16, #tpu.memory_space<vmem>>, vector<1x128xbf16>,
    %c0_36 = arith.constant 0 : index
    %c4_37 = arith.constant 4 : index
    %c0_38 = arith.constant 0 : index
    %32 = vector.load %arg12[%c0_36, %c4_37, %c0_38] : memref<6x6x128xbf16, #tpu.memory_space<vmem>>, vector<1x1x128xbf16>
    %33 = vector.shape_cast %32 : vector<1x1x128xbf16> to vector<1x128xbf16>
    %c1_39 = arith.constant 1 : index
    %c256_40 = arith.constant 256 : index
    %34 = vector.load %arg14[%c1_39, %c256_40] : memref<4x1152xbf16, #tpu.memory_space<vmem>>, vector<1x128xbf16>
    tpu.vector_store %arg14[%c1_39, %c256_40], %33 {strides = array<i32>} : memref<4x1152xbf16, #tpu.memory_space<vmem>>, vector<1x128xbf16>,
    %c1_41 = arith.constant 1 : index
    %c0_42 = arith.constant 0 : index
    %c0_43 = arith.constant 0 : index
    %35 = vector.load %arg12[%c1_41, %c0_42, %c0_43] : memref<6x6x128xbf16, #tpu.memory_space<vmem>>, vector<1x1x128xbf16>
    %36 = vector.shape_cast %35 : vector<1x1x128xbf16> to vector<1x128xbf16>
    %c0_44 = arith.constant 0 : index
    %c384 = arith.constant 384 : index
    %37 = vector.load %arg14[%c0_44, %c384] : memref<4x1152xbf16, #tpu.memory_space<vmem>>, vector<1x128xbf16>
    tpu.vector_store %arg14[%c0_44, %c384], %36 {strides = array<i32>} : memref<4x1152xbf16, #tpu.memory_space<vmem>>, vector<1x128xbf16>,
    %c1_45 = arith.constant 1 : index
    %c2_46 = arith.constant 2 : index
    %c0_47 = arith.constant 0 : index
    %38 = vector.load %arg12[%c1_45, %c2_46, %c0_47] : memref<6x6x128xbf16, #tpu.memory_space<vmem>>, vector<1x1x128xbf16>
    %39 = vector.shape_cast %38 : vector<1x1x128xbf16> to vector<1x128xbf16>
    %c1_48 = arith.constant 1 : index
    %c384_49 = arith.constant 384 : index
    %40 = vector.load %arg14[%c1_48, %c384_49] : memref<4x1152xbf16, #tpu.memory_space<vmem>>, vector<1x128xbf16>
    tpu.vector_store %arg14[%c1_48, %c384_49], %39 {strides = array<i32>} : memref<4x1152xbf16, #tpu.memory_space<vmem>>, vector<1x128xbf16>,
    %c1_50 = arith.constant 1 : index
    %c1_51 = arith.constant 1 : index
    %c0_52 = arith.constant 0 : index
    %41 = vector.load %arg12[%c1_50, %c1_51, %c0_52] : memref<6x6x128xbf16, #tpu.memory_space<vmem>>, vector<1x1x128xbf16>
    %42 = vector.shape_cast %41 : vector<1x1x128xbf16> to vector<1x128xbf16>
    %c0_53 = arith.constant 0 : index
    %c512 = arith.constant 512 : index
    %43 = vector.load %arg14[%c0_53, %c512] : memref<4x1152xbf16, #tpu.memory_space<vmem>>, vector<1x128xbf16>
    tpu.vector_store %arg14[%c0_53, %c512], %42 {strides = array<i32>} : memref<4x1152xbf16, #tpu.memory_space<vmem>>, vector<1x128xbf16>,
    %c1_54 = arith.constant 1 : index
    %c3_55 = arith.constant 3 : index
    %c0_56 = arith.constant 0 : index
    %44 = vector.load %arg12[%c1_54, %c3_55, %c0_56] : memref<6x6x128xbf16, #tpu.memory_space<vmem>>, vector<1x1x128xbf16>
    %45 = vector.shape_cast %44 : vector<1x1x128xbf16> to vector<1x128xbf16>
    %c1_57 = arith.constant 1 : index
    %c512_58 = arith.constant 512 : index
    %46 = vector.load %arg14[%c1_57, %c512_58] : memref<4x1152xbf16, #tpu.memory_space<vmem>>, vector<1x128xbf16>
    tpu.vector_store %arg14[%c1_57, %c512_58], %45 {strides = array<i32>} : memref<4x1152xbf16, #tpu.memory_space<vmem>>, vector<1x128xbf16>,
    %c1_59 = arith.constant 1 : index
    %c2_60 = arith.constant 2 : index
    %c0_61 = arith.constant 0 : index
    %47 = vector.load %arg12[%c1_59, %c2_60, %c0_61] : memref<6x6x128xbf16, #tpu.memory_space<vmem>>, vector<1x1x128xbf16>
    %48 = vector.shape_cast %47 : vector<1x1x128xbf16> to vector<1x128xbf16>
    %c0_62 = arith.constant 0 : index
    %c640 = arith.constant 640 : index
    %49 = vector.load %arg14[%c0_62, %c640] : memref<4x1152xbf16, #tpu.memory_space<vmem>>, vector<1x128xbf16>
    tpu.vector_store %arg14[%c0_62, %c640], %48 {strides = array<i32>} : memref<4x1152xbf16, #tpu.memory_space<vmem>>, vector<1x128xbf16>,
    %c1_63 = arith.constant 1 : index
    %c4_64 = arith.constant 4 : index
    %c0_65 = arith.constant 0 : index
    %50 = vector.load %arg12[%c1_63, %c4_64, %c0_65] : memref<6x6x128xbf16, #tpu.memory_space<vmem>>, vector<1x1x128xbf16>
    %51 = vector.shape_cast %50 : vector<1x1x128xbf16> to vector<1x128xbf16>
    %c1_66 = arith.constant 1 : index
    %c640_67 = arith.constant 640 : index
    %52 = vector.load %arg14[%c1_66, %c640_67] : memref<4x1152xbf16, #tpu.memory_space<vmem>>, vector<1x128xbf16>
    tpu.vector_store %arg14[%c1_66, %c640_67], %51 {strides = array<i32>} : memref<4x1152xbf16, #tpu.memory_space<vmem>>, vector<1x128xbf16>,
    %c2_68 = arith.constant 2 : index
    %c0_69 = arith.constant 0 : index
    %c0_70 = arith.constant 0 : index
    %53 = vector.load %arg12[%c2_68, %c0_69, %c0_70] : memref<6x6x128xbf16, #tpu.memory_space<vmem>>, vector<1x1x128xbf16>
    %54 = vector.shape_cast %53 : vector<1x1x128xbf16> to vector<1x128xbf16>
    %c0_71 = arith.constant 0 : index
    %c768 = arith.constant 768 : index
    %55 = vector.load %arg14[%c0_71, %c768] : memref<4x1152xbf16, #tpu.memory_space<vmem>>, vector<1x128xbf16>
    tpu.vector_store %arg14[%c0_71, %c768], %54 {strides = array<i32>} : memref<4x1152xbf16, #tpu.memory_space<vmem>>, vector<1x128xbf16>,
    %c2_72 = arith.constant 2 : index
    %c2_73 = arith.constant 2 : index
    %c0_74 = arith.constant 0 : index
    %56 = vector.load %arg12[%c2_72, %c2_73, %c0_74] : memref<6x6x128xbf16, #tpu.memory_space<vmem>>, vector<1x1x128xbf16>
    %57 = vector.shape_cast %56 : vector<1x1x128xbf16> to vector<1x128xbf16>
    %c1_75 = arith.constant 1 : index
    %c768_76 = arith.constant 768 : index
    %58 = vector.load %arg14[%c1_75, %c768_76] : memref<4x1152xbf16, #tpu.memory_space<vmem>>, vector<1x128xbf16>
    tpu.vector_store %arg14[%c1_75, %c768_76], %57 {strides = array<i32>} : memref<4x1152xbf16, #tpu.memory_space<vmem>>, vector<1x128xbf16>,
    %c2_77 = arith.constant 2 : index
    %c1_78 = arith.constant 1 : index
    %c0_79 = arith.constant 0 : index
    %59 = vector.load %arg12[%c2_77, %c1_78, %c0_79] : memref<6x6x128xbf16, #tpu.memory_space<vmem>>, vector<1x1x128xbf16>
    %60 = vector.shape_cast %59 : vector<1x1x128xbf16> to vector<1x128xbf16>
    %c0_80 = arith.constant 0 : index
    %c896 = arith.constant 896 : index
    %61 = vector.load %arg14[%c0_80, %c896] : memref<4x1152xbf16, #tpu.memory_space<vmem>>, vector<1x128xbf16>
    tpu.vector_store %arg14[%c0_80, %c896], %60 {strides = array<i32>} : memref<4x1152xbf16, #tpu.memory_space<vmem>>, vector<1x128xbf16>,
    %c2_81 = arith.constant 2 : index
    %c3_82 = arith.constant 3 : index
    %c0_83 = arith.constant 0 : index
    %62 = vector.load %arg12[%c2_81, %c3_82, %c0_83] : memref<6x6x128xbf16, #tpu.memory_space<vmem>>, vector<1x1x128xbf16>
    %63 = vector.shape_cast %62 : vector<1x1x128xbf16> to vector<1x128xbf16>
    %c1_84 = arith.constant 1 : index
    %c896_85 = arith.constant 896 : index
    %64 = vector.load %arg14[%c1_84, %c896_85] : memref<4x1152xbf16, #tpu.memory_space<vmem>>, vector<1x128xbf16>
    tpu.vector_store %arg14[%c1_84, %c896_85], %63 {strides = array<i32>} : memref<4x1152xbf16, #tpu.memory_space<vmem>>, vector<1x128xbf16>,
    %c2_86 = arith.constant 2 : index
    %c2_87 = arith.constant 2 : index
    %c0_88 = arith.constant 0 : index
    %65 = vector.load %arg12[%c2_86, %c2_87, %c0_88] : memref<6x6x128xbf16, #tpu.memory_space<vmem>>, vector<1x1x128xbf16>
    %66 = vector.shape_cast %65 : vector<1x1x128xbf16> to vector<1x128xbf16>
    %c0_89 = arith.constant 0 : index
    %c1024 = arith.constant 1024 : index
    %67 = vector.load %arg14[%c0_89, %c1024] : memref<4x1152xbf16, #tpu.memory_space<vmem>>, vector<1x128xbf16>
    tpu.vector_store %arg14[%c0_89, %c1024], %66 {strides = array<i32>} : memref<4x1152xbf16, #tpu.memory_space<vmem>>, vector<1x128xbf16>,
    %c2_90 = arith.constant 2 : index
    %c4_91 = arith.constant 4 : index
    %c0_92 = arith.constant 0 : index
    %68 = vector.load %arg12[%c2_90, %c4_91, %c0_92] : memref<6x6x128xbf16, #tpu.memory_space<vmem>>, vector<1x1x128xbf16>
    %69 = vector.shape_cast %68 : vector<1x1x128xbf16> to vector<1x128xbf16>
    %c1_93 = arith.constant 1 : index
    %c1024_94 = arith.constant 1024 : index
    %70 = vector.load %arg14[%c1_93, %c1024_94] : memref<4x1152xbf16, #tpu.memory_space<vmem>>, vector<1x128xbf16>
    tpu.vector_store %arg14[%c1_93, %c1024_94], %69 {strides = array<i32>} : memref<4x1152xbf16, #tpu.memory_space<vmem>>, vector<1x128xbf16>,
    %c2_95 = arith.constant 2 : index
    %c0_96 = arith.constant 0 : index
    %c0_97 = arith.constant 0 : index
    %71 = vector.load %arg12[%c2_95, %c0_96, %c0_97] : memref<6x6x128xbf16, #tpu.memory_space<vmem>>, vector<1x1x128xbf16>
    %72 = vector.shape_cast %71 : vector<1x1x128xbf16> to vector<1x128xbf16>
    %c2_98 = arith.constant 2 : index
    %c0_99 = arith.constant 0 : index
    %73 = vector.load %arg14[%c2_98, %c0_99] : memref<4x1152xbf16, #tpu.memory_space<vmem>>, vector<1x128xbf16>
    tpu.vector_store %arg14[%c2_98, %c0_99], %72 {strides = array<i32>} : memref<4x1152xbf16, #tpu.memory_space<vmem>>, vector<1x128xbf16>,
    %c2_100 = arith.constant 2 : index
    %c2_101 = arith.constant 2 : index
    %c0_102 = arith.constant 0 : index
    %74 = vector.load %arg12[%c2_100, %c2_101, %c0_102] : memref<6x6x128xbf16, #tpu.memory_space<vmem>>, vector<1x1x128xbf16>
    %75 = vector.shape_cast %74 : vector<1x1x128xbf16> to vector<1x128xbf16>
    %c3_103 = arith.constant 3 : index
    %c0_104 = arith.constant 0 : index
    %76 = vector.load %arg14[%c3_103, %c0_104] : memref<4x1152xbf16, #tpu.memory_space<vmem>>, vector<1x128xbf16>
    tpu.vector_store %arg14[%c3_103, %c0_104], %75 {strides = array<i32>} : memref<4x1152xbf16, #tpu.memory_space<vmem>>, vector<1x128xbf16>,
    %c2_105 = arith.constant 2 : index
    %c1_106 = arith.constant 1 : index
    %c0_107 = arith.constant 0 : index
    %77 = vector.load %arg12[%c2_105, %c1_106, %c0_107] : memref<6x6x128xbf16, #tpu.memory_space<vmem>>, vector<1x1x128xbf16>
    %78 = vector.shape_cast %77 : vector<1x1x128xbf16> to vector<1x128xbf16>
    %c2_108 = arith.constant 2 : index
    %c128_109 = arith.constant 128 : index
    %79 = vector.load %arg14[%c2_108, %c128_109] : memref<4x1152xbf16, #tpu.memory_space<vmem>>, vector<1x128xbf16>
    tpu.vector_store %arg14[%c2_108, %c128_109], %78 {strides = array<i32>} : memref<4x1152xbf16, #tpu.memory_space<vmem>>, vector<1x128xbf16>,
    %c2_110 = arith.constant 2 : index
    %c3_111 = arith.constant 3 : index
    %c0_112 = arith.constant 0 : index
    %80 = vector.load %arg12[%c2_110, %c3_111, %c0_112] : memref<6x6x128xbf16, #tpu.memory_space<vmem>>, vector<1x1x128xbf16>
    %81 = vector.shape_cast %80 : vector<1x1x128xbf16> to vector<1x128xbf16>
    %c3_113 = arith.constant 3 : index
    %c128_114 = arith.constant 128 : index
    %82 = vector.load %arg14[%c3_113, %c128_114] : memref<4x1152xbf16, #tpu.memory_space<vmem>>, vector<1x128xbf16>
    tpu.vector_store %arg14[%c3_113, %c128_114], %81 {strides = array<i32>} : memref<4x1152xbf16, #tpu.memory_space<vmem>>, vector<1x128xbf16>,
    %c2_115 = arith.constant 2 : index
    %c2_116 = arith.constant 2 : index
    %c0_117 = arith.constant 0 : index
    %83 = vector.load %arg12[%c2_115, %c2_116, %c0_117] : memref<6x6x128xbf16, #tpu.memory_space<vmem>>, vector<1x1x128xbf16>
    %84 = vector.shape_cast %83 : vector<1x1x128xbf16> to vector<1x128xbf16>
    %c2_118 = arith.constant 2 : index
    %c256_119 = arith.constant 256 : index
    %85 = vector.load %arg14[%c2_118, %c256_119] : memref<4x1152xbf16, #tpu.memory_space<vmem>>, vector<1x128xbf16>
    tpu.vector_store %arg14[%c2_118, %c256_119], %84 {strides = array<i32>} : memref<4x1152xbf16, #tpu.memory_space<vmem>>, vector<1x128xbf16>,
    %c2_120 = arith.constant 2 : index
    %c4_121 = arith.constant 4 : index
    %c0_122 = arith.constant 0 : index
    %86 = vector.load %arg12[%c2_120, %c4_121, %c0_122] : memref<6x6x128xbf16, #tpu.memory_space<vmem>>, vector<1x1x128xbf16>
    %87 = vector.shape_cast %86 : vector<1x1x128xbf16> to vector<1x128xbf16>
    %c3_123 = arith.constant 3 : index
    %c256_124 = arith.constant 256 : index
    %88 = vector.load %arg14[%c3_123, %c256_124] : memref<4x1152xbf16, #tpu.memory_space<vmem>>, vector<1x128xbf16>
    tpu.vector_store %arg14[%c3_123, %c256_124], %87 {strides = array<i32>} : memref<4x1152xbf16, #tpu.memory_space<vmem>>, vector<1x128xbf16>,
    %c3_125 = arith.constant 3 : index
    %c0_126 = arith.constant 0 : index
    %c0_127 = arith.constant 0 : index
    %89 = vector.load %arg12[%c3_125, %c0_126, %c0_127] : memref<6x6x128xbf16, #tpu.memory_space<vmem>>, vector<1x1x128xbf16>
    %90 = vector.shape_cast %89 : vector<1x1x128xbf16> to vector<1x128xbf16>
    %c2_128 = arith.constant 2 : index
    %c384_129 = arith.constant 384 : index
    %91 = vector.load %arg14[%c2_128, %c384_129] : memref<4x1152xbf16, #tpu.memory_space<vmem>>, vector<1x128xbf16>
    tpu.vector_store %arg14[%c2_128, %c384_129], %90 {strides = array<i32>} : memref<4x1152xbf16, #tpu.memory_space<vmem>>, vector<1x128xbf16>,
    %c3_130 = arith.constant 3 : index
    %c2_131 = arith.constant 2 : index
    %c0_132 = arith.constant 0 : index
    %92 = vector.load %arg12[%c3_130, %c2_131, %c0_132] : memref<6x6x128xbf16, #tpu.memory_space<vmem>>, vector<1x1x128xbf16>
    %93 = vector.shape_cast %92 : vector<1x1x128xbf16> to vector<1x128xbf16>
    %c3_133 = arith.constant 3 : index
    %c384_134 = arith.constant 384 : index
    %94 = vector.load %arg14[%c3_133, %c384_134] : memref<4x1152xbf16, #tpu.memory_space<vmem>>, vector<1x128xbf16>
    tpu.vector_store %arg14[%c3_133, %c384_134], %93 {strides = array<i32>} : memref<4x1152xbf16, #tpu.memory_space<vmem>>, vector<1x128xbf16>,
    %c3_135 = arith.constant 3 : index
    %c1_136 = arith.constant 1 : index
    %c0_137 = arith.constant 0 : index
    %95 = vector.load %arg12[%c3_135, %c1_136, %c0_137] : memref<6x6x128xbf16, #tpu.memory_space<vmem>>, vector<1x1x128xbf16>
    %96 = vector.shape_cast %95 : vector<1x1x128xbf16> to vector<1x128xbf16>
    %c2_138 = arith.constant 2 : index
    %c512_139 = arith.constant 512 : index
    %97 = vector.load %arg14[%c2_138, %c512_139] : memref<4x1152xbf16, #tpu.memory_space<vmem>>, vector<1x128xbf16>
    tpu.vector_store %arg14[%c2_138, %c512_139], %96 {strides = array<i32>} : memref<4x1152xbf16, #tpu.memory_space<vmem>>, vector<1x128xbf16>,
    %c3_140 = arith.constant 3 : index
    %c3_141 = arith.constant 3 : index
    %c0_142 = arith.constant 0 : index
    %98 = vector.load %arg12[%c3_140, %c3_141, %c0_142] : memref<6x6x128xbf16, #tpu.memory_space<vmem>>, vector<1x1x128xbf16>
    %99 = vector.shape_cast %98 : vector<1x1x128xbf16> to vector<1x128xbf16>
    %c3_143 = arith.constant 3 : index
    %c512_144 = arith.constant 512 : index
    %100 = vector.load %arg14[%c3_143, %c512_144] : memref<4x1152xbf16, #tpu.memory_space<vmem>>, vector<1x128xbf16>
    tpu.vector_store %arg14[%c3_143, %c512_144], %99 {strides = array<i32>} : memref<4x1152xbf16, #tpu.memory_space<vmem>>, vector<1x128xbf16>,
    %c3_145 = arith.constant 3 : index
    %c2_146 = arith.constant 2 : index
    %c0_147 = arith.constant 0 : index
    %101 = vector.load %arg12[%c3_145, %c2_146, %c0_147] : memref<6x6x128xbf16, #tpu.memory_space<vmem>>, vector<1x1x128xbf16>
    %102 = vector.shape_cast %101 : vector<1x1x128xbf16> to vector<1x128xbf16>
    %c2_148 = arith.constant 2 : index
    %c640_149 = arith.constant 640 : index
    %103 = vector.load %arg14[%c2_148, %c640_149] : memref<4x1152xbf16, #tpu.memory_space<vmem>>, vector<1x128xbf16>
    tpu.vector_store %arg14[%c2_148, %c640_149], %102 {strides = array<i32>} : memref<4x1152xbf16, #tpu.memory_space<vmem>>, vector<1x128xbf16>,
    %c3_150 = arith.constant 3 : index
    %c4_151 = arith.constant 4 : index
    %c0_152 = arith.constant 0 : index
    %104 = vector.load %arg12[%c3_150, %c4_151, %c0_152] : memref<6x6x128xbf16, #tpu.memory_space<vmem>>, vector<1x1x128xbf16>
    %105 = vector.shape_cast %104 : vector<1x1x128xbf16> to vector<1x128xbf16>
    %c3_153 = arith.constant 3 : index
    %c640_154 = arith.constant 640 : index
    %106 = vector.load %arg14[%c3_153, %c640_154] : memref<4x1152xbf16, #tpu.memory_space<vmem>>, vector<1x128xbf16>
    tpu.vector_store %arg14[%c3_153, %c640_154], %105 {strides = array<i32>} : memref<4x1152xbf16, #tpu.memory_space<vmem>>, vector<1x128xbf16>,
    %c4_155 = arith.constant 4 : index
    %c0_156 = arith.constant 0 : index
    %c0_157 = arith.constant 0 : index
    %107 = vector.load %arg12[%c4_155, %c0_156, %c0_157] : memref<6x6x128xbf16, #tpu.memory_space<vmem>>, vector<1x1x128xbf16>
    %108 = vector.shape_cast %107 : vector<1x1x128xbf16> to vector<1x128xbf16>
    %c2_158 = arith.constant 2 : index
    %c768_159 = arith.constant 768 : index
    %109 = vector.load %arg14[%c2_158, %c768_159] : memref<4x1152xbf16, #tpu.memory_space<vmem>>, vector<1x128xbf16>
    tpu.vector_store %arg14[%c2_158, %c768_159], %108 {strides = array<i32>} : memref<4x1152xbf16, #tpu.memory_space<vmem>>, vector<1x128xbf16>,
    %c4_160 = arith.constant 4 : index
    %c2_161 = arith.constant 2 : index
    %c0_162 = arith.constant 0 : index
    %110 = vector.load %arg12[%c4_160, %c2_161, %c0_162] : memref<6x6x128xbf16, #tpu.memory_space<vmem>>, vector<1x1x128xbf16>
    %111 = vector.shape_cast %110 : vector<1x1x128xbf16> to vector<1x128xbf16>
    %c3_163 = arith.constant 3 : index
    %c768_164 = arith.constant 768 : index
    %112 = vector.load %arg14[%c3_163, %c768_164] : memref<4x1152xbf16, #tpu.memory_space<vmem>>, vector<1x128xbf16>
    tpu.vector_store %arg14[%c3_163, %c768_164], %111 {strides = array<i32>} : memref<4x1152xbf16, #tpu.memory_space<vmem>>, vector<1x128xbf16>,
    %c4_165 = arith.constant 4 : index
    %c1_166 = arith.constant 1 : index
    %c0_167 = arith.constant 0 : index
    %113 = vector.load %arg12[%c4_165, %c1_166, %c0_167] : memref<6x6x128xbf16, #tpu.memory_space<vmem>>, vector<1x1x128xbf16>
    %114 = vector.shape_cast %113 : vector<1x1x128xbf16> to vector<1x128xbf16>
    %c2_168 = arith.constant 2 : index
    %c896_169 = arith.constant 896 : index
    %115 = vector.load %arg14[%c2_168, %c896_169] : memref<4x1152xbf16, #tpu.memory_space<vmem>>, vector<1x128xbf16>
    tpu.vector_store %arg14[%c2_168, %c896_169], %114 {strides = array<i32>} : memref<4x1152xbf16, #tpu.memory_space<vmem>>, vector<1x128xbf16>,
    %c4_170 = arith.constant 4 : index
    %c3_171 = arith.constant 3 : index
    %c0_172 = arith.constant 0 : index
    %116 = vector.load %arg12[%c4_170, %c3_171, %c0_172] : memref<6x6x128xbf16, #tpu.memory_space<vmem>>, vector<1x1x128xbf16>
    %117 = vector.shape_cast %116 : vector<1x1x128xbf16> to vector<1x128xbf16>
    %c3_173 = arith.constant 3 : index
    %c896_174 = arith.constant 896 : index
    %118 = vector.load %arg14[%c3_173, %c896_174] : memref<4x1152xbf16, #tpu.memory_space<vmem>>, vector<1x128xbf16>
    tpu.vector_store %arg14[%c3_173, %c896_174], %117 {strides = array<i32>} : memref<4x1152xbf16, #tpu.memory_space<vmem>>, vector<1x128xbf16>,
    %c4_175 = arith.constant 4 : index
    %c2_176 = arith.constant 2 : index
    %c0_177 = arith.constant 0 : index
    %119 = vector.load %arg12[%c4_175, %c2_176, %c0_177] : memref<6x6x128xbf16, #tpu.memory_space<vmem>>, vector<1x1x128xbf16>
    %120 = vector.shape_cast %119 : vector<1x1x128xbf16> to vector<1x128xbf16>
    %c2_178 = arith.constant 2 : index
    %c1024_179 = arith.constant 1024 : index
    %121 = vector.load %arg14[%c2_178, %c1024_179] : memref<4x1152xbf16, #tpu.memory_space<vmem>>, vector<1x128xbf16>
    tpu.vector_store %arg14[%c2_178, %c1024_179], %120 {strides = array<i32>} : memref<4x1152xbf16, #tpu.memory_space<vmem>>, vector<1x128xbf16>,
    %c4_180 = arith.constant 4 : index
    %c4_181 = arith.constant 4 : index
    %c0_182 = arith.constant 0 : index
    %122 = vector.load %arg12[%c4_180, %c4_181, %c0_182] : memref<6x6x128xbf16, #tpu.memory_space<vmem>>, vector<1x1x128xbf16>
    %123 = vector.shape_cast %122 : vector<1x1x128xbf16> to vector<1x128xbf16>
    %c3_183 = arith.constant 3 : index
    %c1024_184 = arith.constant 1024 : index
    %124 = vector.load %arg14[%c3_183, %c1024_184] : memref<4x1152xbf16, #tpu.memory_space<vmem>>, vector<1x128xbf16>
    tpu.vector_store %arg14[%c3_183, %c1024_184], %123 {strides = array<i32>} : memref<4x1152xbf16, #tpu.memory_space<vmem>>, vector<1x128xbf16>,
    %c0_185 = arith.constant 0 : index
    %c0_186 = arith.constant 0 : index
    %125 = vector.load %arg14[%c0_185, %c0_186] : memref<4x1152xbf16, #tpu.memory_space<vmem>>, vector<4x1152xbf16>
    %c0_187 = arith.constant 0 : index
    %c0_188 = arith.constant 0 : index
    %126 = vector.load %arg2[%c0_187, %c0_188] : memref<1152x128xbf16, #tpu.memory_space<vmem>>, vector<1152x128xbf16>
    %cst_189 = arith.constant dense<0.000000e+00> : vector<4x128xf32>
    %127 = tpu.matmul %125, %126, %cst_189 {dimension_numbers = #tpu.dot_dimension_numbers<[1], [0], [0], [1], [0, 0, 1, 1], [], []>} : vector<4x1152xbf16>, vector<1152x128xbf16>, vector<4x128xf32> -> vector<4x128xf32>
    %c0_190 = arith.constant 0 : index
    %c0_191 = arith.constant 0 : index
    %128 = vector.load %arg3[%c0_190, %c0_191] : memref<1x128xf32, #tpu.memory_space<vmem>>, vector<1x128xf32>
    %129 = vector.broadcast %128 : vector<1x128xf32> to vector<4x128xf32>
    %130 = arith.mulf %127, %129 : vector<4x128xf32>
    %c0_192 = arith.constant 0 : index
    %c0_193 = arith.constant 0 : index
    %131 = vector.load %arg4[%c0_192, %c0_193] : memref<1x128xf32, #tpu.memory_space<vmem>>, vector<1x128xf32>
    %132 = vector.broadcast %131 : vector<1x128xf32> to vector<4x128xf32>
    %133 = arith.addf %130, %132 : vector<4x128xf32>
    %cst_194 = arith.constant 0.000000e+00 : f32
    %134 = vector.broadcast %cst_194 : f32 to vector<4x128xf32>
    %135 = arith.maximumf %133, %134 : vector<4x128xf32>
    %cst_195 = arith.constant 0.000000e+00 : bf16
    %136 = vector.broadcast %cst_195 : bf16 to vector<4x4x128xbf16>
    %c0_196 = arith.constant 0 : index
    %c0_197 = arith.constant 0 : index
    %c0_198 = arith.constant 0 : index
    %137 = vector.load %arg13[%c0_196, %c0_197, %c0_198] : memref<4x4x128xbf16, #tpu.memory_space<vmem>>, vector<4x4x128xbf16>
    tpu.vector_store %arg13[%c0_196, %c0_197, %c0_198], %136 {strides = array<i32>} : memref<4x4x128xbf16, #tpu.memory_space<vmem>>, vector<4x4x128xbf16>,
    %138 = arith.truncf %135 : vector<4x128xf32> to vector<4x128xbf16>
    %139 = vector.extract_strided_slice %138 {offsets = [0, 0], sizes = [2, 128], strides = [1, 1]} : vector<4x128xbf16> to vector<2x128xbf16>
    %140 = vector.shape_cast %139 : vector<2x128xbf16> to vector<1x2x128xbf16>
    %c1_199 = arith.constant 1 : index
    %c1_200 = arith.constant 1 : index
    %c0_201 = arith.constant 0 : index
    %141 = vector.load %arg13[%c1_199, %c1_200, %c0_201] : memref<4x4x128xbf16, #tpu.memory_space<vmem>>, vector<1x2x128xbf16>
    tpu.vector_store %arg13[%c1_199, %c1_200, %c0_201], %140 {strides = array<i32>} : memref<4x4x128xbf16, #tpu.memory_space<vmem>>, vector<1x2x128xbf16>,
    %142 = vector.extract_strided_slice %138 {offsets = [2, 0], sizes = [2, 128], strides = [1, 1]} : vector<4x128xbf16> to vector<2x128xbf16>
    %143 = vector.shape_cast %142 : vector<2x128xbf16> to vector<1x2x128xbf16>
    %c2_202 = arith.constant 2 : index
    %c1_203 = arith.constant 1 : index
    %c0_204 = arith.constant 0 : index
    %144 = vector.load %arg13[%c2_202, %c1_203, %c0_204] : memref<4x4x128xbf16, #tpu.memory_space<vmem>>, vector<1x2x128xbf16>
    tpu.vector_store %arg13[%c2_202, %c1_203, %c0_204], %143 {strides = array<i32>} : memref<4x4x128xbf16, #tpu.memory_space<vmem>>, vector<1x2x128xbf16>,
    %c0_205 = arith.constant 0 : index
    %c0_206 = arith.constant 0 : index
    %c0_207 = arith.constant 0 : index
    %145 = vector.load %arg13[%c0_205, %c0_206, %c0_207] : memref<4x4x128xbf16, #tpu.memory_space<vmem>>, vector<1x2x128xbf16>
    %146 = vector.shape_cast %145 : vector<1x2x128xbf16> to vector<2x128xbf16>
    %c0_208 = arith.constant 0 : index
    %c0_209 = arith.constant 0 : index
    %147 = vector.load %arg14[%c0_208, %c0_209] : memref<4x1152xbf16, #tpu.memory_space<vmem>>, vector<2x128xbf16>
    tpu.vector_store %arg14[%c0_208, %c0_209], %146 {strides = array<i32>} : memref<4x1152xbf16, #tpu.memory_space<vmem>>, vector<2x128xbf16>,
    %c0_210 = arith.constant 0 : index
    %c1_211 = arith.constant 1 : index
    %c0_212 = arith.constant 0 : index
    %148 = vector.load %arg13[%c0_210, %c1_211, %c0_212] : memref<4x4x128xbf16, #tpu.memory_space<vmem>>, vector<1x2x128xbf16>
    %149 = vector.shape_cast %148 : vector<1x2x128xbf16> to vector<2x128xbf16>
    %c0_213 = arith.constant 0 : index
    %c128_214 = arith.constant 128 : index
    %150 = vector.load %arg14[%c0_213, %c128_214] : memref<4x1152xbf16, #tpu.memory_space<vmem>>, vector<2x128xbf16>
    tpu.vector_store %arg14[%c0_213, %c128_214], %149 {strides = array<i32>} : memref<4x1152xbf16, #tpu.memory_space<vmem>>, vector<2x128xbf16>,
    %c0_215 = arith.constant 0 : index
    %c2_216 = arith.constant 2 : index
    %c0_217 = arith.constant 0 : index
    %151 = vector.load %arg13[%c0_215, %c2_216, %c0_217] : memref<4x4x128xbf16, #tpu.memory_space<vmem>>, vector<1x2x128xbf16>
    %152 = vector.shape_cast %151 : vector<1x2x128xbf16> to vector<2x128xbf16>
    %c0_218 = arith.constant 0 : index
    %c256_219 = arith.constant 256 : index
    %153 = vector.load %arg14[%c0_218, %c256_219] : memref<4x1152xbf16, #tpu.memory_space<vmem>>, vector<2x128xbf16>
    tpu.vector_store %arg14[%c0_218, %c256_219], %152 {strides = array<i32>} : memref<4x1152xbf16, #tpu.memory_space<vmem>>, vector<2x128xbf16>,
    %c1_220 = arith.constant 1 : index
    %c0_221 = arith.constant 0 : index
    %c0_222 = arith.constant 0 : index
    %154 = vector.load %arg13[%c1_220, %c0_221, %c0_222] : memref<4x4x128xbf16, #tpu.memory_space<vmem>>, vector<1x2x128xbf16>
    %155 = vector.shape_cast %154 : vector<1x2x128xbf16> to vector<2x128xbf16>
    %c0_223 = arith.constant 0 : index
    %c384_224 = arith.constant 384 : index
    %156 = vector.load %arg14[%c0_223, %c384_224] : memref<4x1152xbf16, #tpu.memory_space<vmem>>, vector<2x128xbf16>
    tpu.vector_store %arg14[%c0_223, %c384_224], %155 {strides = array<i32>} : memref<4x1152xbf16, #tpu.memory_space<vmem>>, vector<2x128xbf16>,
    %c1_225 = arith.constant 1 : index
    %c1_226 = arith.constant 1 : index
    %c0_227 = arith.constant 0 : index
    %157 = vector.load %arg13[%c1_225, %c1_226, %c0_227] : memref<4x4x128xbf16, #tpu.memory_space<vmem>>, vector<1x2x128xbf16>
    %158 = vector.shape_cast %157 : vector<1x2x128xbf16> to vector<2x128xbf16>
    %c0_228 = arith.constant 0 : index
    %c512_229 = arith.constant 512 : index
    %159 = vector.load %arg14[%c0_228, %c512_229] : memref<4x1152xbf16, #tpu.memory_space<vmem>>, vector<2x128xbf16>
    tpu.vector_store %arg14[%c0_228, %c512_229], %158 {strides = array<i32>} : memref<4x1152xbf16, #tpu.memory_space<vmem>>, vector<2x128xbf16>,
    %c1_230 = arith.constant 1 : index
    %c2_231 = arith.constant 2 : index
    %c0_232 = arith.constant 0 : index
    %160 = vector.load %arg13[%c1_230, %c2_231, %c0_232] : memref<4x4x128xbf16, #tpu.memory_space<vmem>>, vector<1x2x128xbf16>
    %161 = vector.shape_cast %160 : vector<1x2x128xbf16> to vector<2x128xbf16>
    %c0_233 = arith.constant 0 : index
    %c640_234 = arith.constant 640 : index
    %162 = vector.load %arg14[%c0_233, %c640_234] : memref<4x1152xbf16, #tpu.memory_space<vmem>>, vector<2x128xbf16>
    tpu.vector_store %arg14[%c0_233, %c640_234], %161 {strides = array<i32>} : memref<4x1152xbf16, #tpu.memory_space<vmem>>, vector<2x128xbf16>,
    %c2_235 = arith.constant 2 : index
    %c0_236 = arith.constant 0 : index
    %c0_237 = arith.constant 0 : index
    %163 = vector.load %arg13[%c2_235, %c0_236, %c0_237] : memref<4x4x128xbf16, #tpu.memory_space<vmem>>, vector<1x2x128xbf16>
    %164 = vector.shape_cast %163 : vector<1x2x128xbf16> to vector<2x128xbf16>
    %c0_238 = arith.constant 0 : index
    %c768_239 = arith.constant 768 : index
    %165 = vector.load %arg14[%c0_238, %c768_239] : memref<4x1152xbf16, #tpu.memory_space<vmem>>, vector<2x128xbf16>
    tpu.vector_store %arg14[%c0_238, %c768_239], %164 {strides = array<i32>} : memref<4x1152xbf16, #tpu.memory_space<vmem>>, vector<2x128xbf16>,
    %c2_240 = arith.constant 2 : index
    %c1_241 = arith.constant 1 : index
    %c0_242 = arith.constant 0 : index
    %166 = vector.load %arg13[%c2_240, %c1_241, %c0_242] : memref<4x4x128xbf16, #tpu.memory_space<vmem>>, vector<1x2x128xbf16>
    %167 = vector.shape_cast %166 : vector<1x2x128xbf16> to vector<2x128xbf16>
    %c0_243 = arith.constant 0 : index
    %c896_244 = arith.constant 896 : index
    %168 = vector.load %arg14[%c0_243, %c896_244] : memref<4x1152xbf16, #tpu.memory_space<vmem>>, vector<2x128xbf16>
    tpu.vector_store %arg14[%c0_243, %c896_244], %167 {strides = array<i32>} : memref<4x1152xbf16, #tpu.memory_space<vmem>>, vector<2x128xbf16>,
    %c2_245 = arith.constant 2 : index
    %c2_246 = arith.constant 2 : index
    %c0_247 = arith.constant 0 : index
    %169 = vector.load %arg13[%c2_245, %c2_246, %c0_247] : memref<4x4x128xbf16, #tpu.memory_space<vmem>>, vector<1x2x128xbf16>
    %170 = vector.shape_cast %169 : vector<1x2x128xbf16> to vector<2x128xbf16>
    %c0_248 = arith.constant 0 : index
    %c1024_249 = arith.constant 1024 : index
    %171 = vector.load %arg14[%c0_248, %c1024_249] : memref<4x1152xbf16, #tpu.memory_space<vmem>>, vector<2x128xbf16>
    tpu.vector_store %arg14[%c0_248, %c1024_249], %170 {strides = array<i32>} : memref<4x1152xbf16, #tpu.memory_space<vmem>>, vector<2x128xbf16>,
    %c1_250 = arith.constant 1 : index
    %c0_251 = arith.constant 0 : index
    %c0_252 = arith.constant 0 : index
    %172 = vector.load %arg13[%c1_250, %c0_251, %c0_252] : memref<4x4x128xbf16, #tpu.memory_space<vmem>>, vector<1x2x128xbf16>
    %173 = vector.shape_cast %172 : vector<1x2x128xbf16> to vector<2x128xbf16>
    %c2_253 = arith.constant 2 : index
    %c0_254 = arith.constant 0 : index
    %174 = vector.load %arg14[%c2_253, %c0_254] : memref<4x1152xbf16, #tpu.memory_space<vmem>>, vector<2x128xbf16>
    tpu.vector_store %arg14[%c2_253, %c0_254], %173 {strides = array<i32>} : memref<4x1152xbf16, #tpu.memory_space<vmem>>, vector<2x128xbf16>,
    %c1_255 = arith.constant 1 : index
    %c1_256 = arith.constant 1 : index
    %c0_257 = arith.constant 0 : index
    %175 = vector.load %arg13[%c1_255, %c1_256, %c0_257] : memref<4x4x128xbf16, #tpu.memory_space<vmem>>, vector<1x2x128xbf16>
    %176 = vector.shape_cast %175 : vector<1x2x128xbf16> to vector<2x128xbf16>
    %c2_258 = arith.constant 2 : index
    %c128_259 = arith.constant 128 : index
    %177 = vector.load %arg14[%c2_258, %c128_259] : memref<4x1152xbf16, #tpu.memory_space<vmem>>, vector<2x128xbf16>
    tpu.vector_store %arg14[%c2_258, %c128_259], %176 {strides = array<i32>} : memref<4x1152xbf16, #tpu.memory_space<vmem>>, vector<2x128xbf16>,
    %c1_260 = arith.constant 1 : index
    %c2_261 = arith.constant 2 : index
    %c0_262 = arith.constant 0 : index
    %178 = vector.load %arg13[%c1_260, %c2_261, %c0_262] : memref<4x4x128xbf16, #tpu.memory_space<vmem>>, vector<1x2x128xbf16>
    %179 = vector.shape_cast %178 : vector<1x2x128xbf16> to vector<2x128xbf16>
    %c2_263 = arith.constant 2 : index
    %c256_264 = arith.constant 256 : index
    %180 = vector.load %arg14[%c2_263, %c256_264] : memref<4x1152xbf16, #tpu.memory_space<vmem>>, vector<2x128xbf16>
    tpu.vector_store %arg14[%c2_263, %c256_264], %179 {strides = array<i32>} : memref<4x1152xbf16, #tpu.memory_space<vmem>>, vector<2x128xbf16>,
    %c2_265 = arith.constant 2 : index
    %c0_266 = arith.constant 0 : index
    %c0_267 = arith.constant 0 : index
    %181 = vector.load %arg13[%c2_265, %c0_266, %c0_267] : memref<4x4x128xbf16, #tpu.memory_space<vmem>>, vector<1x2x128xbf16>
    %182 = vector.shape_cast %181 : vector<1x2x128xbf16> to vector<2x128xbf16>
    %c2_268 = arith.constant 2 : index
    %c384_269 = arith.constant 384 : index
    %183 = vector.load %arg14[%c2_268, %c384_269] : memref<4x1152xbf16, #tpu.memory_space<vmem>>, vector<2x128xbf16>
    tpu.vector_store %arg14[%c2_268, %c384_269], %182 {strides = array<i32>} : memref<4x1152xbf16, #tpu.memory_space<vmem>>, vector<2x128xbf16>,
    %c2_270 = arith.constant 2 : index
    %c1_271 = arith.constant 1 : index
    %c0_272 = arith.constant 0 : index
    %184 = vector.load %arg13[%c2_270, %c1_271, %c0_272] : memref<4x4x128xbf16, #tpu.memory_space<vmem>>, vector<1x2x128xbf16>
    %185 = vector.shape_cast %184 : vector<1x2x128xbf16> to vector<2x128xbf16>
    %c2_273 = arith.constant 2 : index
    %c512_274 = arith.constant 512 : index
    %186 = vector.load %arg14[%c2_273, %c512_274] : memref<4x1152xbf16, #tpu.memory_space<vmem>>, vector<2x128xbf16>
    tpu.vector_store %arg14[%c2_273, %c512_274], %185 {strides = array<i32>} : memref<4x1152xbf16, #tpu.memory_space<vmem>>, vector<2x128xbf16>,
    %c2_275 = arith.constant 2 : index
    %c2_276 = arith.constant 2 : index
    %c0_277 = arith.constant 0 : index
    %187 = vector.load %arg13[%c2_275, %c2_276, %c0_277] : memref<4x4x128xbf16, #tpu.memory_space<vmem>>, vector<1x2x128xbf16>
    %188 = vector.shape_cast %187 : vector<1x2x128xbf16> to vector<2x128xbf16>
    %c2_278 = arith.constant 2 : index
    %c640_279 = arith.constant 640 : index
    %189 = vector.load %arg14[%c2_278, %c640_279] : memref<4x1152xbf16, #tpu.memory_space<vmem>>, vector<2x128xbf16>
    tpu.vector_store %arg14[%c2_278, %c640_279], %188 {strides = array<i32>} : memref<4x1152xbf16, #tpu.memory_space<vmem>>, vector<2x128xbf16>,
    %c3_280 = arith.constant 3 : index
    %c0_281 = arith.constant 0 : index
    %c0_282 = arith.constant 0 : index
    %190 = vector.load %arg13[%c3_280, %c0_281, %c0_282] : memref<4x4x128xbf16, #tpu.memory_space<vmem>>, vector<1x2x128xbf16>
    %191 = vector.shape_cast %190 : vector<1x2x128xbf16> to vector<2x128xbf16>
    %c2_283 = arith.constant 2 : index
    %c768_284 = arith.constant 768 : index
    %192 = vector.load %arg14[%c2_283, %c768_284] : memref<4x1152xbf16, #tpu.memory_space<vmem>>, vector<2x128xbf16>
    tpu.vector_store %arg14[%c2_283, %c768_284], %191 {strides = array<i32>} : memref<4x1152xbf16, #tpu.memory_space<vmem>>, vector<2x128xbf16>,
    %c3_285 = arith.constant 3 : index
    %c1_286 = arith.constant 1 : index
    %c0_287 = arith.constant 0 : index
    %193 = vector.load %arg13[%c3_285, %c1_286, %c0_287] : memref<4x4x128xbf16, #tpu.memory_space<vmem>>, vector<1x2x128xbf16>
    %194 = vector.shape_cast %193 : vector<1x2x128xbf16> to vector<2x128xbf16>
    %c2_288 = arith.constant 2 : index
    %c896_289 = arith.constant 896 : index
    %195 = vector.load %arg14[%c2_288, %c896_289] : memref<4x1152xbf16, #tpu.memory_space<vmem>>, vector<2x128xbf16>
    tpu.vector_store %arg14[%c2_288, %c896_289], %194 {strides = array<i32>} : memref<4x1152xbf16, #tpu.memory_space<vmem>>, vector<2x128xbf16>,
    %c3_290 = arith.constant 3 : index
    %c2_291 = arith.constant 2 : index
    %c0_292 = arith.constant 0 : index
    %196 = vector.load %arg13[%c3_290, %c2_291, %c0_292] : memref<4x4x128xbf16, #tpu.memory_space<vmem>>, vector<1x2x128xbf16>
    %197 = vector.shape_cast %196 : vector<1x2x128xbf16> to vector<2x128xbf16>
    %c2_293 = arith.constant 2 : index
    %c1024_294 = arith.constant 1024 : index
    %198 = vector.load %arg14[%c2_293, %c1024_294] : memref<4x1152xbf16, #tpu.memory_space<vmem>>, vector<2x128xbf16>
    tpu.vector_store %arg14[%c2_293, %c1024_294], %197 {strides = array<i32>} : memref<4x1152xbf16, #tpu.memory_space<vmem>>, vector<2x128xbf16>,
    %c0_295 = arith.constant 0 : index
    %c0_296 = arith.constant 0 : index
    %199 = vector.load %arg14[%c0_295, %c0_296] : memref<4x1152xbf16, #tpu.memory_space<vmem>>, vector<4x1152xbf16>
    %c0_297 = arith.constant 0 : index
    %c0_298 = arith.constant 0 : index
    %200 = vector.load %arg5[%c0_297, %c0_298] : memref<1152x128xbf16, #tpu.memory_space<vmem>>, vector<1152x128xbf16>
    %cst_299 = arith.constant dense<0.000000e+00> : vector<4x128xf32>
    %201 = tpu.matmul %199, %200, %cst_299 {dimension_numbers = #tpu.dot_dimension_numbers<[1], [0], [0], [1], [0, 0, 1, 1], [], []>} : vector<4x1152xbf16>, vector<1152x128xbf16>, vector<4x128xf32> -> vector<4x128xf32>
    %c0_300 = arith.constant 0 : index
    %c0_301 = arith.constant 0 : index
    %202 = vector.load %arg6[%c0_300, %c0_301] : memref<1x128xf32, #tpu.memory_space<vmem>>, vector<1x128xf32>
    %203 = vector.broadcast %202 : vector<1x128xf32> to vector<4x128xf32>
    %204 = arith.mulf %201, %203 : vector<4x128xf32>
    %c0_302 = arith.constant 0 : index
    %c0_303 = arith.constant 0 : index
    %205 = vector.load %arg7[%c0_302, %c0_303] : memref<1x128xf32, #tpu.memory_space<vmem>>, vector<1x128xf32>
    %206 = vector.broadcast %205 : vector<1x128xf32> to vector<4x128xf32>
    %207 = arith.addf %204, %206 : vector<4x128xf32>
    %208 = vector.extract_strided_slice %3 {offsets = [0, 0], sizes = [1, 128], strides = [1, 1]} : vector<16x128xf32> to vector<1x128xf32>
    %209 = vector.extract_strided_slice %3 {offsets = [2, 0], sizes = [1, 128], strides = [1, 1]} : vector<16x128xf32> to vector<1x128xf32>
    %210 = vector.extract_strided_slice %3 {offsets = [8, 0], sizes = [1, 128], strides = [1, 1]} : vector<16x128xf32> to vector<1x128xf32>
    %211 = vector.extract_strided_slice %3 {offsets = [10, 0], sizes = [1, 128], strides = [1, 1]} : vector<16x128xf32> to vector<1x128xf32>
    %212 = tpu.concatenate %208, %209, %210, %211 in 0 : vector<1x128xf32>, vector<1x128xf32>, vector<1x128xf32>, vector<1x128xf32> -> vector<4x128xf32>
    %213 = arith.truncf %212 : vector<4x128xf32> to vector<4x128xbf16>
    %c0_304 = arith.constant 0 : index
    %c0_305 = arith.constant 0 : index
    %214 = vector.load %arg8[%c0_304, %c0_305] : memref<128x128xbf16, #tpu.memory_space<vmem>>, vector<128x128xbf16>
    %cst_306 = arith.constant dense<0.000000e+00> : vector<4x128xf32>
    %215 = tpu.matmul %213, %214, %cst_306 {dimension_numbers = #tpu.dot_dimension_numbers<[1], [0], [0], [1], [0, 0, 1, 1], [], []>} : vector<4x128xbf16>, vector<128x128xbf16>, vector<4x128xf32> -> vector<4x128xf32>
    %c0_307 = arith.constant 0 : index
    %c0_308 = arith.constant 0 : index
    %216 = vector.load %arg9[%c0_307, %c0_308] : memref<1x128xf32, #tpu.memory_space<vmem>>, vector<1x128xf32>
    %217 = vector.broadcast %216 : vector<1x128xf32> to vector<4x128xf32>
    %218 = arith.mulf %215, %217 : vector<4x128xf32>
    %c0_309 = arith.constant 0 : index
    %c0_310 = arith.constant 0 : index
    %219 = vector.load %arg10[%c0_309, %c0_310] : memref<1x128xf32, #tpu.memory_space<vmem>>, vector<1x128xf32>
    %220 = vector.broadcast %219 : vector<1x128xf32> to vector<4x128xf32>
    %221 = arith.addf %218, %220 : vector<4x128xf32>
    %222 = arith.addf %207, %221 : vector<4x128xf32>
    %cst_311 = arith.constant 0.000000e+00 : f32
    %223 = vector.broadcast %cst_311 : f32 to vector<4x128xf32>
    %224 = arith.maximumf %222, %223 : vector<4x128xf32>
    %c0_312 = arith.constant 0 : index
    %c0_313 = arith.constant 0 : index
    %c0_314 = arith.constant 0 : index
    %225 = vector.load %arg11[%c0_312, %c0_313, %c0_314] : memref<1x4x128xf32, #tpu.memory_space<vmem>>, vector<1x4x128xf32>
    %226 = vector.shape_cast %225 : vector<1x4x128xf32> to vector<4x128xf32>
    %227 = vector.shape_cast %224 : vector<4x128xf32> to vector<1x4x128xf32>
    tpu.vector_store %arg11[%c0_312, %c0_313, %c0_314], %227 {strides = array<i32>} : memref<1x4x128xf32, #tpu.memory_space<vmem>>, vector<1x4x128xf32>,
    return
  }
  func.func @transform_0(%arg0: i32) -> (i32, i32, i32) {
    %c0_i32 = arith.constant 0 : i32
    %c0_i32_0 = arith.constant 0 : i32
    %c0_i32_1 = arith.constant 0 : i32
    return %arg0, %c0_i32, %c0_i32_0 : i32, i32, i32
  }
  func.func @transform_1(%arg0: i32) -> (i32, i32) {
    %c0_i32 = arith.constant 0 : i32
    %c0_i32_0 = arith.constant 0 : i32
    %c0_i32_1 = arith.constant 0 : i32
    return %c0_i32, %c0_i32_0 : i32, i32
  }
  func.func @transform_2(%arg0: i32) -> (i32, i32) {
    %c0_i32 = arith.constant 0 : i32
    %c0_i32_0 = arith.constant 0 : i32
    %c0_i32_1 = arith.constant 0 : i32
    return %c0_i32, %c0_i32_0 : i32, i32
  }
  func.func @transform_3(%arg0: i32) -> (i32, i32) {
    %c0_i32 = arith.constant 0 : i32
    %c0_i32_0 = arith.constant 0 : i32
    %c0_i32_1 = arith.constant 0 : i32
    return %c0_i32, %c0_i32_0 : i32, i32
  }
  func.func @transform_4(%arg0: i32) -> (i32, i32) {
    %c0_i32 = arith.constant 0 : i32
    %c0_i32_0 = arith.constant 0 : i32
    %c0_i32_1 = arith.constant 0 : i32
    return %c0_i32, %c0_i32_0 : i32, i32
  }
  func.func @transform_5(%arg0: i32) -> (i32, i32) {
    %c0_i32 = arith.constant 0 : i32
    %c0_i32_0 = arith.constant 0 : i32
    %c0_i32_1 = arith.constant 0 : i32
    return %c0_i32, %c0_i32_0 : i32, i32
  }
  func.func @transform_6(%arg0: i32) -> (i32, i32) {
    %c0_i32 = arith.constant 0 : i32
    %c0_i32_0 = arith.constant 0 : i32
    %c0_i32_1 = arith.constant 0 : i32
    return %c0_i32, %c0_i32_0 : i32, i32
  }
  func.func @transform_7(%arg0: i32) -> (i32, i32) {
    %c0_i32 = arith.constant 0 : i32
    %c0_i32_0 = arith.constant 0 : i32
    %c0_i32_1 = arith.constant 0 : i32
    return %c0_i32, %c0_i32_0 : i32, i32
  }
  func.func @transform_8(%arg0: i32) -> (i32, i32) {
    %c0_i32 = arith.constant 0 : i32
    %c0_i32_0 = arith.constant 0 : i32
    %c0_i32_1 = arith.constant 0 : i32
    return %c0_i32, %c0_i32_0 : i32, i32
  }
  func.func @transform_9(%arg0: i32) -> (i32, i32) {
    %c0_i32 = arith.constant 0 : i32
    %c0_i32_0 = arith.constant 0 : i32
    %c0_i32_1 = arith.constant 0 : i32
    return %c0_i32, %c0_i32_0 : i32, i32
  }
  func.func @transform_10(%arg0: i32) -> (i32, i32, i32) {
    %c0_i32 = arith.constant 0 : i32
    %c0_i32_0 = arith.constant 0 : i32
    %c0_i32_1 = arith.constant 0 : i32
    return %arg0, %c0_i32, %c0_i32_0 : i32, i32, i32
  }
}

module attributes {stable_mosaic.version = 11 : i64} {
  func.func @_basic_block_kernel(%arg0: i32, %arg1: memref<1x16x128xf32, #tpu.memory_space<vmem>>, %arg2: memref<1152x128xbf16, #tpu.memory_space<vmem>>, %arg3: memref<1x128xf32, #tpu.memory_space<vmem>>, %arg4: memref<1x128xf32, #tpu.memory_space<vmem>>, %arg5: memref<1152x128xbf16, #tpu.memory_space<vmem>>, %arg6: memref<1x128xf32, #tpu.memory_space<vmem>>, %arg7: memref<1x128xf32, #tpu.memory_space<vmem>>, %arg8: memref<1x16x128xf32, #tpu.memory_space<vmem>>, %arg9: memref<6x6x128xbf16, #tpu.memory_space<vmem>>, %arg10: memref<6x6x128xbf16, #tpu.memory_space<vmem>>, %arg11: memref<16x1152xbf16, #tpu.memory_space<vmem>>) attributes {dimension_semantics = [#tpu.dimension_semantics<parallel>], iteration_bounds = array<i64: 2>, scalar_prefetch = 0 : i64, scratch_operands = 3 : i64, tpu.core_type = #tpu.core_type<tc>, window_params = [{transform_indices = @transform_0, window_bounds = array<i64: 1, 16, 128>}, {pipeline_mode = #tpu.pipeline_mode<synchronous>, transform_indices = @transform_1, window_bounds = array<i64: 1152, 128>}, {pipeline_mode = #tpu.pipeline_mode<synchronous>, transform_indices = @transform_2, window_bounds = array<i64: 1, 128>}, {pipeline_mode = #tpu.pipeline_mode<synchronous>, transform_indices = @transform_3, window_bounds = array<i64: 1, 128>}, {pipeline_mode = #tpu.pipeline_mode<synchronous>, transform_indices = @transform_4, window_bounds = array<i64: 1152, 128>}, {pipeline_mode = #tpu.pipeline_mode<synchronous>, transform_indices = @transform_5, window_bounds = array<i64: 1, 128>}, {pipeline_mode = #tpu.pipeline_mode<synchronous>, transform_indices = @transform_6, window_bounds = array<i64: 1, 128>}, {transform_indices = @transform_7, window_bounds = array<i64: 1, 16, 128>}]} {
    %cst = arith.constant 0.000000e+00 : bf16
    %0 = vector.broadcast %cst : bf16 to vector<6x6x128xbf16>
    %c0 = arith.constant 0 : index
    %c0_0 = arith.constant 0 : index
    %c0_1 = arith.constant 0 : index
    %1 = vector.load %arg9[%c0, %c0_0, %c0_1] : memref<6x6x128xbf16, #tpu.memory_space<vmem>>, vector<6x6x128xbf16>
    tpu.vector_store %arg9[%c0, %c0_0, %c0_1], %0 {strides = array<i32>} : memref<6x6x128xbf16, #tpu.memory_space<vmem>>, vector<6x6x128xbf16>,
    %c0_2 = arith.constant 0 : index
    %c0_3 = arith.constant 0 : index
    %c0_4 = arith.constant 0 : index
    %2 = vector.load %arg1[%c0_2, %c0_3, %c0_4] : memref<1x16x128xf32, #tpu.memory_space<vmem>>, vector<1x16x128xf32>
    %3 = vector.shape_cast %2 : vector<1x16x128xf32> to vector<16x128xf32>
    %4 = arith.truncf %3 : vector<16x128xf32> to vector<16x128xbf16>
    %5 = vector.extract_strided_slice %4 {offsets = [0, 0], sizes = [4, 128], strides = [1, 1]} : vector<16x128xbf16> to vector<4x128xbf16>
    %6 = vector.shape_cast %5 : vector<4x128xbf16> to vector<1x4x128xbf16>
    %c1 = arith.constant 1 : index
    %c1_5 = arith.constant 1 : index
    %c0_6 = arith.constant 0 : index
    %7 = vector.load %arg9[%c1, %c1_5, %c0_6] : memref<6x6x128xbf16, #tpu.memory_space<vmem>>, vector<1x4x128xbf16>
    tpu.vector_store %arg9[%c1, %c1_5, %c0_6], %6 {strides = array<i32>} : memref<6x6x128xbf16, #tpu.memory_space<vmem>>, vector<1x4x128xbf16>,
    %8 = vector.extract_strided_slice %4 {offsets = [4, 0], sizes = [4, 128], strides = [1, 1]} : vector<16x128xbf16> to vector<4x128xbf16>
    %9 = vector.shape_cast %8 : vector<4x128xbf16> to vector<1x4x128xbf16>
    %c2 = arith.constant 2 : index
    %c1_7 = arith.constant 1 : index
    %c0_8 = arith.constant 0 : index
    %10 = vector.load %arg9[%c2, %c1_7, %c0_8] : memref<6x6x128xbf16, #tpu.memory_space<vmem>>, vector<1x4x128xbf16>
    tpu.vector_store %arg9[%c2, %c1_7, %c0_8], %9 {strides = array<i32>} : memref<6x6x128xbf16, #tpu.memory_space<vmem>>, vector<1x4x128xbf16>,
    %11 = vector.extract_strided_slice %4 {offsets = [8, 0], sizes = [4, 128], strides = [1, 1]} : vector<16x128xbf16> to vector<4x128xbf16>
    %12 = vector.shape_cast %11 : vector<4x128xbf16> to vector<1x4x128xbf16>
    %c3 = arith.constant 3 : index
    %c1_9 = arith.constant 1 : index
    %c0_10 = arith.constant 0 : index
    %13 = vector.load %arg9[%c3, %c1_9, %c0_10] : memref<6x6x128xbf16, #tpu.memory_space<vmem>>, vector<1x4x128xbf16>
    tpu.vector_store %arg9[%c3, %c1_9, %c0_10], %12 {strides = array<i32>} : memref<6x6x128xbf16, #tpu.memory_space<vmem>>, vector<1x4x128xbf16>,
    %14 = vector.extract_strided_slice %4 {offsets = [12, 0], sizes = [4, 128], strides = [1, 1]} : vector<16x128xbf16> to vector<4x128xbf16>
    %15 = vector.shape_cast %14 : vector<4x128xbf16> to vector<1x4x128xbf16>
    %c4 = arith.constant 4 : index
    %c1_11 = arith.constant 1 : index
    %c0_12 = arith.constant 0 : index
    %16 = vector.load %arg9[%c4, %c1_11, %c0_12] : memref<6x6x128xbf16, #tpu.memory_space<vmem>>, vector<1x4x128xbf16>
    tpu.vector_store %arg9[%c4, %c1_11, %c0_12], %15 {strides = array<i32>} : memref<6x6x128xbf16, #tpu.memory_space<vmem>>, vector<1x4x128xbf16>,
    %c0_13 = arith.constant 0 : index
    %c0_14 = arith.constant 0 : index
    %c0_15 = arith.constant 0 : index
    %17 = vector.load %arg9[%c0_13, %c0_14, %c0_15] : memref<6x6x128xbf16, #tpu.memory_space<vmem>>, vector<1x4x128xbf16>
    %18 = vector.shape_cast %17 : vector<1x4x128xbf16> to vector<4x128xbf16>
    %c0_16 = arith.constant 0 : index
    %c0_17 = arith.constant 0 : index
    %19 = vector.load %arg11[%c0_16, %c0_17] : memref<16x1152xbf16, #tpu.memory_space<vmem>>, vector<4x128xbf16>
    tpu.vector_store %arg11[%c0_16, %c0_17], %18 {strides = array<i32>} : memref<16x1152xbf16, #tpu.memory_space<vmem>>, vector<4x128xbf16>,
    %c0_18 = arith.constant 0 : index
    %c1_19 = arith.constant 1 : index
    %c0_20 = arith.constant 0 : index
    %20 = vector.load %arg9[%c0_18, %c1_19, %c0_20] : memref<6x6x128xbf16, #tpu.memory_space<vmem>>, vector<1x4x128xbf16>
    %21 = vector.shape_cast %20 : vector<1x4x128xbf16> to vector<4x128xbf16>
    %c0_21 = arith.constant 0 : index
    %c128 = arith.constant 128 : index
    %22 = vector.load %arg11[%c0_21, %c128] : memref<16x1152xbf16, #tpu.memory_space<vmem>>, vector<4x128xbf16>
    tpu.vector_store %arg11[%c0_21, %c128], %21 {strides = array<i32>} : memref<16x1152xbf16, #tpu.memory_space<vmem>>, vector<4x128xbf16>,
    %c0_22 = arith.constant 0 : index
    %c2_23 = arith.constant 2 : index
    %c0_24 = arith.constant 0 : index
    %23 = vector.load %arg9[%c0_22, %c2_23, %c0_24] : memref<6x6x128xbf16, #tpu.memory_space<vmem>>, vector<1x4x128xbf16>
    %24 = vector.shape_cast %23 : vector<1x4x128xbf16> to vector<4x128xbf16>
    %c0_25 = arith.constant 0 : index
    %c256 = arith.constant 256 : index
    %25 = vector.load %arg11[%c0_25, %c256] : memref<16x1152xbf16, #tpu.memory_space<vmem>>, vector<4x128xbf16>
    tpu.vector_store %arg11[%c0_25, %c256], %24 {strides = array<i32>} : memref<16x1152xbf16, #tpu.memory_space<vmem>>, vector<4x128xbf16>,
    %c1_26 = arith.constant 1 : index
    %c0_27 = arith.constant 0 : index
    %c0_28 = arith.constant 0 : index
    %26 = vector.load %arg9[%c1_26, %c0_27, %c0_28] : memref<6x6x128xbf16, #tpu.memory_space<vmem>>, vector<1x4x128xbf16>
    %27 = vector.shape_cast %26 : vector<1x4x128xbf16> to vector<4x128xbf16>
    %c0_29 = arith.constant 0 : index
    %c384 = arith.constant 384 : index
    %28 = vector.load %arg11[%c0_29, %c384] : memref<16x1152xbf16, #tpu.memory_space<vmem>>, vector<4x128xbf16>
    tpu.vector_store %arg11[%c0_29, %c384], %27 {strides = array<i32>} : memref<16x1152xbf16, #tpu.memory_space<vmem>>, vector<4x128xbf16>,
    %c1_30 = arith.constant 1 : index
    %c1_31 = arith.constant 1 : index
    %c0_32 = arith.constant 0 : index
    %29 = vector.load %arg9[%c1_30, %c1_31, %c0_32] : memref<6x6x128xbf16, #tpu.memory_space<vmem>>, vector<1x4x128xbf16>
    %30 = vector.shape_cast %29 : vector<1x4x128xbf16> to vector<4x128xbf16>
    %c0_33 = arith.constant 0 : index
    %c512 = arith.constant 512 : index
    %31 = vector.load %arg11[%c0_33, %c512] : memref<16x1152xbf16, #tpu.memory_space<vmem>>, vector<4x128xbf16>
    tpu.vector_store %arg11[%c0_33, %c512], %30 {strides = array<i32>} : memref<16x1152xbf16, #tpu.memory_space<vmem>>, vector<4x128xbf16>,
    %c1_34 = arith.constant 1 : index
    %c2_35 = arith.constant 2 : index
    %c0_36 = arith.constant 0 : index
    %32 = vector.load %arg9[%c1_34, %c2_35, %c0_36] : memref<6x6x128xbf16, #tpu.memory_space<vmem>>, vector<1x4x128xbf16>
    %33 = vector.shape_cast %32 : vector<1x4x128xbf16> to vector<4x128xbf16>
    %c0_37 = arith.constant 0 : index
    %c640 = arith.constant 640 : index
    %34 = vector.load %arg11[%c0_37, %c640] : memref<16x1152xbf16, #tpu.memory_space<vmem>>, vector<4x128xbf16>
    tpu.vector_store %arg11[%c0_37, %c640], %33 {strides = array<i32>} : memref<16x1152xbf16, #tpu.memory_space<vmem>>, vector<4x128xbf16>,
    %c2_38 = arith.constant 2 : index
    %c0_39 = arith.constant 0 : index
    %c0_40 = arith.constant 0 : index
    %35 = vector.load %arg9[%c2_38, %c0_39, %c0_40] : memref<6x6x128xbf16, #tpu.memory_space<vmem>>, vector<1x4x128xbf16>
    %36 = vector.shape_cast %35 : vector<1x4x128xbf16> to vector<4x128xbf16>
    %c0_41 = arith.constant 0 : index
    %c768 = arith.constant 768 : index
    %37 = vector.load %arg11[%c0_41, %c768] : memref<16x1152xbf16, #tpu.memory_space<vmem>>, vector<4x128xbf16>
    tpu.vector_store %arg11[%c0_41, %c768], %36 {strides = array<i32>} : memref<16x1152xbf16, #tpu.memory_space<vmem>>, vector<4x128xbf16>,
    %c2_42 = arith.constant 2 : index
    %c1_43 = arith.constant 1 : index
    %c0_44 = arith.constant 0 : index
    %38 = vector.load %arg9[%c2_42, %c1_43, %c0_44] : memref<6x6x128xbf16, #tpu.memory_space<vmem>>, vector<1x4x128xbf16>
    %39 = vector.shape_cast %38 : vector<1x4x128xbf16> to vector<4x128xbf16>
    %c0_45 = arith.constant 0 : index
    %c896 = arith.constant 896 : index
    %40 = vector.load %arg11[%c0_45, %c896] : memref<16x1152xbf16, #tpu.memory_space<vmem>>, vector<4x128xbf16>
    tpu.vector_store %arg11[%c0_45, %c896], %39 {strides = array<i32>} : memref<16x1152xbf16, #tpu.memory_space<vmem>>, vector<4x128xbf16>,
    %c2_46 = arith.constant 2 : index
    %c2_47 = arith.constant 2 : index
    %c0_48 = arith.constant 0 : index
    %41 = vector.load %arg9[%c2_46, %c2_47, %c0_48] : memref<6x6x128xbf16, #tpu.memory_space<vmem>>, vector<1x4x128xbf16>
    %42 = vector.shape_cast %41 : vector<1x4x128xbf16> to vector<4x128xbf16>
    %c0_49 = arith.constant 0 : index
    %c1024 = arith.constant 1024 : index
    %43 = vector.load %arg11[%c0_49, %c1024] : memref<16x1152xbf16, #tpu.memory_space<vmem>>, vector<4x128xbf16>
    tpu.vector_store %arg11[%c0_49, %c1024], %42 {strides = array<i32>} : memref<16x1152xbf16, #tpu.memory_space<vmem>>, vector<4x128xbf16>,
    %c1_50 = arith.constant 1 : index
    %c0_51 = arith.constant 0 : index
    %c0_52 = arith.constant 0 : index
    %44 = vector.load %arg9[%c1_50, %c0_51, %c0_52] : memref<6x6x128xbf16, #tpu.memory_space<vmem>>, vector<1x4x128xbf16>
    %45 = vector.shape_cast %44 : vector<1x4x128xbf16> to vector<4x128xbf16>
    %c4_53 = arith.constant 4 : index
    %c0_54 = arith.constant 0 : index
    %46 = vector.load %arg11[%c4_53, %c0_54] : memref<16x1152xbf16, #tpu.memory_space<vmem>>, vector<4x128xbf16>
    tpu.vector_store %arg11[%c4_53, %c0_54], %45 {strides = array<i32>} : memref<16x1152xbf16, #tpu.memory_space<vmem>>, vector<4x128xbf16>,
    %c1_55 = arith.constant 1 : index
    %c1_56 = arith.constant 1 : index
    %c0_57 = arith.constant 0 : index
    %47 = vector.load %arg9[%c1_55, %c1_56, %c0_57] : memref<6x6x128xbf16, #tpu.memory_space<vmem>>, vector<1x4x128xbf16>
    %48 = vector.shape_cast %47 : vector<1x4x128xbf16> to vector<4x128xbf16>
    %c4_58 = arith.constant 4 : index
    %c128_59 = arith.constant 128 : index
    %49 = vector.load %arg11[%c4_58, %c128_59] : memref<16x1152xbf16, #tpu.memory_space<vmem>>, vector<4x128xbf16>
    tpu.vector_store %arg11[%c4_58, %c128_59], %48 {strides = array<i32>} : memref<16x1152xbf16, #tpu.memory_space<vmem>>, vector<4x128xbf16>,
    %c1_60 = arith.constant 1 : index
    %c2_61 = arith.constant 2 : index
    %c0_62 = arith.constant 0 : index
    %50 = vector.load %arg9[%c1_60, %c2_61, %c0_62] : memref<6x6x128xbf16, #tpu.memory_space<vmem>>, vector<1x4x128xbf16>
    %51 = vector.shape_cast %50 : vector<1x4x128xbf16> to vector<4x128xbf16>
    %c4_63 = arith.constant 4 : index
    %c256_64 = arith.constant 256 : index
    %52 = vector.load %arg11[%c4_63, %c256_64] : memref<16x1152xbf16, #tpu.memory_space<vmem>>, vector<4x128xbf16>
    tpu.vector_store %arg11[%c4_63, %c256_64], %51 {strides = array<i32>} : memref<16x1152xbf16, #tpu.memory_space<vmem>>, vector<4x128xbf16>,
    %c2_65 = arith.constant 2 : index
    %c0_66 = arith.constant 0 : index
    %c0_67 = arith.constant 0 : index
    %53 = vector.load %arg9[%c2_65, %c0_66, %c0_67] : memref<6x6x128xbf16, #tpu.memory_space<vmem>>, vector<1x4x128xbf16>
    %54 = vector.shape_cast %53 : vector<1x4x128xbf16> to vector<4x128xbf16>
    %c4_68 = arith.constant 4 : index
    %c384_69 = arith.constant 384 : index
    %55 = vector.load %arg11[%c4_68, %c384_69] : memref<16x1152xbf16, #tpu.memory_space<vmem>>, vector<4x128xbf16>
    tpu.vector_store %arg11[%c4_68, %c384_69], %54 {strides = array<i32>} : memref<16x1152xbf16, #tpu.memory_space<vmem>>, vector<4x128xbf16>,
    %c2_70 = arith.constant 2 : index
    %c1_71 = arith.constant 1 : index
    %c0_72 = arith.constant 0 : index
    %56 = vector.load %arg9[%c2_70, %c1_71, %c0_72] : memref<6x6x128xbf16, #tpu.memory_space<vmem>>, vector<1x4x128xbf16>
    %57 = vector.shape_cast %56 : vector<1x4x128xbf16> to vector<4x128xbf16>
    %c4_73 = arith.constant 4 : index
    %c512_74 = arith.constant 512 : index
    %58 = vector.load %arg11[%c4_73, %c512_74] : memref<16x1152xbf16, #tpu.memory_space<vmem>>, vector<4x128xbf16>
    tpu.vector_store %arg11[%c4_73, %c512_74], %57 {strides = array<i32>} : memref<16x1152xbf16, #tpu.memory_space<vmem>>, vector<4x128xbf16>,
    %c2_75 = arith.constant 2 : index
    %c2_76 = arith.constant 2 : index
    %c0_77 = arith.constant 0 : index
    %59 = vector.load %arg9[%c2_75, %c2_76, %c0_77] : memref<6x6x128xbf16, #tpu.memory_space<vmem>>, vector<1x4x128xbf16>
    %60 = vector.shape_cast %59 : vector<1x4x128xbf16> to vector<4x128xbf16>
    %c4_78 = arith.constant 4 : index
    %c640_79 = arith.constant 640 : index
    %61 = vector.load %arg11[%c4_78, %c640_79] : memref<16x1152xbf16, #tpu.memory_space<vmem>>, vector<4x128xbf16>
    tpu.vector_store %arg11[%c4_78, %c640_79], %60 {strides = array<i32>} : memref<16x1152xbf16, #tpu.memory_space<vmem>>, vector<4x128xbf16>,
    %c3_80 = arith.constant 3 : index
    %c0_81 = arith.constant 0 : index
    %c0_82 = arith.constant 0 : index
    %62 = vector.load %arg9[%c3_80, %c0_81, %c0_82] : memref<6x6x128xbf16, #tpu.memory_space<vmem>>, vector<1x4x128xbf16>
    %63 = vector.shape_cast %62 : vector<1x4x128xbf16> to vector<4x128xbf16>
    %c4_83 = arith.constant 4 : index
    %c768_84 = arith.constant 768 : index
    %64 = vector.load %arg11[%c4_83, %c768_84] : memref<16x1152xbf16, #tpu.memory_space<vmem>>, vector<4x128xbf16>
    tpu.vector_store %arg11[%c4_83, %c768_84], %63 {strides = array<i32>} : memref<16x1152xbf16, #tpu.memory_space<vmem>>, vector<4x128xbf16>,
    %c3_85 = arith.constant 3 : index
    %c1_86 = arith.constant 1 : index
    %c0_87 = arith.constant 0 : index
    %65 = vector.load %arg9[%c3_85, %c1_86, %c0_87] : memref<6x6x128xbf16, #tpu.memory_space<vmem>>, vector<1x4x128xbf16>
    %66 = vector.shape_cast %65 : vector<1x4x128xbf16> to vector<4x128xbf16>
    %c4_88 = arith.constant 4 : index
    %c896_89 = arith.constant 896 : index
    %67 = vector.load %arg11[%c4_88, %c896_89] : memref<16x1152xbf16, #tpu.memory_space<vmem>>, vector<4x128xbf16>
    tpu.vector_store %arg11[%c4_88, %c896_89], %66 {strides = array<i32>} : memref<16x1152xbf16, #tpu.memory_space<vmem>>, vector<4x128xbf16>,
    %c3_90 = arith.constant 3 : index
    %c2_91 = arith.constant 2 : index
    %c0_92 = arith.constant 0 : index
    %68 = vector.load %arg9[%c3_90, %c2_91, %c0_92] : memref<6x6x128xbf16, #tpu.memory_space<vmem>>, vector<1x4x128xbf16>
    %69 = vector.shape_cast %68 : vector<1x4x128xbf16> to vector<4x128xbf16>
    %c4_93 = arith.constant 4 : index
    %c1024_94 = arith.constant 1024 : index
    %70 = vector.load %arg11[%c4_93, %c1024_94] : memref<16x1152xbf16, #tpu.memory_space<vmem>>, vector<4x128xbf16>
    tpu.vector_store %arg11[%c4_93, %c1024_94], %69 {strides = array<i32>} : memref<16x1152xbf16, #tpu.memory_space<vmem>>, vector<4x128xbf16>,
    %c2_95 = arith.constant 2 : index
    %c0_96 = arith.constant 0 : index
    %c0_97 = arith.constant 0 : index
    %71 = vector.load %arg9[%c2_95, %c0_96, %c0_97] : memref<6x6x128xbf16, #tpu.memory_space<vmem>>, vector<1x4x128xbf16>
    %72 = vector.shape_cast %71 : vector<1x4x128xbf16> to vector<4x128xbf16>
    %c8 = arith.constant 8 : index
    %c0_98 = arith.constant 0 : index
    %73 = vector.load %arg11[%c8, %c0_98] : memref<16x1152xbf16, #tpu.memory_space<vmem>>, vector<4x128xbf16>
    tpu.vector_store %arg11[%c8, %c0_98], %72 {strides = array<i32>} : memref<16x1152xbf16, #tpu.memory_space<vmem>>, vector<4x128xbf16>,
    %c2_99 = arith.constant 2 : index
    %c1_100 = arith.constant 1 : index
    %c0_101 = arith.constant 0 : index
    %74 = vector.load %arg9[%c2_99, %c1_100, %c0_101] : memref<6x6x128xbf16, #tpu.memory_space<vmem>>, vector<1x4x128xbf16>
    %75 = vector.shape_cast %74 : vector<1x4x128xbf16> to vector<4x128xbf16>
    %c8_102 = arith.constant 8 : index
    %c128_103 = arith.constant 128 : index
    %76 = vector.load %arg11[%c8_102, %c128_103] : memref<16x1152xbf16, #tpu.memory_space<vmem>>, vector<4x128xbf16>
    tpu.vector_store %arg11[%c8_102, %c128_103], %75 {strides = array<i32>} : memref<16x1152xbf16, #tpu.memory_space<vmem>>, vector<4x128xbf16>,
    %c2_104 = arith.constant 2 : index
    %c2_105 = arith.constant 2 : index
    %c0_106 = arith.constant 0 : index
    %77 = vector.load %arg9[%c2_104, %c2_105, %c0_106] : memref<6x6x128xbf16, #tpu.memory_space<vmem>>, vector<1x4x128xbf16>
    %78 = vector.shape_cast %77 : vector<1x4x128xbf16> to vector<4x128xbf16>
    %c8_107 = arith.constant 8 : index
    %c256_108 = arith.constant 256 : index
    %79 = vector.load %arg11[%c8_107, %c256_108] : memref<16x1152xbf16, #tpu.memory_space<vmem>>, vector<4x128xbf16>
    tpu.vector_store %arg11[%c8_107, %c256_108], %78 {strides = array<i32>} : memref<16x1152xbf16, #tpu.memory_space<vmem>>, vector<4x128xbf16>,
    %c3_109 = arith.constant 3 : index
    %c0_110 = arith.constant 0 : index
    %c0_111 = arith.constant 0 : index
    %80 = vector.load %arg9[%c3_109, %c0_110, %c0_111] : memref<6x6x128xbf16, #tpu.memory_space<vmem>>, vector<1x4x128xbf16>
    %81 = vector.shape_cast %80 : vector<1x4x128xbf16> to vector<4x128xbf16>
    %c8_112 = arith.constant 8 : index
    %c384_113 = arith.constant 384 : index
    %82 = vector.load %arg11[%c8_112, %c384_113] : memref<16x1152xbf16, #tpu.memory_space<vmem>>, vector<4x128xbf16>
    tpu.vector_store %arg11[%c8_112, %c384_113], %81 {strides = array<i32>} : memref<16x1152xbf16, #tpu.memory_space<vmem>>, vector<4x128xbf16>,
    %c3_114 = arith.constant 3 : index
    %c1_115 = arith.constant 1 : index
    %c0_116 = arith.constant 0 : index
    %83 = vector.load %arg9[%c3_114, %c1_115, %c0_116] : memref<6x6x128xbf16, #tpu.memory_space<vmem>>, vector<1x4x128xbf16>
    %84 = vector.shape_cast %83 : vector<1x4x128xbf16> to vector<4x128xbf16>
    %c8_117 = arith.constant 8 : index
    %c512_118 = arith.constant 512 : index
    %85 = vector.load %arg11[%c8_117, %c512_118] : memref<16x1152xbf16, #tpu.memory_space<vmem>>, vector<4x128xbf16>
    tpu.vector_store %arg11[%c8_117, %c512_118], %84 {strides = array<i32>} : memref<16x1152xbf16, #tpu.memory_space<vmem>>, vector<4x128xbf16>,
    %c3_119 = arith.constant 3 : index
    %c2_120 = arith.constant 2 : index
    %c0_121 = arith.constant 0 : index
    %86 = vector.load %arg9[%c3_119, %c2_120, %c0_121] : memref<6x6x128xbf16, #tpu.memory_space<vmem>>, vector<1x4x128xbf16>
    %87 = vector.shape_cast %86 : vector<1x4x128xbf16> to vector<4x128xbf16>
    %c8_122 = arith.constant 8 : index
    %c640_123 = arith.constant 640 : index
    %88 = vector.load %arg11[%c8_122, %c640_123] : memref<16x1152xbf16, #tpu.memory_space<vmem>>, vector<4x128xbf16>
    tpu.vector_store %arg11[%c8_122, %c640_123], %87 {strides = array<i32>} : memref<16x1152xbf16, #tpu.memory_space<vmem>>, vector<4x128xbf16>,
    %c4_124 = arith.constant 4 : index
    %c0_125 = arith.constant 0 : index
    %c0_126 = arith.constant 0 : index
    %89 = vector.load %arg9[%c4_124, %c0_125, %c0_126] : memref<6x6x128xbf16, #tpu.memory_space<vmem>>, vector<1x4x128xbf16>
    %90 = vector.shape_cast %89 : vector<1x4x128xbf16> to vector<4x128xbf16>
    %c8_127 = arith.constant 8 : index
    %c768_128 = arith.constant 768 : index
    %91 = vector.load %arg11[%c8_127, %c768_128] : memref<16x1152xbf16, #tpu.memory_space<vmem>>, vector<4x128xbf16>
    tpu.vector_store %arg11[%c8_127, %c768_128], %90 {strides = array<i32>} : memref<16x1152xbf16, #tpu.memory_space<vmem>>, vector<4x128xbf16>,
    %c4_129 = arith.constant 4 : index
    %c1_130 = arith.constant 1 : index
    %c0_131 = arith.constant 0 : index
    %92 = vector.load %arg9[%c4_129, %c1_130, %c0_131] : memref<6x6x128xbf16, #tpu.memory_space<vmem>>, vector<1x4x128xbf16>
    %93 = vector.shape_cast %92 : vector<1x4x128xbf16> to vector<4x128xbf16>
    %c8_132 = arith.constant 8 : index
    %c896_133 = arith.constant 896 : index
    %94 = vector.load %arg11[%c8_132, %c896_133] : memref<16x1152xbf16, #tpu.memory_space<vmem>>, vector<4x128xbf16>
    tpu.vector_store %arg11[%c8_132, %c896_133], %93 {strides = array<i32>} : memref<16x1152xbf16, #tpu.memory_space<vmem>>, vector<4x128xbf16>,
    %c4_134 = arith.constant 4 : index
    %c2_135 = arith.constant 2 : index
    %c0_136 = arith.constant 0 : index
    %95 = vector.load %arg9[%c4_134, %c2_135, %c0_136] : memref<6x6x128xbf16, #tpu.memory_space<vmem>>, vector<1x4x128xbf16>
    %96 = vector.shape_cast %95 : vector<1x4x128xbf16> to vector<4x128xbf16>
    %c8_137 = arith.constant 8 : index
    %c1024_138 = arith.constant 1024 : index
    %97 = vector.load %arg11[%c8_137, %c1024_138] : memref<16x1152xbf16, #tpu.memory_space<vmem>>, vector<4x128xbf16>
    tpu.vector_store %arg11[%c8_137, %c1024_138], %96 {strides = array<i32>} : memref<16x1152xbf16, #tpu.memory_space<vmem>>, vector<4x128xbf16>,
    %c3_139 = arith.constant 3 : index
    %c0_140 = arith.constant 0 : index
    %c0_141 = arith.constant 0 : index
    %98 = vector.load %arg9[%c3_139, %c0_140, %c0_141] : memref<6x6x128xbf16, #tpu.memory_space<vmem>>, vector<1x4x128xbf16>
    %99 = vector.shape_cast %98 : vector<1x4x128xbf16> to vector<4x128xbf16>
    %c12 = arith.constant 12 : index
    %c0_142 = arith.constant 0 : index
    %100 = vector.load %arg11[%c12, %c0_142] : memref<16x1152xbf16, #tpu.memory_space<vmem>>, vector<4x128xbf16>
    tpu.vector_store %arg11[%c12, %c0_142], %99 {strides = array<i32>} : memref<16x1152xbf16, #tpu.memory_space<vmem>>, vector<4x128xbf16>,
    %c3_143 = arith.constant 3 : index
    %c1_144 = arith.constant 1 : index
    %c0_145 = arith.constant 0 : index
    %101 = vector.load %arg9[%c3_143, %c1_144, %c0_145] : memref<6x6x128xbf16, #tpu.memory_space<vmem>>, vector<1x4x128xbf16>
    %102 = vector.shape_cast %101 : vector<1x4x128xbf16> to vector<4x128xbf16>
    %c12_146 = arith.constant 12 : index
    %c128_147 = arith.constant 128 : index
    %103 = vector.load %arg11[%c12_146, %c128_147] : memref<16x1152xbf16, #tpu.memory_space<vmem>>, vector<4x128xbf16>
    tpu.vector_store %arg11[%c12_146, %c128_147], %102 {strides = array<i32>} : memref<16x1152xbf16, #tpu.memory_space<vmem>>, vector<4x128xbf16>,
    %c3_148 = arith.constant 3 : index
    %c2_149 = arith.constant 2 : index
    %c0_150 = arith.constant 0 : index
    %104 = vector.load %arg9[%c3_148, %c2_149, %c0_150] : memref<6x6x128xbf16, #tpu.memory_space<vmem>>, vector<1x4x128xbf16>
    %105 = vector.shape_cast %104 : vector<1x4x128xbf16> to vector<4x128xbf16>
    %c12_151 = arith.constant 12 : index
    %c256_152 = arith.constant 256 : index
    %106 = vector.load %arg11[%c12_151, %c256_152] : memref<16x1152xbf16, #tpu.memory_space<vmem>>, vector<4x128xbf16>
    tpu.vector_store %arg11[%c12_151, %c256_152], %105 {strides = array<i32>} : memref<16x1152xbf16, #tpu.memory_space<vmem>>, vector<4x128xbf16>,
    %c4_153 = arith.constant 4 : index
    %c0_154 = arith.constant 0 : index
    %c0_155 = arith.constant 0 : index
    %107 = vector.load %arg9[%c4_153, %c0_154, %c0_155] : memref<6x6x128xbf16, #tpu.memory_space<vmem>>, vector<1x4x128xbf16>
    %108 = vector.shape_cast %107 : vector<1x4x128xbf16> to vector<4x128xbf16>
    %c12_156 = arith.constant 12 : index
    %c384_157 = arith.constant 384 : index
    %109 = vector.load %arg11[%c12_156, %c384_157] : memref<16x1152xbf16, #tpu.memory_space<vmem>>, vector<4x128xbf16>
    tpu.vector_store %arg11[%c12_156, %c384_157], %108 {strides = array<i32>} : memref<16x1152xbf16, #tpu.memory_space<vmem>>, vector<4x128xbf16>,
    %c4_158 = arith.constant 4 : index
    %c1_159 = arith.constant 1 : index
    %c0_160 = arith.constant 0 : index
    %110 = vector.load %arg9[%c4_158, %c1_159, %c0_160] : memref<6x6x128xbf16, #tpu.memory_space<vmem>>, vector<1x4x128xbf16>
    %111 = vector.shape_cast %110 : vector<1x4x128xbf16> to vector<4x128xbf16>
    %c12_161 = arith.constant 12 : index
    %c512_162 = arith.constant 512 : index
    %112 = vector.load %arg11[%c12_161, %c512_162] : memref<16x1152xbf16, #tpu.memory_space<vmem>>, vector<4x128xbf16>
    tpu.vector_store %arg11[%c12_161, %c512_162], %111 {strides = array<i32>} : memref<16x1152xbf16, #tpu.memory_space<vmem>>, vector<4x128xbf16>,
    %c4_163 = arith.constant 4 : index
    %c2_164 = arith.constant 2 : index
    %c0_165 = arith.constant 0 : index
    %113 = vector.load %arg9[%c4_163, %c2_164, %c0_165] : memref<6x6x128xbf16, #tpu.memory_space<vmem>>, vector<1x4x128xbf16>
    %114 = vector.shape_cast %113 : vector<1x4x128xbf16> to vector<4x128xbf16>
    %c12_166 = arith.constant 12 : index
    %c640_167 = arith.constant 640 : index
    %115 = vector.load %arg11[%c12_166, %c640_167] : memref<16x1152xbf16, #tpu.memory_space<vmem>>, vector<4x128xbf16>
    tpu.vector_store %arg11[%c12_166, %c640_167], %114 {strides = array<i32>} : memref<16x1152xbf16, #tpu.memory_space<vmem>>, vector<4x128xbf16>,
    %c5 = arith.constant 5 : index
    %c0_168 = arith.constant 0 : index
    %c0_169 = arith.constant 0 : index
    %116 = vector.load %arg9[%c5, %c0_168, %c0_169] : memref<6x6x128xbf16, #tpu.memory_space<vmem>>, vector<1x4x128xbf16>
    %117 = vector.shape_cast %116 : vector<1x4x128xbf16> to vector<4x128xbf16>
    %c12_170 = arith.constant 12 : index
    %c768_171 = arith.constant 768 : index
    %118 = vector.load %arg11[%c12_170, %c768_171] : memref<16x1152xbf16, #tpu.memory_space<vmem>>, vector<4x128xbf16>
    tpu.vector_store %arg11[%c12_170, %c768_171], %117 {strides = array<i32>} : memref<16x1152xbf16, #tpu.memory_space<vmem>>, vector<4x128xbf16>,
    %c5_172 = arith.constant 5 : index
    %c1_173 = arith.constant 1 : index
    %c0_174 = arith.constant 0 : index
    %119 = vector.load %arg9[%c5_172, %c1_173, %c0_174] : memref<6x6x128xbf16, #tpu.memory_space<vmem>>, vector<1x4x128xbf16>
    %120 = vector.shape_cast %119 : vector<1x4x128xbf16> to vector<4x128xbf16>
    %c12_175 = arith.constant 12 : index
    %c896_176 = arith.constant 896 : index
    %121 = vector.load %arg11[%c12_175, %c896_176] : memref<16x1152xbf16, #tpu.memory_space<vmem>>, vector<4x128xbf16>
    tpu.vector_store %arg11[%c12_175, %c896_176], %120 {strides = array<i32>} : memref<16x1152xbf16, #tpu.memory_space<vmem>>, vector<4x128xbf16>,
    %c5_177 = arith.constant 5 : index
    %c2_178 = arith.constant 2 : index
    %c0_179 = arith.constant 0 : index
    %122 = vector.load %arg9[%c5_177, %c2_178, %c0_179] : memref<6x6x128xbf16, #tpu.memory_space<vmem>>, vector<1x4x128xbf16>
    %123 = vector.shape_cast %122 : vector<1x4x128xbf16> to vector<4x128xbf16>
    %c12_180 = arith.constant 12 : index
    %c1024_181 = arith.constant 1024 : index
    %124 = vector.load %arg11[%c12_180, %c1024_181] : memref<16x1152xbf16, #tpu.memory_space<vmem>>, vector<4x128xbf16>
    tpu.vector_store %arg11[%c12_180, %c1024_181], %123 {strides = array<i32>} : memref<16x1152xbf16, #tpu.memory_space<vmem>>, vector<4x128xbf16>,
    %c0_182 = arith.constant 0 : index
    %c0_183 = arith.constant 0 : index
    %125 = vector.load %arg11[%c0_182, %c0_183] : memref<16x1152xbf16, #tpu.memory_space<vmem>>, vector<16x1152xbf16>
    %c0_184 = arith.constant 0 : index
    %c0_185 = arith.constant 0 : index
    %126 = vector.load %arg2[%c0_184, %c0_185] : memref<1152x128xbf16, #tpu.memory_space<vmem>>, vector<1152x128xbf16>
    %cst_186 = arith.constant dense<0.000000e+00> : vector<16x128xf32>
    %127 = tpu.matmul %125, %126, %cst_186 {dimension_numbers = #tpu.dot_dimension_numbers<[1], [0], [0], [1], [0, 0, 1, 1], [], []>} : vector<16x1152xbf16>, vector<1152x128xbf16>, vector<16x128xf32> -> vector<16x128xf32>
    %c0_187 = arith.constant 0 : index
    %c0_188 = arith.constant 0 : index
    %128 = vector.load %arg3[%c0_187, %c0_188] : memref<1x128xf32, #tpu.memory_space<vmem>>, vector<1x128xf32>
    %129 = vector.broadcast %128 : vector<1x128xf32> to vector<16x128xf32>
    %130 = arith.mulf %127, %129 : vector<16x128xf32>
    %c0_189 = arith.constant 0 : index
    %c0_190 = arith.constant 0 : index
    %131 = vector.load %arg4[%c0_189, %c0_190] : memref<1x128xf32, #tpu.memory_space<vmem>>, vector<1x128xf32>
    %132 = vector.broadcast %131 : vector<1x128xf32> to vector<16x128xf32>
    %133 = arith.addf %130, %132 : vector<16x128xf32>
    %cst_191 = arith.constant 0.000000e+00 : f32
    %134 = vector.broadcast %cst_191 : f32 to vector<16x128xf32>
    %135 = arith.maximumf %133, %134 : vector<16x128xf32>
    %cst_192 = arith.constant 0.000000e+00 : bf16
    %136 = vector.broadcast %cst_192 : bf16 to vector<6x6x128xbf16>
    %c0_193 = arith.constant 0 : index
    %c0_194 = arith.constant 0 : index
    %c0_195 = arith.constant 0 : index
    %137 = vector.load %arg10[%c0_193, %c0_194, %c0_195] : memref<6x6x128xbf16, #tpu.memory_space<vmem>>, vector<6x6x128xbf16>
    tpu.vector_store %arg10[%c0_193, %c0_194, %c0_195], %136 {strides = array<i32>} : memref<6x6x128xbf16, #tpu.memory_space<vmem>>, vector<6x6x128xbf16>,
    %138 = arith.truncf %135 : vector<16x128xf32> to vector<16x128xbf16>
    %139 = vector.extract_strided_slice %138 {offsets = [0, 0], sizes = [4, 128], strides = [1, 1]} : vector<16x128xbf16> to vector<4x128xbf16>
    %140 = vector.shape_cast %139 : vector<4x128xbf16> to vector<1x4x128xbf16>
    %c1_196 = arith.constant 1 : index
    %c1_197 = arith.constant 1 : index
    %c0_198 = arith.constant 0 : index
    %141 = vector.load %arg10[%c1_196, %c1_197, %c0_198] : memref<6x6x128xbf16, #tpu.memory_space<vmem>>, vector<1x4x128xbf16>
    tpu.vector_store %arg10[%c1_196, %c1_197, %c0_198], %140 {strides = array<i32>} : memref<6x6x128xbf16, #tpu.memory_space<vmem>>, vector<1x4x128xbf16>,
    %142 = vector.extract_strided_slice %138 {offsets = [4, 0], sizes = [4, 128], strides = [1, 1]} : vector<16x128xbf16> to vector<4x128xbf16>
    %143 = vector.shape_cast %142 : vector<4x128xbf16> to vector<1x4x128xbf16>
    %c2_199 = arith.constant 2 : index
    %c1_200 = arith.constant 1 : index
    %c0_201 = arith.constant 0 : index
    %144 = vector.load %arg10[%c2_199, %c1_200, %c0_201] : memref<6x6x128xbf16, #tpu.memory_space<vmem>>, vector<1x4x128xbf16>
    tpu.vector_store %arg10[%c2_199, %c1_200, %c0_201], %143 {strides = array<i32>} : memref<6x6x128xbf16, #tpu.memory_space<vmem>>, vector<1x4x128xbf16>,
    %145 = vector.extract_strided_slice %138 {offsets = [8, 0], sizes = [4, 128], strides = [1, 1]} : vector<16x128xbf16> to vector<4x128xbf16>
    %146 = vector.shape_cast %145 : vector<4x128xbf16> to vector<1x4x128xbf16>
    %c3_202 = arith.constant 3 : index
    %c1_203 = arith.constant 1 : index
    %c0_204 = arith.constant 0 : index
    %147 = vector.load %arg10[%c3_202, %c1_203, %c0_204] : memref<6x6x128xbf16, #tpu.memory_space<vmem>>, vector<1x4x128xbf16>
    tpu.vector_store %arg10[%c3_202, %c1_203, %c0_204], %146 {strides = array<i32>} : memref<6x6x128xbf16, #tpu.memory_space<vmem>>, vector<1x4x128xbf16>,
    %148 = vector.extract_strided_slice %138 {offsets = [12, 0], sizes = [4, 128], strides = [1, 1]} : vector<16x128xbf16> to vector<4x128xbf16>
    %149 = vector.shape_cast %148 : vector<4x128xbf16> to vector<1x4x128xbf16>
    %c4_205 = arith.constant 4 : index
    %c1_206 = arith.constant 1 : index
    %c0_207 = arith.constant 0 : index
    %150 = vector.load %arg10[%c4_205, %c1_206, %c0_207] : memref<6x6x128xbf16, #tpu.memory_space<vmem>>, vector<1x4x128xbf16>
    tpu.vector_store %arg10[%c4_205, %c1_206, %c0_207], %149 {strides = array<i32>} : memref<6x6x128xbf16, #tpu.memory_space<vmem>>, vector<1x4x128xbf16>,
    %c0_208 = arith.constant 0 : index
    %c0_209 = arith.constant 0 : index
    %c0_210 = arith.constant 0 : index
    %151 = vector.load %arg10[%c0_208, %c0_209, %c0_210] : memref<6x6x128xbf16, #tpu.memory_space<vmem>>, vector<1x4x128xbf16>
    %152 = vector.shape_cast %151 : vector<1x4x128xbf16> to vector<4x128xbf16>
    %c0_211 = arith.constant 0 : index
    %c0_212 = arith.constant 0 : index
    %153 = vector.load %arg11[%c0_211, %c0_212] : memref<16x1152xbf16, #tpu.memory_space<vmem>>, vector<4x128xbf16>
    tpu.vector_store %arg11[%c0_211, %c0_212], %152 {strides = array<i32>} : memref<16x1152xbf16, #tpu.memory_space<vmem>>, vector<4x128xbf16>,
    %c0_213 = arith.constant 0 : index
    %c1_214 = arith.constant 1 : index
    %c0_215 = arith.constant 0 : index
    %154 = vector.load %arg10[%c0_213, %c1_214, %c0_215] : memref<6x6x128xbf16, #tpu.memory_space<vmem>>, vector<1x4x128xbf16>
    %155 = vector.shape_cast %154 : vector<1x4x128xbf16> to vector<4x128xbf16>
    %c0_216 = arith.constant 0 : index
    %c128_217 = arith.constant 128 : index
    %156 = vector.load %arg11[%c0_216, %c128_217] : memref<16x1152xbf16, #tpu.memory_space<vmem>>, vector<4x128xbf16>
    tpu.vector_store %arg11[%c0_216, %c128_217], %155 {strides = array<i32>} : memref<16x1152xbf16, #tpu.memory_space<vmem>>, vector<4x128xbf16>,
    %c0_218 = arith.constant 0 : index
    %c2_219 = arith.constant 2 : index
    %c0_220 = arith.constant 0 : index
    %157 = vector.load %arg10[%c0_218, %c2_219, %c0_220] : memref<6x6x128xbf16, #tpu.memory_space<vmem>>, vector<1x4x128xbf16>
    %158 = vector.shape_cast %157 : vector<1x4x128xbf16> to vector<4x128xbf16>
    %c0_221 = arith.constant 0 : index
    %c256_222 = arith.constant 256 : index
    %159 = vector.load %arg11[%c0_221, %c256_222] : memref<16x1152xbf16, #tpu.memory_space<vmem>>, vector<4x128xbf16>
    tpu.vector_store %arg11[%c0_221, %c256_222], %158 {strides = array<i32>} : memref<16x1152xbf16, #tpu.memory_space<vmem>>, vector<4x128xbf16>,
    %c1_223 = arith.constant 1 : index
    %c0_224 = arith.constant 0 : index
    %c0_225 = arith.constant 0 : index
    %160 = vector.load %arg10[%c1_223, %c0_224, %c0_225] : memref<6x6x128xbf16, #tpu.memory_space<vmem>>, vector<1x4x128xbf16>
    %161 = vector.shape_cast %160 : vector<1x4x128xbf16> to vector<4x128xbf16>
    %c0_226 = arith.constant 0 : index
    %c384_227 = arith.constant 384 : index
    %162 = vector.load %arg11[%c0_226, %c384_227] : memref<16x1152xbf16, #tpu.memory_space<vmem>>, vector<4x128xbf16>
    tpu.vector_store %arg11[%c0_226, %c384_227], %161 {strides = array<i32>} : memref<16x1152xbf16, #tpu.memory_space<vmem>>, vector<4x128xbf16>,
    %c1_228 = arith.constant 1 : index
    %c1_229 = arith.constant 1 : index
    %c0_230 = arith.constant 0 : index
    %163 = vector.load %arg10[%c1_228, %c1_229, %c0_230] : memref<6x6x128xbf16, #tpu.memory_space<vmem>>, vector<1x4x128xbf16>
    %164 = vector.shape_cast %163 : vector<1x4x128xbf16> to vector<4x128xbf16>
    %c0_231 = arith.constant 0 : index
    %c512_232 = arith.constant 512 : index
    %165 = vector.load %arg11[%c0_231, %c512_232] : memref<16x1152xbf16, #tpu.memory_space<vmem>>, vector<4x128xbf16>
    tpu.vector_store %arg11[%c0_231, %c512_232], %164 {strides = array<i32>} : memref<16x1152xbf16, #tpu.memory_space<vmem>>, vector<4x128xbf16>,
    %c1_233 = arith.constant 1 : index
    %c2_234 = arith.constant 2 : index
    %c0_235 = arith.constant 0 : index
    %166 = vector.load %arg10[%c1_233, %c2_234, %c0_235] : memref<6x6x128xbf16, #tpu.memory_space<vmem>>, vector<1x4x128xbf16>
    %167 = vector.shape_cast %166 : vector<1x4x128xbf16> to vector<4x128xbf16>
    %c0_236 = arith.constant 0 : index
    %c640_237 = arith.constant 640 : index
    %168 = vector.load %arg11[%c0_236, %c640_237] : memref<16x1152xbf16, #tpu.memory_space<vmem>>, vector<4x128xbf16>
    tpu.vector_store %arg11[%c0_236, %c640_237], %167 {strides = array<i32>} : memref<16x1152xbf16, #tpu.memory_space<vmem>>, vector<4x128xbf16>,
    %c2_238 = arith.constant 2 : index
    %c0_239 = arith.constant 0 : index
    %c0_240 = arith.constant 0 : index
    %169 = vector.load %arg10[%c2_238, %c0_239, %c0_240] : memref<6x6x128xbf16, #tpu.memory_space<vmem>>, vector<1x4x128xbf16>
    %170 = vector.shape_cast %169 : vector<1x4x128xbf16> to vector<4x128xbf16>
    %c0_241 = arith.constant 0 : index
    %c768_242 = arith.constant 768 : index
    %171 = vector.load %arg11[%c0_241, %c768_242] : memref<16x1152xbf16, #tpu.memory_space<vmem>>, vector<4x128xbf16>
    tpu.vector_store %arg11[%c0_241, %c768_242], %170 {strides = array<i32>} : memref<16x1152xbf16, #tpu.memory_space<vmem>>, vector<4x128xbf16>,
    %c2_243 = arith.constant 2 : index
    %c1_244 = arith.constant 1 : index
    %c0_245 = arith.constant 0 : index
    %172 = vector.load %arg10[%c2_243, %c1_244, %c0_245] : memref<6x6x128xbf16, #tpu.memory_space<vmem>>, vector<1x4x128xbf16>
    %173 = vector.shape_cast %172 : vector<1x4x128xbf16> to vector<4x128xbf16>
    %c0_246 = arith.constant 0 : index
    %c896_247 = arith.constant 896 : index
    %174 = vector.load %arg11[%c0_246, %c896_247] : memref<16x1152xbf16, #tpu.memory_space<vmem>>, vector<4x128xbf16>
    tpu.vector_store %arg11[%c0_246, %c896_247], %173 {strides = array<i32>} : memref<16x1152xbf16, #tpu.memory_space<vmem>>, vector<4x128xbf16>,
    %c2_248 = arith.constant 2 : index
    %c2_249 = arith.constant 2 : index
    %c0_250 = arith.constant 0 : index
    %175 = vector.load %arg10[%c2_248, %c2_249, %c0_250] : memref<6x6x128xbf16, #tpu.memory_space<vmem>>, vector<1x4x128xbf16>
    %176 = vector.shape_cast %175 : vector<1x4x128xbf16> to vector<4x128xbf16>
    %c0_251 = arith.constant 0 : index
    %c1024_252 = arith.constant 1024 : index
    %177 = vector.load %arg11[%c0_251, %c1024_252] : memref<16x1152xbf16, #tpu.memory_space<vmem>>, vector<4x128xbf16>
    tpu.vector_store %arg11[%c0_251, %c1024_252], %176 {strides = array<i32>} : memref<16x1152xbf16, #tpu.memory_space<vmem>>, vector<4x128xbf16>,
    %c1_253 = arith.constant 1 : index
    %c0_254 = arith.constant 0 : index
    %c0_255 = arith.constant 0 : index
    %178 = vector.load %arg10[%c1_253, %c0_254, %c0_255] : memref<6x6x128xbf16, #tpu.memory_space<vmem>>, vector<1x4x128xbf16>
    %179 = vector.shape_cast %178 : vector<1x4x128xbf16> to vector<4x128xbf16>
    %c4_256 = arith.constant 4 : index
    %c0_257 = arith.constant 0 : index
    %180 = vector.load %arg11[%c4_256, %c0_257] : memref<16x1152xbf16, #tpu.memory_space<vmem>>, vector<4x128xbf16>
    tpu.vector_store %arg11[%c4_256, %c0_257], %179 {strides = array<i32>} : memref<16x1152xbf16, #tpu.memory_space<vmem>>, vector<4x128xbf16>,
    %c1_258 = arith.constant 1 : index
    %c1_259 = arith.constant 1 : index
    %c0_260 = arith.constant 0 : index
    %181 = vector.load %arg10[%c1_258, %c1_259, %c0_260] : memref<6x6x128xbf16, #tpu.memory_space<vmem>>, vector<1x4x128xbf16>
    %182 = vector.shape_cast %181 : vector<1x4x128xbf16> to vector<4x128xbf16>
    %c4_261 = arith.constant 4 : index
    %c128_262 = arith.constant 128 : index
    %183 = vector.load %arg11[%c4_261, %c128_262] : memref<16x1152xbf16, #tpu.memory_space<vmem>>, vector<4x128xbf16>
    tpu.vector_store %arg11[%c4_261, %c128_262], %182 {strides = array<i32>} : memref<16x1152xbf16, #tpu.memory_space<vmem>>, vector<4x128xbf16>,
    %c1_263 = arith.constant 1 : index
    %c2_264 = arith.constant 2 : index
    %c0_265 = arith.constant 0 : index
    %184 = vector.load %arg10[%c1_263, %c2_264, %c0_265] : memref<6x6x128xbf16, #tpu.memory_space<vmem>>, vector<1x4x128xbf16>
    %185 = vector.shape_cast %184 : vector<1x4x128xbf16> to vector<4x128xbf16>
    %c4_266 = arith.constant 4 : index
    %c256_267 = arith.constant 256 : index
    %186 = vector.load %arg11[%c4_266, %c256_267] : memref<16x1152xbf16, #tpu.memory_space<vmem>>, vector<4x128xbf16>
    tpu.vector_store %arg11[%c4_266, %c256_267], %185 {strides = array<i32>} : memref<16x1152xbf16, #tpu.memory_space<vmem>>, vector<4x128xbf16>,
    %c2_268 = arith.constant 2 : index
    %c0_269 = arith.constant 0 : index
    %c0_270 = arith.constant 0 : index
    %187 = vector.load %arg10[%c2_268, %c0_269, %c0_270] : memref<6x6x128xbf16, #tpu.memory_space<vmem>>, vector<1x4x128xbf16>
    %188 = vector.shape_cast %187 : vector<1x4x128xbf16> to vector<4x128xbf16>
    %c4_271 = arith.constant 4 : index
    %c384_272 = arith.constant 384 : index
    %189 = vector.load %arg11[%c4_271, %c384_272] : memref<16x1152xbf16, #tpu.memory_space<vmem>>, vector<4x128xbf16>
    tpu.vector_store %arg11[%c4_271, %c384_272], %188 {strides = array<i32>} : memref<16x1152xbf16, #tpu.memory_space<vmem>>, vector<4x128xbf16>,
    %c2_273 = arith.constant 2 : index
    %c1_274 = arith.constant 1 : index
    %c0_275 = arith.constant 0 : index
    %190 = vector.load %arg10[%c2_273, %c1_274, %c0_275] : memref<6x6x128xbf16, #tpu.memory_space<vmem>>, vector<1x4x128xbf16>
    %191 = vector.shape_cast %190 : vector<1x4x128xbf16> to vector<4x128xbf16>
    %c4_276 = arith.constant 4 : index
    %c512_277 = arith.constant 512 : index
    %192 = vector.load %arg11[%c4_276, %c512_277] : memref<16x1152xbf16, #tpu.memory_space<vmem>>, vector<4x128xbf16>
    tpu.vector_store %arg11[%c4_276, %c512_277], %191 {strides = array<i32>} : memref<16x1152xbf16, #tpu.memory_space<vmem>>, vector<4x128xbf16>,
    %c2_278 = arith.constant 2 : index
    %c2_279 = arith.constant 2 : index
    %c0_280 = arith.constant 0 : index
    %193 = vector.load %arg10[%c2_278, %c2_279, %c0_280] : memref<6x6x128xbf16, #tpu.memory_space<vmem>>, vector<1x4x128xbf16>
    %194 = vector.shape_cast %193 : vector<1x4x128xbf16> to vector<4x128xbf16>
    %c4_281 = arith.constant 4 : index
    %c640_282 = arith.constant 640 : index
    %195 = vector.load %arg11[%c4_281, %c640_282] : memref<16x1152xbf16, #tpu.memory_space<vmem>>, vector<4x128xbf16>
    tpu.vector_store %arg11[%c4_281, %c640_282], %194 {strides = array<i32>} : memref<16x1152xbf16, #tpu.memory_space<vmem>>, vector<4x128xbf16>,
    %c3_283 = arith.constant 3 : index
    %c0_284 = arith.constant 0 : index
    %c0_285 = arith.constant 0 : index
    %196 = vector.load %arg10[%c3_283, %c0_284, %c0_285] : memref<6x6x128xbf16, #tpu.memory_space<vmem>>, vector<1x4x128xbf16>
    %197 = vector.shape_cast %196 : vector<1x4x128xbf16> to vector<4x128xbf16>
    %c4_286 = arith.constant 4 : index
    %c768_287 = arith.constant 768 : index
    %198 = vector.load %arg11[%c4_286, %c768_287] : memref<16x1152xbf16, #tpu.memory_space<vmem>>, vector<4x128xbf16>
    tpu.vector_store %arg11[%c4_286, %c768_287], %197 {strides = array<i32>} : memref<16x1152xbf16, #tpu.memory_space<vmem>>, vector<4x128xbf16>,
    %c3_288 = arith.constant 3 : index
    %c1_289 = arith.constant 1 : index
    %c0_290 = arith.constant 0 : index
    %199 = vector.load %arg10[%c3_288, %c1_289, %c0_290] : memref<6x6x128xbf16, #tpu.memory_space<vmem>>, vector<1x4x128xbf16>
    %200 = vector.shape_cast %199 : vector<1x4x128xbf16> to vector<4x128xbf16>
    %c4_291 = arith.constant 4 : index
    %c896_292 = arith.constant 896 : index
    %201 = vector.load %arg11[%c4_291, %c896_292] : memref<16x1152xbf16, #tpu.memory_space<vmem>>, vector<4x128xbf16>
    tpu.vector_store %arg11[%c4_291, %c896_292], %200 {strides = array<i32>} : memref<16x1152xbf16, #tpu.memory_space<vmem>>, vector<4x128xbf16>,
    %c3_293 = arith.constant 3 : index
    %c2_294 = arith.constant 2 : index
    %c0_295 = arith.constant 0 : index
    %202 = vector.load %arg10[%c3_293, %c2_294, %c0_295] : memref<6x6x128xbf16, #tpu.memory_space<vmem>>, vector<1x4x128xbf16>
    %203 = vector.shape_cast %202 : vector<1x4x128xbf16> to vector<4x128xbf16>
    %c4_296 = arith.constant 4 : index
    %c1024_297 = arith.constant 1024 : index
    %204 = vector.load %arg11[%c4_296, %c1024_297] : memref<16x1152xbf16, #tpu.memory_space<vmem>>, vector<4x128xbf16>
    tpu.vector_store %arg11[%c4_296, %c1024_297], %203 {strides = array<i32>} : memref<16x1152xbf16, #tpu.memory_space<vmem>>, vector<4x128xbf16>,
    %c2_298 = arith.constant 2 : index
    %c0_299 = arith.constant 0 : index
    %c0_300 = arith.constant 0 : index
    %205 = vector.load %arg10[%c2_298, %c0_299, %c0_300] : memref<6x6x128xbf16, #tpu.memory_space<vmem>>, vector<1x4x128xbf16>
    %206 = vector.shape_cast %205 : vector<1x4x128xbf16> to vector<4x128xbf16>
    %c8_301 = arith.constant 8 : index
    %c0_302 = arith.constant 0 : index
    %207 = vector.load %arg11[%c8_301, %c0_302] : memref<16x1152xbf16, #tpu.memory_space<vmem>>, vector<4x128xbf16>
    tpu.vector_store %arg11[%c8_301, %c0_302], %206 {strides = array<i32>} : memref<16x1152xbf16, #tpu.memory_space<vmem>>, vector<4x128xbf16>,
    %c2_303 = arith.constant 2 : index
    %c1_304 = arith.constant 1 : index
    %c0_305 = arith.constant 0 : index
    %208 = vector.load %arg10[%c2_303, %c1_304, %c0_305] : memref<6x6x128xbf16, #tpu.memory_space<vmem>>, vector<1x4x128xbf16>
    %209 = vector.shape_cast %208 : vector<1x4x128xbf16> to vector<4x128xbf16>
    %c8_306 = arith.constant 8 : index
    %c128_307 = arith.constant 128 : index
    %210 = vector.load %arg11[%c8_306, %c128_307] : memref<16x1152xbf16, #tpu.memory_space<vmem>>, vector<4x128xbf16>
    tpu.vector_store %arg11[%c8_306, %c128_307], %209 {strides = array<i32>} : memref<16x1152xbf16, #tpu.memory_space<vmem>>, vector<4x128xbf16>,
    %c2_308 = arith.constant 2 : index
    %c2_309 = arith.constant 2 : index
    %c0_310 = arith.constant 0 : index
    %211 = vector.load %arg10[%c2_308, %c2_309, %c0_310] : memref<6x6x128xbf16, #tpu.memory_space<vmem>>, vector<1x4x128xbf16>
    %212 = vector.shape_cast %211 : vector<1x4x128xbf16> to vector<4x128xbf16>
    %c8_311 = arith.constant 8 : index
    %c256_312 = arith.constant 256 : index
    %213 = vector.load %arg11[%c8_311, %c256_312] : memref<16x1152xbf16, #tpu.memory_space<vmem>>, vector<4x128xbf16>
    tpu.vector_store %arg11[%c8_311, %c256_312], %212 {strides = array<i32>} : memref<16x1152xbf16, #tpu.memory_space<vmem>>, vector<4x128xbf16>,
    %c3_313 = arith.constant 3 : index
    %c0_314 = arith.constant 0 : index
    %c0_315 = arith.constant 0 : index
    %214 = vector.load %arg10[%c3_313, %c0_314, %c0_315] : memref<6x6x128xbf16, #tpu.memory_space<vmem>>, vector<1x4x128xbf16>
    %215 = vector.shape_cast %214 : vector<1x4x128xbf16> to vector<4x128xbf16>
    %c8_316 = arith.constant 8 : index
    %c384_317 = arith.constant 384 : index
    %216 = vector.load %arg11[%c8_316, %c384_317] : memref<16x1152xbf16, #tpu.memory_space<vmem>>, vector<4x128xbf16>
    tpu.vector_store %arg11[%c8_316, %c384_317], %215 {strides = array<i32>} : memref<16x1152xbf16, #tpu.memory_space<vmem>>, vector<4x128xbf16>,
    %c3_318 = arith.constant 3 : index
    %c1_319 = arith.constant 1 : index
    %c0_320 = arith.constant 0 : index
    %217 = vector.load %arg10[%c3_318, %c1_319, %c0_320] : memref<6x6x128xbf16, #tpu.memory_space<vmem>>, vector<1x4x128xbf16>
    %218 = vector.shape_cast %217 : vector<1x4x128xbf16> to vector<4x128xbf16>
    %c8_321 = arith.constant 8 : index
    %c512_322 = arith.constant 512 : index
    %219 = vector.load %arg11[%c8_321, %c512_322] : memref<16x1152xbf16, #tpu.memory_space<vmem>>, vector<4x128xbf16>
    tpu.vector_store %arg11[%c8_321, %c512_322], %218 {strides = array<i32>} : memref<16x1152xbf16, #tpu.memory_space<vmem>>, vector<4x128xbf16>,
    %c3_323 = arith.constant 3 : index
    %c2_324 = arith.constant 2 : index
    %c0_325 = arith.constant 0 : index
    %220 = vector.load %arg10[%c3_323, %c2_324, %c0_325] : memref<6x6x128xbf16, #tpu.memory_space<vmem>>, vector<1x4x128xbf16>
    %221 = vector.shape_cast %220 : vector<1x4x128xbf16> to vector<4x128xbf16>
    %c8_326 = arith.constant 8 : index
    %c640_327 = arith.constant 640 : index
    %222 = vector.load %arg11[%c8_326, %c640_327] : memref<16x1152xbf16, #tpu.memory_space<vmem>>, vector<4x128xbf16>
    tpu.vector_store %arg11[%c8_326, %c640_327], %221 {strides = array<i32>} : memref<16x1152xbf16, #tpu.memory_space<vmem>>, vector<4x128xbf16>,
    %c4_328 = arith.constant 4 : index
    %c0_329 = arith.constant 0 : index
    %c0_330 = arith.constant 0 : index
    %223 = vector.load %arg10[%c4_328, %c0_329, %c0_330] : memref<6x6x128xbf16, #tpu.memory_space<vmem>>, vector<1x4x128xbf16>
    %224 = vector.shape_cast %223 : vector<1x4x128xbf16> to vector<4x128xbf16>
    %c8_331 = arith.constant 8 : index
    %c768_332 = arith.constant 768 : index
    %225 = vector.load %arg11[%c8_331, %c768_332] : memref<16x1152xbf16, #tpu.memory_space<vmem>>, vector<4x128xbf16>
    tpu.vector_store %arg11[%c8_331, %c768_332], %224 {strides = array<i32>} : memref<16x1152xbf16, #tpu.memory_space<vmem>>, vector<4x128xbf16>,
    %c4_333 = arith.constant 4 : index
    %c1_334 = arith.constant 1 : index
    %c0_335 = arith.constant 0 : index
    %226 = vector.load %arg10[%c4_333, %c1_334, %c0_335] : memref<6x6x128xbf16, #tpu.memory_space<vmem>>, vector<1x4x128xbf16>
    %227 = vector.shape_cast %226 : vector<1x4x128xbf16> to vector<4x128xbf16>
    %c8_336 = arith.constant 8 : index
    %c896_337 = arith.constant 896 : index
    %228 = vector.load %arg11[%c8_336, %c896_337] : memref<16x1152xbf16, #tpu.memory_space<vmem>>, vector<4x128xbf16>
    tpu.vector_store %arg11[%c8_336, %c896_337], %227 {strides = array<i32>} : memref<16x1152xbf16, #tpu.memory_space<vmem>>, vector<4x128xbf16>,
    %c4_338 = arith.constant 4 : index
    %c2_339 = arith.constant 2 : index
    %c0_340 = arith.constant 0 : index
    %229 = vector.load %arg10[%c4_338, %c2_339, %c0_340] : memref<6x6x128xbf16, #tpu.memory_space<vmem>>, vector<1x4x128xbf16>
    %230 = vector.shape_cast %229 : vector<1x4x128xbf16> to vector<4x128xbf16>
    %c8_341 = arith.constant 8 : index
    %c1024_342 = arith.constant 1024 : index
    %231 = vector.load %arg11[%c8_341, %c1024_342] : memref<16x1152xbf16, #tpu.memory_space<vmem>>, vector<4x128xbf16>
    tpu.vector_store %arg11[%c8_341, %c1024_342], %230 {strides = array<i32>} : memref<16x1152xbf16, #tpu.memory_space<vmem>>, vector<4x128xbf16>,
    %c3_343 = arith.constant 3 : index
    %c0_344 = arith.constant 0 : index
    %c0_345 = arith.constant 0 : index
    %232 = vector.load %arg10[%c3_343, %c0_344, %c0_345] : memref<6x6x128xbf16, #tpu.memory_space<vmem>>, vector<1x4x128xbf16>
    %233 = vector.shape_cast %232 : vector<1x4x128xbf16> to vector<4x128xbf16>
    %c12_346 = arith.constant 12 : index
    %c0_347 = arith.constant 0 : index
    %234 = vector.load %arg11[%c12_346, %c0_347] : memref<16x1152xbf16, #tpu.memory_space<vmem>>, vector<4x128xbf16>
    tpu.vector_store %arg11[%c12_346, %c0_347], %233 {strides = array<i32>} : memref<16x1152xbf16, #tpu.memory_space<vmem>>, vector<4x128xbf16>,
    %c3_348 = arith.constant 3 : index
    %c1_349 = arith.constant 1 : index
    %c0_350 = arith.constant 0 : index
    %235 = vector.load %arg10[%c3_348, %c1_349, %c0_350] : memref<6x6x128xbf16, #tpu.memory_space<vmem>>, vector<1x4x128xbf16>
    %236 = vector.shape_cast %235 : vector<1x4x128xbf16> to vector<4x128xbf16>
    %c12_351 = arith.constant 12 : index
    %c128_352 = arith.constant 128 : index
    %237 = vector.load %arg11[%c12_351, %c128_352] : memref<16x1152xbf16, #tpu.memory_space<vmem>>, vector<4x128xbf16>
    tpu.vector_store %arg11[%c12_351, %c128_352], %236 {strides = array<i32>} : memref<16x1152xbf16, #tpu.memory_space<vmem>>, vector<4x128xbf16>,
    %c3_353 = arith.constant 3 : index
    %c2_354 = arith.constant 2 : index
    %c0_355 = arith.constant 0 : index
    %238 = vector.load %arg10[%c3_353, %c2_354, %c0_355] : memref<6x6x128xbf16, #tpu.memory_space<vmem>>, vector<1x4x128xbf16>
    %239 = vector.shape_cast %238 : vector<1x4x128xbf16> to vector<4x128xbf16>
    %c12_356 = arith.constant 12 : index
    %c256_357 = arith.constant 256 : index
    %240 = vector.load %arg11[%c12_356, %c256_357] : memref<16x1152xbf16, #tpu.memory_space<vmem>>, vector<4x128xbf16>
    tpu.vector_store %arg11[%c12_356, %c256_357], %239 {strides = array<i32>} : memref<16x1152xbf16, #tpu.memory_space<vmem>>, vector<4x128xbf16>,
    %c4_358 = arith.constant 4 : index
    %c0_359 = arith.constant 0 : index
    %c0_360 = arith.constant 0 : index
    %241 = vector.load %arg10[%c4_358, %c0_359, %c0_360] : memref<6x6x128xbf16, #tpu.memory_space<vmem>>, vector<1x4x128xbf16>
    %242 = vector.shape_cast %241 : vector<1x4x128xbf16> to vector<4x128xbf16>
    %c12_361 = arith.constant 12 : index
    %c384_362 = arith.constant 384 : index
    %243 = vector.load %arg11[%c12_361, %c384_362] : memref<16x1152xbf16, #tpu.memory_space<vmem>>, vector<4x128xbf16>
    tpu.vector_store %arg11[%c12_361, %c384_362], %242 {strides = array<i32>} : memref<16x1152xbf16, #tpu.memory_space<vmem>>, vector<4x128xbf16>,
    %c4_363 = arith.constant 4 : index
    %c1_364 = arith.constant 1 : index
    %c0_365 = arith.constant 0 : index
    %244 = vector.load %arg10[%c4_363, %c1_364, %c0_365] : memref<6x6x128xbf16, #tpu.memory_space<vmem>>, vector<1x4x128xbf16>
    %245 = vector.shape_cast %244 : vector<1x4x128xbf16> to vector<4x128xbf16>
    %c12_366 = arith.constant 12 : index
    %c512_367 = arith.constant 512 : index
    %246 = vector.load %arg11[%c12_366, %c512_367] : memref<16x1152xbf16, #tpu.memory_space<vmem>>, vector<4x128xbf16>
    tpu.vector_store %arg11[%c12_366, %c512_367], %245 {strides = array<i32>} : memref<16x1152xbf16, #tpu.memory_space<vmem>>, vector<4x128xbf16>,
    %c4_368 = arith.constant 4 : index
    %c2_369 = arith.constant 2 : index
    %c0_370 = arith.constant 0 : index
    %247 = vector.load %arg10[%c4_368, %c2_369, %c0_370] : memref<6x6x128xbf16, #tpu.memory_space<vmem>>, vector<1x4x128xbf16>
    %248 = vector.shape_cast %247 : vector<1x4x128xbf16> to vector<4x128xbf16>
    %c12_371 = arith.constant 12 : index
    %c640_372 = arith.constant 640 : index
    %249 = vector.load %arg11[%c12_371, %c640_372] : memref<16x1152xbf16, #tpu.memory_space<vmem>>, vector<4x128xbf16>
    tpu.vector_store %arg11[%c12_371, %c640_372], %248 {strides = array<i32>} : memref<16x1152xbf16, #tpu.memory_space<vmem>>, vector<4x128xbf16>,
    %c5_373 = arith.constant 5 : index
    %c0_374 = arith.constant 0 : index
    %c0_375 = arith.constant 0 : index
    %250 = vector.load %arg10[%c5_373, %c0_374, %c0_375] : memref<6x6x128xbf16, #tpu.memory_space<vmem>>, vector<1x4x128xbf16>
    %251 = vector.shape_cast %250 : vector<1x4x128xbf16> to vector<4x128xbf16>
    %c12_376 = arith.constant 12 : index
    %c768_377 = arith.constant 768 : index
    %252 = vector.load %arg11[%c12_376, %c768_377] : memref<16x1152xbf16, #tpu.memory_space<vmem>>, vector<4x128xbf16>
    tpu.vector_store %arg11[%c12_376, %c768_377], %251 {strides = array<i32>} : memref<16x1152xbf16, #tpu.memory_space<vmem>>, vector<4x128xbf16>,
    %c5_378 = arith.constant 5 : index
    %c1_379 = arith.constant 1 : index
    %c0_380 = arith.constant 0 : index
    %253 = vector.load %arg10[%c5_378, %c1_379, %c0_380] : memref<6x6x128xbf16, #tpu.memory_space<vmem>>, vector<1x4x128xbf16>
    %254 = vector.shape_cast %253 : vector<1x4x128xbf16> to vector<4x128xbf16>
    %c12_381 = arith.constant 12 : index
    %c896_382 = arith.constant 896 : index
    %255 = vector.load %arg11[%c12_381, %c896_382] : memref<16x1152xbf16, #tpu.memory_space<vmem>>, vector<4x128xbf16>
    tpu.vector_store %arg11[%c12_381, %c896_382], %254 {strides = array<i32>} : memref<16x1152xbf16, #tpu.memory_space<vmem>>, vector<4x128xbf16>,
    %c5_383 = arith.constant 5 : index
    %c2_384 = arith.constant 2 : index
    %c0_385 = arith.constant 0 : index
    %256 = vector.load %arg10[%c5_383, %c2_384, %c0_385] : memref<6x6x128xbf16, #tpu.memory_space<vmem>>, vector<1x4x128xbf16>
    %257 = vector.shape_cast %256 : vector<1x4x128xbf16> to vector<4x128xbf16>
    %c12_386 = arith.constant 12 : index
    %c1024_387 = arith.constant 1024 : index
    %258 = vector.load %arg11[%c12_386, %c1024_387] : memref<16x1152xbf16, #tpu.memory_space<vmem>>, vector<4x128xbf16>
    tpu.vector_store %arg11[%c12_386, %c1024_387], %257 {strides = array<i32>} : memref<16x1152xbf16, #tpu.memory_space<vmem>>, vector<4x128xbf16>,
    %c0_388 = arith.constant 0 : index
    %c0_389 = arith.constant 0 : index
    %259 = vector.load %arg11[%c0_388, %c0_389] : memref<16x1152xbf16, #tpu.memory_space<vmem>>, vector<16x1152xbf16>
    %c0_390 = arith.constant 0 : index
    %c0_391 = arith.constant 0 : index
    %260 = vector.load %arg5[%c0_390, %c0_391] : memref<1152x128xbf16, #tpu.memory_space<vmem>>, vector<1152x128xbf16>
    %cst_392 = arith.constant dense<0.000000e+00> : vector<16x128xf32>
    %261 = tpu.matmul %259, %260, %cst_392 {dimension_numbers = #tpu.dot_dimension_numbers<[1], [0], [0], [1], [0, 0, 1, 1], [], []>} : vector<16x1152xbf16>, vector<1152x128xbf16>, vector<16x128xf32> -> vector<16x128xf32>
    %c0_393 = arith.constant 0 : index
    %c0_394 = arith.constant 0 : index
    %262 = vector.load %arg6[%c0_393, %c0_394] : memref<1x128xf32, #tpu.memory_space<vmem>>, vector<1x128xf32>
    %263 = vector.broadcast %262 : vector<1x128xf32> to vector<16x128xf32>
    %264 = arith.mulf %261, %263 : vector<16x128xf32>
    %c0_395 = arith.constant 0 : index
    %c0_396 = arith.constant 0 : index
    %265 = vector.load %arg7[%c0_395, %c0_396] : memref<1x128xf32, #tpu.memory_space<vmem>>, vector<1x128xf32>
    %266 = vector.broadcast %265 : vector<1x128xf32> to vector<16x128xf32>
    %267 = arith.addf %264, %266 : vector<16x128xf32>
    %268 = arith.addf %267, %3 : vector<16x128xf32>
    %cst_397 = arith.constant 0.000000e+00 : f32
    %269 = vector.broadcast %cst_397 : f32 to vector<16x128xf32>
    %270 = arith.maximumf %268, %269 : vector<16x128xf32>
    %c0_398 = arith.constant 0 : index
    %c0_399 = arith.constant 0 : index
    %c0_400 = arith.constant 0 : index
    %271 = vector.load %arg8[%c0_398, %c0_399, %c0_400] : memref<1x16x128xf32, #tpu.memory_space<vmem>>, vector<1x16x128xf32>
    %272 = vector.shape_cast %271 : vector<1x16x128xf32> to vector<16x128xf32>
    %273 = vector.shape_cast %270 : vector<16x128xf32> to vector<1x16x128xf32>
    tpu.vector_store %arg8[%c0_398, %c0_399, %c0_400], %273 {strides = array<i32>} : memref<1x16x128xf32, #tpu.memory_space<vmem>>, vector<1x16x128xf32>,
    return
  }
  func.func @transform_0(%arg0: i32) -> (i32, i32, i32) {
    %c0_i32 = arith.constant 0 : i32
    %c0_i32_0 = arith.constant 0 : i32
    %c0_i32_1 = arith.constant 0 : i32
    return %arg0, %c0_i32, %c0_i32_0 : i32, i32, i32
  }
  func.func @transform_1(%arg0: i32) -> (i32, i32) {
    %c0_i32 = arith.constant 0 : i32
    %c0_i32_0 = arith.constant 0 : i32
    %c0_i32_1 = arith.constant 0 : i32
    return %c0_i32, %c0_i32_0 : i32, i32
  }
  func.func @transform_2(%arg0: i32) -> (i32, i32) {
    %c0_i32 = arith.constant 0 : i32
    %c0_i32_0 = arith.constant 0 : i32
    %c0_i32_1 = arith.constant 0 : i32
    return %c0_i32, %c0_i32_0 : i32, i32
  }
  func.func @transform_3(%arg0: i32) -> (i32, i32) {
    %c0_i32 = arith.constant 0 : i32
    %c0_i32_0 = arith.constant 0 : i32
    %c0_i32_1 = arith.constant 0 : i32
    return %c0_i32, %c0_i32_0 : i32, i32
  }
  func.func @transform_4(%arg0: i32) -> (i32, i32) {
    %c0_i32 = arith.constant 0 : i32
    %c0_i32_0 = arith.constant 0 : i32
    %c0_i32_1 = arith.constant 0 : i32
    return %c0_i32, %c0_i32_0 : i32, i32
  }
  func.func @transform_5(%arg0: i32) -> (i32, i32) {
    %c0_i32 = arith.constant 0 : i32
    %c0_i32_0 = arith.constant 0 : i32
    %c0_i32_1 = arith.constant 0 : i32
    return %c0_i32, %c0_i32_0 : i32, i32
  }
  func.func @transform_6(%arg0: i32) -> (i32, i32) {
    %c0_i32 = arith.constant 0 : i32
    %c0_i32_0 = arith.constant 0 : i32
    %c0_i32_1 = arith.constant 0 : i32
    return %c0_i32, %c0_i32_0 : i32, i32
  }
  func.func @transform_7(%arg0: i32) -> (i32, i32, i32) {
    %c0_i32 = arith.constant 0 : i32
    %c0_i32_0 = arith.constant 0 : i32
    %c0_i32_1 = arith.constant 0 : i32
    return %arg0, %c0_i32, %c0_i32_0 : i32, i32, i32
  }
}

</mosaic_0001>

<bundles_post_ra>
// kernel: _lambda_.3
= control target key start
LH: loop header
LB: loop body
LE: loop exit
PB: predicated region body
PF: predicated region fallthrough
CT: control target
= control target key end

     0   :  { %s799_s15 = smov 0   ;;  %s910_s0 = inlined_call_operand.vmem [shape: bf16[2,64,256], index: 0, kind: input, shape index: {}]   ;;  %s911_s1 = inlined_call_operand.vmem [shape: bf16[256,128], index: 1, kind: input, shape index: {}]   ;;  %s912_s2 = inlined_call_operand.vmem [shape: f32[1,128], index: 2, kind: input, shape index: {}]   ;;  %s913_s3 = inlined_call_operand.vmem [shape: f32[1,128], index: 3, kind: input, shape index: {}]   ;;  %s914_s4 = inlined_call_operand.vmem [shape: f32[2,16,128], index: 4, kind: output, shape index: {}]  }
   0x1 LB: > { %s607_s16 = sadd.s32 4294967295, %s772_s15   ;;  %p611_p0 = scmp.ge.s32.totalorder %s772_s15, 1  ;;  %s772_s15 = sphi %s799_s15, %s14_s15  }
   0x2   : > { %p162_p1 = scmp.lt.s32.totalorder %s772_s15, 3 }
   0x4   : > { %p163_p2 = pnand %p611_p0, %p162_p1 }
   0x5   : > { %p188_p3 = scmp.lt.s32.totalorder (!%p163_p2), %s607_s16, 1 }
   0x6   : > { %166 = sbr.rel (%p163_p2) target bundleno = 222 (0xde), region = 36 }
   0xb   : > { %v731_v0 = vld [vmem:[%s911_s1 + $0x38] sm:$0xff]  ;;  %v730_v2 = vld [vmem:[%s911_s1 + $0x30] sm:$0xff]  ;;  %v729_v4 = vld [vmem:[%s911_s1 + $0x28] sm:$0xff]  ;;  %s916_s16 = smov (!%p188_p3, %s607_s16), 1  ;;  %vm529_vm0 = vcmask 1040384   ;;  %vm531_vm1 = vcmask 1041408  }
   0xc   : > { %v739_v1 = vld [vmem:[%s911_s1 + $0x78] sm:$0xff]  ;;  %374 = vmatpush.bf16.msra.mxu0 %v731_v0  ;;  %740 = vmatpush.bf16.msra.mxu2 %v731_v0  ;;  %v738_v3 = vld [vmem:[%s911_s1 + $0x70] sm:$0xff]  ;;  %v737_v5 = vld [vmem:[%s911_s1 + $0x68] sm:$0xff]  ;;  %s714_s17 = sshll.u32 %s916_s16, 6  ;;  %vm533_vm2 = vcmask 1042432   ;;  %vm535_vm3 = vcmask 1043456  }
   0xd   : > { %403 = vmatpush.bf16.msra.mxu1 %v739_v1  ;;  %748 = vmatpush.bf16.msra.mxu3 %v739_v1  ;;  %v728_v6 = vld [vmem:[%s911_s1 + $0x20] sm:$0xff]  ;;  %v727_v8 = vld [vmem:[%s911_s1 + $0x18] sm:$0xff]  ;;  %v726_v10 = vld [vmem:[%s911_s1 + $0x10] sm:$0xff]  ;;  %s856_s22 = scalar_lea.vmem %s910_s0, %s714_s17  ;;  %s715_s7 = sshll.u32 %s916_s16, 4  ;;  %vm537_vm4 = vcmask 1044480   ;;  %vm539_vm5 = vcmask 1045504  }
   0xe   : > { %v736_v7 = vld [vmem:[%s911_s1 + $0x60] sm:$0xff]  ;;  %v735_v9 = vld [vmem:[%s911_s1 + $0x58] sm:$0xff]  ;;  %v734_v11 = vld [vmem:[%s911_s1 + $0x50] sm:$0xff]  ;;  %vm541_vm6 = vcmask 1046528   ;;  %s197_s10 = scalar_lea.vmem %s914_s4, %s715_s7 }
   0xf   : > { %v725_v12 = vld [vmem:[%s911_s1 + $0x8] sm:$0xff]  ;;  %v724_v14 = vld [vmem:[%s911_s1] sm:$0xff]  ;;  %v626_v28 = vld [vmem:[%s856_s22 + $0x10] sm:$0xf] }
  0x10   : > { %375 = vmatpush.bf16.msra.mxu0 %v730_v2  ;;  %741 = vmatpush.bf16.msra.mxu2 %v730_v2  ;;  %v733_v13 = vld [vmem:[%s911_s1 + $0x48] sm:$0xff]  ;;  %v732_v15 = vld [vmem:[%s911_s1 + $0x40] sm:$0xff]  ;;  %v719_v29 = vld [vmem:[%s856_s22 + $0x14] sm:$0xf0] }
  0x11   : > { %404 = vmatpush.bf16.msra.mxu1 %v738_v3  ;;  %749 = vmatpush.bf16.msra.mxu3 %v738_v3  ;;  %v618_v16 = vld [vmem:[%s856_s22] sm:$0xf]  ;;  %v717_v17 = vld [vmem:[%s856_s22 + $0x4] sm:$0xf0]  ;;  %v716_v20 = vld [vmem:[%s856_s22 + $0x4] sm:$0xf]  ;;  %v627_v36 = vor.u32 %v719_v29, %v626_v28 }
  0x12   : > { %v634_v18 = vld [vmem:[%s856_s22 + $0x20] sm:$0xf]  ;;  %v721_v19 = vld [vmem:[%s856_s22 + $0x24] sm:$0xf0]  ;;  %v620_v21 = vld [vmem:[%s856_s22 + $0x8] sm:$0xf0]  ;;  %v619_v24 = vor.u32 %v717_v17, %v618_v16 }
  0x13   : > { %v720_v22 = vld [vmem:[%s856_s22 + $0x24] sm:$0xf]  ;;  %v636_v23 = vld [vmem:[%s856_s22 + $0x28] sm:$0xf0]  ;;  %v635_v25 = vor.u32 %v721_v19, %v634_v18  ;;  %v623_v26 = vor.u32 %v716_v20, %v620_v21  ;;  %v642_v30 = vld [vmem:[%s856_s22 + $0x30] sm:$0xf] }
  0x14   : > { %376 = vmatpush.bf16.msra.mxu0 %v729_v4  ;;  %742 = vmatpush.bf16.msra.mxu2 %v729_v4  ;;  %v639_v27 = vor.u32 %v720_v22, %v636_v23  ;;  %v723_v31 = vld [vmem:[%s856_s22 + $0x34] sm:$0xf0]  ;;  %v718_v32 = vld [vmem:[%s856_s22 + $0x14] sm:$0xf]  ;;  %v628_v33 = vld [vmem:[%s856_s22 + $0x18] sm:$0xf0] }
  0x15   : > { %405 = vmatpush.bf16.msra.mxu1 %v737_v5  ;;  %750 = vmatpush.bf16.msra.mxu3 %v737_v5  ;;  %v722_v34 = vld [vmem:[%s856_s22 + $0x34] sm:$0xf]  ;;  %v644_v35 = vld [vmem:[%s856_s22 + $0x38] sm:$0xf0]  ;;  %v643_v37 = vor.u32 %v723_v31, %v642_v30  ;;  %v631_v38 = vor.u32 %v718_v32, %v628_v33  ;;  %v764_v43 = vld [vmem:[%s912_s2] ss:$0 sm:$0xff] }
  0x16   : > { %v647_v39 = vor.u32 %v722_v34, %v644_v35  ;;  %v765_v49 = vld [vmem:[%s913_s3] ss:$0 sm:$0xff] }
  0x18   : > { %377 = vmatpush.bf16.msra.mxu0 %v728_v6  ;;  %743 = vmatpush.bf16.msra.mxu2 %v728_v6 }
  0x19   : > { %406 = vmatpush.bf16.msra.mxu1 %v736_v7  ;;  %751 = vmatpush.bf16.msra.mxu3 %v736_v7 }
  0x1c   : > { %378 = vmatpush.bf16.msra.mxu0 %v727_v8  ;;  %744 = vmatpush.bf16.msra.mxu2 %v727_v8 }
  0x1d   : > { %407 = vmatpush.bf16.msra.mxu1 %v735_v9  ;;  %752 = vmatpush.bf16.msra.mxu3 %v735_v9 }
  0x20   : > { %379 = vmatpush.bf16.msra.mxu0 %v726_v10  ;;  %745 = vmatpush.bf16.msra.mxu2 %v726_v10 }
  0x21   : > { %408 = vmatpush.bf16.msra.mxu1 %v734_v11  ;;  %753 = vmatpush.bf16.msra.mxu3 %v734_v11 }
  0x24   : > { %380 = vmatpush.bf16.msra.mxu0 %v725_v12  ;;  %746 = vmatpush.bf16.msra.mxu2 %v725_v12 }
  0x25   : > { %409 = vmatpush.bf16.msra.mxu1 %v733_v13  ;;  %754 = vmatpush.bf16.msra.mxu3 %v733_v13 }
  0x28   : > { %381 = vmatpush.bf16.msra.mxu0 %v724_v14  ;;  %747 = vmatpush.bf16.msra.mxu2 %v724_v14 }
  0x29   : > { %410 = vmatpush.bf16.msra.mxu1 %v732_v15  ;;  %755 = vmatpush.bf16.msra.mxu3 %v732_v15 }
  0x2b   : > { %382 = vmatmul.bf16.vlgmr.msra.gmra.mxu0 %v619_v24  ;;  %392 = vmatmul.bf16.vlgmr.msra.gmra.mxu2 %v635_v25 }
  0x2c   : > { %411 = vmatmul.bf16.vlgmr.msra.gmra.mxu1 %v623_v26  ;;  %421 = vmatmul.bf16.vlgmr.msra.gmra.mxu3 %v639_v27 }
  0x3b   : > { %387 = vmatmul.bf16.gmra.mxu0 %v627_v36  ;;  %397 = vmatmul.bf16.gmra.mxu2 %v643_v37 }
  0x3c   : > { %416 = vmatmul.bf16.gmra.mxu1 %v631_v38  ;;  %426 = vmatmul.bf16.gmra.mxu3 %v647_v39 }
  0xa8   : > { %v383_v40 = vpop.f32.mrf.mxu0 }
  0xa9   : > { %v412_v41 = vpop.f32.mrf.mxu1 }
  0xaa   : > { %v413_v42 = vadd.f32 %v412_v41, %v383_v40 }
  0xac   : > { %v436_v48 = vmul.f32 %v764_v43, %v413_v42 }
  0xae   : > { %v393_v44 = vpop.f32.mrf.mxu2  ;;  %v448_v52 = vadd.f32 %v765_v49, %v436_v48 }
  0xaf   : > { %v422_v45 = vpop.f32.mrf.mxu3 }
  0xb0   : > { %v385_v46 = vpop.f32.mrf.mxu0  ;;  %v456_v59 = vmax.f32 %v448_v52, 0.0  ;;  %v423_v62 = vadd.f32 %v422_v45, %v393_v44 }
  0xb1   : > { %v414_v47 = vpop.f32.mrf.mxu1 }
  0xb2   : > { %v415_v50 = vadd.f32 %v414_v47, %v385_v46  ;;  %v440_v6 = vmul.f32 %v764_v43, %v423_v62 }
  0xb4   : > { %v437_v51 = vmul.f32 %v764_v43, %v415_v50  ;;  %v452_v13 = vadd.f32 %v765_v49, %v440_v6 }
  0xb6   : > { %v449_v53 = vadd.f32 %v765_v49, %v437_v51  ;;  %v395_v54 = vpop.f32.mrf.mxu2  ;;  %v460_v24 = vmax.f32 %v452_v13, 0.0 }
  0xb7   : > { %v424_v55 = vpop.f32.mrf.mxu3 }
  0xb8   : > { %v457_v56 = vmax.f32 %v449_v53, 0.0  ;;  %v388_v57 = vpop.f32.mrf.mxu0  ;;  %v425_v1 = vadd.f32 %v424_v55, %v395_v54 }
  0xb9   : > { %v417_v58 = vpop.f32.mrf.mxu1 }
  0xba   : > { %v418_v60 = vadd.f32 %v417_v58, %v388_v57  ;;  %v464_v61 = vmax.f32 %v456_v59, %v457_v56  ;;  %v441_v9 = vmul.f32 %v764_v43, %v425_v1 }
  0xbc   : > { %v438_v63 = vmul.f32 %v764_v43, %v418_v60  ;;  %v466_v3 = vrot.slane %v464_v61, 1  ;;  %v469_v16 = vrot.slane %v464_v61, 2  ;;  %v453_v19 = vadd.f32 %v765_v49, %v441_v9 }
  0xbe   : > { %v398_v0 = vpop.f32.mrf.mxu2  ;;  %v450_v7 = vadd.f32 %v765_v49, %v438_v63  ;;  %v468_v12 = vmax.f32 %v464_v61, %v466_v3  ;;  %v461_v29 = vmax.f32 %v453_v19, 0.0 }
  0xbf   : > { %v427_v2 = vpop.f32.mrf.mxu3 }
  0xc0   : > { %v428_v4 = vadd.f32 %v427_v2, %v398_v0  ;;  %v390_v5 = vpop.f32.mrf.mxu0  ;;  %v458_v14 = vmax.f32 %v450_v7, 0.0  ;;  %v471_v22 = vmax.f32 %v468_v12, %v469_v16 }
  0xc1   : > { %v419_v8 = vpop.f32.mrf.mxu1 }
  0xc2   : > { %v442_v10 = vmul.f32 %v764_v43, %v428_v4  ;;  %v420_v11 = vadd.f32 %v419_v8, %v390_v5  ;;  %v472_v25 = vmax.f32 %v457_v56, %v458_v14  ;;  %v500_v32 = vrot.slane %v471_v22, 1 }
  0xc3   : > { %v530_v34 = vsel %vm529_vm0, %v468_v12, %v471_v22  ;;  %v502_v39 = vrot.slane %v471_v22, 2 }
  0xc4   : > { %v439_v15 = vmul.f32 %v764_v43, %v420_v11  ;;  %v454_v17 = vadd.f32 %v765_v49, %v442_v10  ;;  %v532_v44 = vsel %vm531_vm1, %v530_v34, %v500_v32 }
  0xc5   : > { %v534_v53 = vsel %vm533_vm2, %v532_v44, %v502_v39 }
  0xc6   : > { %v400_v18 = vpop.f32.mrf.mxu2  ;;  %v451_v20 = vadd.f32 %v765_v49, %v439_v15  ;;  %v462_v27 = vmax.f32 %v454_v17, 0.0 }
  0xc7   : > { %v429_v21 = vpop.f32.mrf.mxu3 }
  0xc8   : > { %v430_v23 = vadd.f32 %v429_v21, %v400_v18  ;;  %v459_v26 = vmax.f32 %v451_v20, 0.0  ;;  %v490_v37 = vmax.f32 %v461_v29, %v462_v27 }
  0xca   : > { %v443_v28 = vmul.f32 %v764_v43, %v430_v23  ;;  %v473_v30 = vmax.f32 %v472_v25, %v459_v26  ;;  %v481_v31 = vmax.f32 %v459_v26, %v460_v24 }
  0xcc   : > { %v455_v33 = vadd.f32 %v765_v49, %v443_v28  ;;  %v475_v35 = vrot.slane %v473_v30, 1  ;;  %v482_v36 = vmax.f32 %v481_v31, %v461_v29  ;;  %v478_v41 = vrot.slane %v473_v30, 2 }
  0xce   : > { %v463_v38 = vmax.f32 %v455_v33, 0.0  ;;  %v477_v40 = vmax.f32 %v473_v30, %v475_v35  ;;  %v484_v42 = vrot.slane %v482_v36, 1  ;;  %v487_v47 = vrot.slane %v482_v36, 2 }
  0xd0   : > { %v491_v43 = vmax.f32 %v490_v37, %v463_v38  ;;  %v480_v45 = vmax.f32 %v477_v40, %v478_v41  ;;  %v486_v46 = vmax.f32 %v482_v36, %v484_v42  ;;  %v505_v48 = vrot.slane %v477_v40, 4 }
  0xd2   : > { %v493_v49 = vrot.slane %v491_v43, 1  ;;  %v489_v50 = vmax.f32 %v486_v46, %v487_v47  ;;  %v508_v51 = vrot.slane %v480_v45, 4  ;;  %v510_v52 = vrot.slane %v480_v45, 5 }
  0xd3   : > { %v512_v54 = vrot.slane %v480_v45, 6  ;;  %v536_v55 = vsel %vm535_vm3, %v534_v53, %v505_v48  ;;  %v496_v57 = vrot.slane %v491_v43, 2 }
  0xd4   : > { %v495_v56 = vmax.f32 %v491_v43, %v493_v49  ;;  %v515_v58 = vrot.slane %v489_v50, 1  ;;  %v517_v59 = vrot.slane %v489_v50, 2  ;;  %v538_v60 = vsel %vm537_vm4, %v536_v55, %v508_v51 }
  0xd5   : > { %v543_v61 = vsel %vm529_vm0, %v486_v46, %v489_v50  ;;  %v540_v62 = vsel %vm539_vm5, %v538_v60, %v510_v52 }
  0xd6   : > { %v498_v63 = vmax.f32 %v495_v56, %v496_v57  ;;  %v520_v0 = vrot.slane %v495_v56, 4  ;;  %v542_v1 = vsel %vm541_vm6, %v540_v62, %v512_v54  ;;  %v544_v2 = vsel %vm531_vm1, %v543_v61, %v515_v58 }
  0xd7   : > { %550 = vst [vmem:[%s197_s10] sm:$0xff] %v542_v1  ;;  %v545_v5 = vsel %vm533_vm2, %v544_v2, %v517_v59 }
  0xd8   : > { %v523_v3 = vrot.slane %v498_v63, 4  ;;  %v525_v4 = vrot.slane %v498_v63, 5  ;;  %v546_v6 = vsel %vm535_vm3, %v545_v5, %v520_v0  ;;  %v527_v7 = vrot.slane %v498_v63, 6 }
  0xda   : > { %v547_v8 = vsel %vm537_vm4, %v546_v6, %v523_v3 }
  0xdb   : > { %v548_v9 = vsel %vm539_vm5, %v547_v8, %v525_v4 }
  0xdc   : > { %v549_v10 = vsel %vm541_vm6, %v548_v9, %v527_v7 }
  0xdd   : > { %551 = vst [vmem:[%s197_s10 + $0x8] sm:$0xff] %v549_v10 }
  0xde PF: > { %s14_s15 = sadd.s32 1, %s772_s15  }
  0xdf   : > { %p11_p4 = scmp.ge.s32.totalorder %s14_s15, 4  }
  0xe1   :  { %13 = sbr.rel (!%p11_p4) target bundleno = 1 (0x1), region = 66 }

// kernel: _lambda_.4
= control target key start
LH: loop header
LB: loop body
LE: loop exit
PB: predicated region body
PF: predicated region fallthrough
CT: control target
= control target key end

     0   :  { %s3381_s24 = smov 0   ;;  %s3884_s0 = inlined_call_operand.vmem [shape: f32[2,16,128], index: 0, kind: input, shape index: {}]   ;;  %s3885_s1 = inlined_call_operand.vmem [shape: bf16[1152,128], index: 1, kind: input, shape index: {}]   ;;  %s3886_s2 = inlined_call_operand.vmem [shape: f32[1,128], index: 2, kind: input, shape index: {}, may-alias: {2,5}]   ;;  %s3887_s3 = inlined_call_operand.vmem [shape: f32[1,128], index: 3, kind: input, shape index: {}, may-alias: {3,6}]   ;;  %s3888_s4 = inlined_call_operand.vmem [shape: bf16[1152,128], index: 4, kind: input, shape index: {}]   ;;  %s3889_s5 = inlined_call_operand.vmem [shape: f32[1,128], index: 5, kind: input, shape index: {}, may-alias: {2,5}]   ;;  %s3890_s6 = inlined_call_operand.vmem [shape: f32[1,128], index: 6, kind: input, shape index: {}, may-alias: {3,6}]   ;;  %s3891_s7 = inlined_call_operand.vmem [shape: f32[2,16,128], index: 7, kind: output, shape index: {}]  }
   0x1 LB: > { %s2482_s25 = sadd.s32 4294967295, %s3338_s24   ;;  %p2486_p0 = scmp.ge.s32.totalorder %s3338_s24, 1  ;;  %s3338_s24 = sphi %s3381_s24, %s17_s24  }
   0x2   : > { %p237_p1 = scmp.lt.s32.totalorder %s3338_s24, 3 }
   0x4   : > { %p238_p2 = pnand %p2486_p0, %p237_p1 }
   0x5   : > { %p269_p3 = scmp.lt.s32.totalorder (!%p238_p2), %s2482_s25, 1 }
   0x6   : > { %241 = sbr.rel (%p238_p2) target bundleno = 459 (0x1cb), region = 48 }
   0xb   : > { %v3171_v0 = vld [vmem:[%s3885_s1 + $0x38] sm:$0xff]  ;;  %v3340_v4 = vmov 0   ;;  %v3170_v5 = vld [vmem:[%s3885_s1 + $0x30] sm:$0xff]  ;;  %v3169_v9 = vld [vmem:[%s3885_s1 + $0x28] sm:$0xff]  ;;  %s3895_s25 = smov (!%p269_p3, %s2482_s25), 1  ;;  %vm299_vm1 = vcmask 1042432  }
   0xc   : > { %v3187_v1 = vld [vmem:[%s3885_s1 + $0xb8] sm:$0xff]  ;;  %280 = vst [vmem:[#allocation2] sm:$0x7] %v3340_v4  ;;  %1214 = vmatpush.bf16.msra.mxu0 %v3171_v0  ;;  %v3186_v6 = vld [vmem:[%s3885_s1 + $0xb0] sm:$0xff]  ;;  %v3185_v10 = vld [vmem:[%s3885_s1 + $0xa8] sm:$0xff]  ;;  %s3153_s10 = sshll.u32 %s3895_s25, 4 }
   0xd   : > { %v3179_v2 = vld [vmem:[%s3885_s1 + $0x78] sm:$0xff]  ;;  %1242 = vmatpush.bf16.msra.mxu2 %v3187_v1  ;;  %281 = vst [vmem:[#allocation2 + $0x4] sm:$0x7] %v3340_v4  ;;  %v3178_v7 = vld [vmem:[%s3885_s1 + $0x70] sm:$0xff]  ;;  %v3177_v11 = vld [vmem:[%s3885_s1 + $0x68] sm:$0xff]  ;;  %s3445_s17 = scalar_lea.vmem %s3884_s0, %s3153_s10  ;;  %s278_s18 = scalar_lea.vmem %s3891_s7, %s3153_s10 }
   0xe   : > { %v3195_v3 = vld [vmem:[%s3885_s1 + $0xf8] sm:$0xff]  ;;  %1228 = vmatpush.bf16.msra.mxu1 %v3179_v2  ;;  %v3194_v8 = vld [vmem:[%s3885_s1 + $0xf0] sm:$0xff]  ;;  %282 = vst [vmem:[#allocation2 + $0x8] sm:$0x7] %v3340_v4  ;;  %v3193_v12 = vld [vmem:[%s3885_s1 + $0xe8] sm:$0xff] }
   0xf   : > { %1256 = vmatpush.bf16.msra.mxu3 %v3195_v3  ;;  %283 = vst [vmem:[#allocation2 + $0xc] sm:$0x7] %v3340_v4  ;;  %v3168_v13 = vld [vmem:[%s3885_s1 + $0x20] sm:$0xff]  ;;  %v3167_v17 = vld [vmem:[%s3885_s1 + $0x18] sm:$0xff]  ;;  %v287_v22 = vld [vmem:[%s3445_s17 + $0x8] sm:$0xff] }
  0x10   : > { %1215 = vmatpush.bf16.msra.mxu0 %v3170_v5  ;;  %1354 = vst [vmem:[#allocation3] sm:$0x7] %v3340_v4  ;;  %v3184_v14 = vld [vmem:[%s3885_s1 + $0xa0] sm:$0xff]  ;;  %v3183_v18 = vld [vmem:[%s3885_s1 + $0x98] sm:$0xff]  ;;  %v3166_v23 = vld [vmem:[%s3885_s1 + $0x10] sm:$0xff]  ;;  %v289_v27 = vpack.c.bf16 %v287_v22, %v287_v22 }
  0x11   : > { %1243 = vmatpush.bf16.msra.mxu2 %v3186_v6  ;;  %284 = vst [vmem:[#allocation2 + $0x10] sm:$0x7] %v3340_v4  ;;  %v3176_v15 = vld [vmem:[%s3885_s1 + $0x60] sm:$0xff]  ;;  %v3175_v19 = vld [vmem:[%s3885_s1 + $0x58] sm:$0xff]  ;;  %v3182_v24 = vld [vmem:[%s3885_s1 + $0x90] sm:$0xff] }
  0x12   : > { %1229 = vmatpush.bf16.msra.mxu1 %v3178_v7  ;;  %285 = vst [vmem:[#allocation2 + $0x14] sm:$0x7] %v3340_v4  ;;  %v3192_v16 = vld [vmem:[%s3885_s1 + $0xe0] sm:$0xff]  ;;  %v3191_v20 = vld [vmem:[%s3885_s1 + $0xd8] sm:$0xff]  ;;  %v3174_v25 = vld [vmem:[%s3885_s1 + $0x50] sm:$0xff]  ;;  %v315_v33 = vshrl.u32 %v289_v27, 16 }
  0x13   : > { %1257 = vmatpush.bf16.msra.mxu3 %v3194_v8  ;;  %1355 = vst [vmem:[#allocation3 + $0x4] sm:$0x7] %v3340_v4  ;;  %v286_v21 = vld [vmem:[%s3445_s17] sm:$0xff]  ;;  %vm300_vm0 = vsmask.f32 2306  ;;  %v3190_v28 = vld [vmem:[%s3885_s1 + $0xd0] sm:$0xff] }
  0x14   : > { %1216 = vmatpush.bf16.msra.mxu0 %v3169_v9  ;;  %1356 = vst [vmem:[#allocation3 + $0x8] sm:$0x7] %v3340_v4  ;;  %v288_v26 = vpack.c.bf16 %v286_v21, %v286_v21  ;;  %v335_v29 = vld [vmem:[#allocation2] sm:$0x3]  ;;  %v318_v34 = vshll.u32 %v289_v27, 16  ;;  %v3165_v35 = vld [vmem:[%s3885_s1 + $0x8] sm:$0xff]  ;;  %vm3487_vm2 = vmand %vm299_vm1, %vm300_vm0 }
  0x15   : > { %1244 = vmatpush.bf16.msra.mxu2 %v3185_v10  ;;  %1357 = vst [vmem:[#allocation3 + $0xc] sm:$0x7] %v3340_v4  ;;  %v349_v30 = vld [vmem:[#allocation2] sm:$0x6]  ;;  %v3181_v36 = vld [vmem:[%s3885_s1 + $0x88] sm:$0xff]  ;;  %v317_v43 = vrot.slane %v315_v33, 7 }
  0x16   : > { %1230 = vmatpush.bf16.msra.mxu1 %v3177_v11  ;;  %1358 = vst [vmem:[#allocation3 + $0x10] sm:$0x7] %v3340_v4  ;;  %v291_v31 = vshrl.u32 %v288_v26, 16  ;;  %v294_v32 = vshll.u32 %v288_v26, 16  ;;  %v302_v37 = vld [vmem:[#allocation2 + $0x4] sm:$0x7] }
  0x17   : > { %1258 = vmatpush.bf16.msra.mxu3 %v3193_v12  ;;  %1359 = vst [vmem:[#allocation3 + $0x14] sm:$0x7] %v3340_v4  ;;  %v323_v38 = vld [vmem:[#allocation2 + $0xc] sm:$0x7]  ;;  %v2491_v39 = vrot.slane %v349_v30, 9  ;;  %v3173_v45 = vld [vmem:[%s3885_s1 + $0x48] sm:$0xff]  ;;  %v320_v53 = vor.u32 %v318_v34, %v317_v43 }
  0x18   : > { %1217 = vmatpush.bf16.msra.mxu0 %v3168_v13  ;;  %336 = vst [vmem:[#allocation4] sm:$0x3] %v335_v29  ;;  %v293_v40 = vrot.slane %v291_v31, 7  ;;  %v305_v41 = vrot.slane %v291_v31, 5  ;;  %v306_v42 = vrot.slane %v294_v32, 6  ;;  %v326_v48 = vrot.slane %v315_v33, 5 }
  0x19   : > { %1245 = vmatpush.bf16.msra.mxu2 %v3184_v14  ;;  %v337_v44 = vld [vmem:[#allocation2] sm:$0x7]  ;;  %354 = vst [vmem:[#allocation4 + $0x8] sm:$0x3] %v2491_v39  ;;  %v3189_v49 = vld [vmem:[%s3885_s1 + $0xc8] sm:$0xff]  ;;  %v327_v54 = vrot.slane %v318_v34, 6  ;;  %v324_v61 = vsel %vm3487_vm2, %v320_v53, %v323_v38 }
  0x1a   : > { %1231 = vmatpush.bf16.msra.mxu1 %v3176_v15  ;;  %v339_v46 = vshrl.u32 %v337_v44, 16  ;;  %v342_v47 = vshll.u32 %v337_v44, 16  ;;  %v296_v50 = vor.u32 %v294_v32, %v293_v40  ;;  %v307_v51 = vor.u32 %v306_v42, %v305_v41  ;;  %v311_v52 = vld [vmem:[#allocation2 + $0x8] sm:$0x7]  ;;  %v1406_v58 = vld [vmem:[#allocation3] sm:$0x7] }
  0x1b   : > { %1259 = vmatpush.bf16.msra.mxu3 %v3192_v16  ;;  %v3164_v62 = vld [vmem:[%s3885_s1] sm:$0xff]  ;;  %v3203_v0 = vld [vmem:[%s3885_s1 + $0x138] sm:$0xff]  ;;  %v328_v2 = vor.u32 %v327_v54, %v326_v48  ;;  %325 = vst [vmem:[#allocation2 + $0xc] sm:$0x7] %v324_v61  ;;  %v1408_v9 = vshrl.u32 %v1406_v58, 16  ;;  %v1411_v13 = vshll.u32 %v1406_v58, 16 }
  0x1c   : > { %1218 = vmatpush.bf16.msra.mxu0 %v3167_v17  ;;  %v341_v56 = vrot.slane %v339_v46, 4  ;;  %v344_v57 = vrot.slane %v342_v47, 5  ;;  %v303_v59 = vsel %vm3487_vm2, %v296_v50, %v302_v37  ;;  %v308_v60 = vrot.slane %v307_v51, 4  ;;  %v3180_v63 = vld [vmem:[%s3885_s1 + $0x80] sm:$0xff]  ;;  %v3219_v3 = vld [vmem:[%s3885_s1 + $0x1b8] sm:$0xff]  ;;  %v3202_v15 = vld [vmem:[%s3885_s1 + $0x130] sm:$0xff] }
  0x1d   : > { %1246 = vmatpush.bf16.msra.mxu2 %v3183_v18  ;;  %304 = vst [vmem:[#allocation2 + $0x4] sm:$0x7] %v303_v59  ;;  %v3172_v4 = vld [vmem:[%s3885_s1 + $0x40] sm:$0xff]  ;;  %v329_v10 = vrot.slane %v328_v2, 4  ;;  %v3211_v11 = vld [vmem:[%s3885_s1 + $0x178] sm:$0xff]  ;;  %v3218_v16 = vld [vmem:[%s3885_s1 + $0x1b0] sm:$0xff] }
  0x1e   : > { %1232 = vmatpush.bf16.msra.mxu1 %v3175_v19  ;;  %v345_v1 = vor.u32 %v344_v57, %v341_v56  ;;  %v312_v5 = vsel %vm3487_vm2, %v308_v60, %v311_v52  ;;  %v332_v6 = vld [vmem:[#allocation2 + $0x10] sm:$0x7]  ;;  %v3227_v12 = vld [vmem:[%s3885_s1 + $0x1f8] sm:$0xff]  ;;  %v3210_v17 = vld [vmem:[%s3885_s1 + $0x170] sm:$0xff]  ;;  %v3535_v19 = vrot.slane %v1408_v9, 4 }
  0x1f   : > { %1260 = vmatpush.bf16.msra.mxu3 %v3191_v20  ;;  %v3188_v7 = vld [vmem:[%s3885_s1 + $0xc0] sm:$0xff]  ;;  %313 = vst [vmem:[#allocation2 + $0x8] sm:$0x7] %v312_v5  ;;  %v333_v14 = vsel %vm3487_vm2, %v329_v10, %v332_v6  ;;  %v3226_v18 = vld [vmem:[%s3885_s1 + $0x1f0] sm:$0xff]  ;;  %v3201_v20 = vld [vmem:[%s3885_s1 + $0x128] sm:$0xff] }
  0x20   : > { %1219 = vmatpush.bf16.msra.mxu0 %v3166_v23  ;;  %v346_v8 = vrot.slane %v345_v1, 4  ;;  %334 = vst [vmem:[#allocation2 + $0x10] sm:$0x7] %v333_v14  ;;  %v3217_v21 = vld [vmem:[%s3885_s1 + $0x1a8] sm:$0xff]  ;;  %v3200_v39 = vld [vmem:[%s3885_s1 + $0x120] sm:$0xff]  ;;  %v3199_v60 = vld [vmem:[%s3885_s1 + $0x118] sm:$0xff] }
  0x21   : > { %1247 = vmatpush.bf16.msra.mxu2 %v3182_v24  ;;  %v3209_v29 = vld [vmem:[%s3885_s1 + $0x168] sm:$0xff]  ;;  %v3216_v40 = vld [vmem:[%s3885_s1 + $0x1a0] sm:$0xff]  ;;  %v3198_v14 = vld [vmem:[%s3885_s1 + $0x110] sm:$0xff] }
  0x22   : > { %1233 = vmatpush.bf16.msra.mxu1 %v3174_v25  ;;  %348 = vst [vmem:[#allocation4 + $0x4] sm:$0x3] %v346_v8  ;;  %v518_v26 = vld [vmem:[#allocation2 + $0xc] sm:$0x3]  ;;  %v3225_v30 = vld [vmem:[%s3885_s1 + $0x1e8] sm:$0xff]  ;;  %v3208_v48 = vld [vmem:[%s3885_s1 + $0x160] sm:$0xff] }
  0x23   : > { %1261 = vmatpush.bf16.msra.mxu3 %v3190_v28  ;;  %v534_v27 = vld [vmem:[#allocation2 + $0xc] sm:$0x6]  ;;  %v1413_v28 = vrot.slane %v1411_v13, 5  ;;  %v520_v32 = vrot.slane %v518_v26, 6  ;;  %v1418_v41 = vld [vmem:[#allocation3] sm:$0x6] }
  0x24   : > { %1220 = vmatpush.bf16.msra.mxu0 %v3165_v35  ;;  %v395_v22 = vld [vmem:[#allocation2 + $0x4] sm:$0x3]  ;;  %v523_v43 = vld [vmem:[#allocation2 + $0xc] sm:$0x7]  ;;  %v3224_v59 = vld [vmem:[%s3885_s1 + $0x1e0] sm:$0xff] }
  0x25   : > { %1248 = vmatpush.bf16.msra.mxu2 %v3181_v36  ;;  %v411_v23 = vld [vmem:[#allocation2 + $0x4] sm:$0x6]  ;;  %v397_v25 = vrot.slane %v395_v22, 6  ;;  %v536_v36 = vrot.slane %v534_v27, 7  ;;  %522 = vst [vmem:[#allocation4 + $0x24] sm:$0xc] %v520_v32  ;;  %v1414_v52 = vor.u32 %v1413_v28, %v3535_v19 }
  0x26   : > { %1234 = vmatpush.bf16.msra.mxu1 %v3173_v45  ;;  %v400_v24 = vld [vmem:[#allocation2 + $0x4] sm:$0x7]  ;;  %v458_v31 = vld [vmem:[#allocation2 + $0x8] sm:$0x3]  ;;  %v413_v33 = vrot.slane %v411_v23, 7  ;;  %v525_v50 = vshrl.u32 %v523_v43, 16 }
  0x27   : > { %1262 = vmatpush.bf16.msra.mxu3 %v3189_v49  ;;  %v472_v34 = vld [vmem:[#allocation2 + $0x8] sm:$0x6]  ;;  %399 = vst [vmem:[#allocation4] sm:$0xc] %v397_v25  ;;  %v402_v37 = vshrl.u32 %v400_v24, 16  ;;  %v405_v38 = vshll.u32 %v400_v24, 16 }
  0x28   : > { %1221 = vmatpush.bf16.msra.mxu0 %v3164_v62  ;;  %v2494_v35 = vrot.slane %v472_v34, 9  ;;  %459 = vst [vmem:[#allocation4 + $0x24] sm:$0x3] %v458_v31  ;;  %v460_v42 = vld [vmem:[#allocation2 + $0x8] sm:$0x7]  ;;  %v528_v51 = vshll.u32 %v523_v43, 16 }
  0x29   : > { %1249 = vmatpush.bf16.msra.mxu2 %v3180_v63  ;;  %v404_v44 = vrot.slane %v402_v37, 6  ;;  %v407_v45 = vrot.slane %v405_v38, 7  ;;  %v462_v46 = vshrl.u32 %v460_v42, 16  ;;  %v465_v47 = vshll.u32 %v460_v42, 16  ;;  %v1404_v49 = vld [vmem:[#allocation3] sm:$0x3] }
  0x2a   : > { %1235 = vmatpush.bf16.msra.mxu1 %v3172_v4  ;;  %415 = vst [vmem:[#allocation4 + $0x8] sm:$0xc] %v413_v33  ;;  %v355_v53 = vld [vmem:[#allocation2 + $0x4] sm:$0x3]  ;;  %v416_v58 = vld [vmem:[#allocation2 + $0x8] sm:$0x3] }
  0x2b   : > { %1263 = vmatpush.bf16.msra.mxu3 %v3188_v7  ;;  %477 = vst [vmem:[#allocation4 + $0x2c] sm:$0x3] %v2494_v35  ;;  %v408_v54 = vor.u32 %v407_v45, %v404_v44  ;;  %v464_v56 = vrot.slane %v462_v46, 4  ;;  %v467_v57 = vrot.slane %v465_v47, 5  ;;  %v527_v61 = vrot.slane %v525_v50, 6  ;;  %v3207_v7 = vld [vmem:[%s3885_s1 + $0x158] sm:$0xff] }
  0x2c   : > { %1270 = vmatpush.bf16.msrb.mxu0 %v3203_v0  ;;  %538 = vst [vmem:[#allocation4 + $0x2c] sm:$0xc] %v536_v36  ;;  %v530_v62 = vrot.slane %v528_v51, 7  ;;  %v2821_v63 = vrot.slane %v1418_v41, 9  ;;  %v3215_v0 = vld [vmem:[%s3885_s1 + $0x198] sm:$0xff]  ;;  %v1415_v5 = vrot.slane %v1414_v52, 4 }
  0x2d   : > { %1298 = vmatpush.bf16.msrb.mxu2 %v3219_v3  ;;  %410 = vst [vmem:[#allocation4 + $0x4] sm:$0xc] %v408_v54  ;;  %v468_v1 = vor.u32 %v467_v57, %v464_v56  ;;  %v539_v2 = vld [vmem:[#allocation2 + $0x10] sm:$0x3]  ;;  %v418_v6 = vrot.slane %v416_v58, 6  ;;  %v3223_v8 = vld [vmem:[%s3885_s1 + $0x1d8] sm:$0xff] }
  0x2e   : > { %1284 = vmatpush.bf16.msrb.mxu1 %v3211_v11  ;;  %v2499_v3 = vld [vmem:[#allocation4] sm:$0xf]  ;;  %v531_v4 = vor.u32 %v530_v62, %v527_v61  ;;  %356 = vst [vmem:[#allocation4 + $0xc] sm:$0x3] %v355_v53  ;;  %v478_v10 = vld [vmem:[#allocation2 + $0xc] sm:$0x3] }
  0x2f   : > { %1312 = vmatpush.bf16.msrb.mxu3 %v3227_v12  ;;  %1405 = vst [vmem:[#allocation4] sm:$0x3] %v1404_v49  ;;  %v469_v9 = vrot.slane %v468_v1, 4  ;;  %v541_v11 = vrot.slane %v539_v2, 6  ;;  %v357_v12 = vld [vmem:[#allocation2 + $0x4] sm:$0x7] }
  0x30   : > { %1271 = vmatpush.bf16.msrb.mxu0 %v3202_v15  ;;  %v3159_v13 = vld [vmem:[#allocation4 + $0x20] sm:$0xf0]  ;;  %533 = vst [vmem:[#allocation4 + $0x28] sm:$0xc] %v531_v4  ;;  %v359_v15 = vshrl.u32 %v357_v12, 16  ;;  %v3214_v19 = vld [vmem:[%s3885_s1 + $0x190] sm:$0xff] }
  0x31   : > { %1299 = vmatpush.bf16.msrb.mxu2 %v3218_v16  ;;  %v362_v16 = vshll.u32 %v357_v12, 16  ;;  %471 = vst [vmem:[#allocation4 + $0x28] sm:$0x3] %v469_v9  ;;  %v3222_v22 = vld [vmem:[%s3885_s1 + $0x1d0] sm:$0xff]  ;;  %v480_v28 = vld [vmem:[#allocation2 + $0xc] sm:$0x7] }
  0x32   : > { %1285 = vmatpush.bf16.msrb.mxu1 %v3210_v17  ;;  %v2500_v17 = vor.u32 %v3159_v13, %v2499_v3  ;;  %v361_v23 = vrot.slane %v359_v15, 4  ;;  %420 = vst [vmem:[#allocation4 + $0xc] sm:$0xc] %v418_v6  ;;  %v3197_v31 = vld [vmem:[%s3885_s1 + $0x108] sm:$0xff]  ;;  %v482_v36 = vshrl.u32 %v480_v28, 16  ;;  %v485_v37 = vshll.u32 %v480_v28, 16 }
  0x33   : > { %1313 = vmatpush.bf16.msrb.mxu3 %v3226_v18  ;;  %v2507_v18 = vld [vmem:[#allocation4 + $0x8] sm:$0xf]  ;;  %v364_v24 = vrot.slane %v362_v16, 5  ;;  %v3160_v27 = vld [vmem:[#allocation4 + $0x28] sm:$0xf0]  ;;  %v3196_v53 = vld [vmem:[%s3885_s1 + $0x100] sm:$0xff] }
  0x34   : > { %1272 = vmatpush.bf16.msrb.mxu0 %v3201_v20  ;;  %v421_v20 = vld [vmem:[#allocation2 + $0x8] sm:$0x7]  ;;  %1423 = vst [vmem:[#allocation4 + $0x8] sm:$0x3] %v2821_v63  ;;  %v3213_v35 = vld [vmem:[%s3885_s1 + $0x188] sm:$0xff]  ;;  %v484_v45 = vrot.slane %v482_v36, 4 }
  0x35   : > { %1300 = vmatpush.bf16.msrb.mxu2 %v3217_v21  ;;  %v3206_v21 = vld [vmem:[%s3885_s1 + $0x150] sm:$0xff]  ;;  %v423_v25 = vshrl.u32 %v421_v20, 16  ;;  %v426_v26 = vshll.u32 %v421_v20, 16  ;;  %1222 = vmatmul.bf16.vlgmr.msra.gmra.mxu0 %v2500_v17  ;;  %479 = vst [vmem:[#allocation4 + $0x30] sm:$0x3] %v478_v10  ;;  %v365_v32 = vor.u32 %v364_v24, %v361_v23  ;;  %v487_v46 = vrot.slane %v485_v37, 5 }
  0x36   : > { %1286 = vmatpush.bf16.msrb.mxu1 %v3209_v29  ;;  %v2508_v29 = vor.u32 %v3160_v27, %v2507_v18  ;;  %v544_v38 = vld [vmem:[#allocation2 + $0x10] sm:$0x7]  ;;  %543 = vst [vmem:[#allocation4 + $0x30] sm:$0xc] %v541_v11  ;;  %v375_v47 = vld [vmem:[#allocation2 + $0x8] sm:$0x3] }
  0x37   : > { %1314 = vmatpush.bf16.msrb.mxu3 %v3225_v30  ;;  %v3155_v30 = vld [vmem:[#allocation4 + $0x4] sm:$0xf]  ;;  %v425_v33 = vrot.slane %v423_v25, 6  ;;  %v428_v34 = vrot.slane %v426_v26, 7  ;;  %v366_v41 = vrot.slane %v365_v32, 4  ;;  %v546_v43 = vshrl.u32 %v544_v38, 16 }
  0x38   : > { %1273 = vmatpush.bf16.msrb.mxu0 %v3200_v39  ;;  %1417 = vst [vmem:[#allocation4 + $0x4] sm:$0x3] %v1415_v5  ;;  %1250 = vmatmul.bf16.vlgmr.msra.gmra.mxu2 %v2508_v29  ;;  %v3205_v39 = vld [vmem:[%s3885_s1 + $0x148] sm:$0xff]  ;;  %v549_v44 = vshll.u32 %v544_v38, 16  ;;  %v3212_v54 = vld [vmem:[%s3885_s1 + $0x180] sm:$0xff]  ;;  %v3235_v56 = vld [vmem:[%s3885_s1 + $0x238] sm:$0xff]  ;;  %v488_v57 = vor.u32 %v487_v46, %v484_v45 }
  0x39   : > { %1301 = vmatpush.bf16.msrb.mxu2 %v3216_v40  ;;  %v3221_v40 = vld [vmem:[%s3885_s1 + $0x1c8] sm:$0xff]  ;;  %v429_v42 = vor.u32 %v428_v34, %v425_v33  ;;  %368 = vst [vmem:[#allocation4 + $0x10] sm:$0x3] %v366_v41  ;;  %v548_v50 = vrot.slane %v546_v43, 6  ;;  %v498_v61 = vld [vmem:[#allocation2 + $0x10] sm:$0x3] }
  0x3a   : > { %1287 = vmatpush.bf16.msrb.mxu1 %v3208_v48  ;;  %v437_v48 = vld [vmem:[#allocation2 + $0xc] sm:$0x3]  ;;  %v2501_v49 = vld [vmem:[#allocation4 + $0x24] sm:$0xf0]  ;;  %v551_v51 = vrot.slane %v549_v44, 7  ;;  %v489_v1 = vrot.slane %v488_v57, 4 }
  0x3b   : > { %1315 = vmatpush.bf16.msrb.mxu3 %v3224_v59  ;;  %v2504_v52 = vor.u32 %v3155_v30, %v2501_v49  ;;  %431 = vst [vmem:[#allocation4 + $0x10] sm:$0xc] %v429_v42  ;;  %v439_v58 = vrot.slane %v437_v48, 6  ;;  %v3204_v59 = vld [vmem:[%s3885_s1 + $0x140] sm:$0xff]  ;;  %v3156_v63 = vld [vmem:[#allocation4 + $0xc] sm:$0xf] }
  0x3c   : > { %1274 = vmatpush.bf16.msrb.mxu0 %v3199_v60  ;;  %v552_v60 = vor.u32 %v551_v51, %v548_v50  ;;  %376 = vst [vmem:[#allocation4 + $0x18] sm:$0x3] %v375_v47  ;;  %v561_v62 = vld [vmem:[#allocation2 + $0x14] sm:$0x3]  ;;  %v1630_v3 = vld [vmem:[#allocation3 + $0x14] sm:$0x3] }
  0x3d   : > { %1302 = vmatpush.bf16.msrb.mxu2 %v3215_v0  ;;  %1236 = vmatmul.bf16.vlgmr.msra.gmra.mxu1 %v2504_v52  ;;  %v3220_v0 = vld [vmem:[%s3885_s1 + $0x1c0] sm:$0xff]  ;;  %441 = vst [vmem:[#allocation4 + $0x18] sm:$0xc] %v439_v58  ;;  %v563_v2 = vrot.slane %v561_v62, 6  ;;  %v369_v4 = vld [vmem:[#allocation2 + $0x4] sm:$0x6] }
  0x3e   : > { %1288 = vmatpush.bf16.msrb.mxu1 %v3207_v7  ;;  %554 = vst [vmem:[#allocation4 + $0x34] sm:$0xc] %v552_v60  ;;  %v2509_v5 = vld [vmem:[#allocation4 + $0x2c] sm:$0xf0]  ;;  %v2492_v6 = vrot.slane %v369_v4, 9  ;;  %v1632_v15 = vrot.slane %v1630_v3, 6 }
  0x3f   : > { %1316 = vmatpush.bf16.msrb.mxu3 %v3223_v8  ;;  %491 = vst [vmem:[#allocation4 + $0x34] sm:$0x3] %v489_v1  ;;  %v3234_v7 = vld [vmem:[%s3885_s1 + $0x230] sm:$0xff]  ;;  %v2512_v8 = vor.u32 %v3156_v63, %v2509_v5  ;;  %v432_v9 = vld [vmem:[#allocation2 + $0x8] sm:$0x6]  ;;  %v3232_v49 = vld [vmem:[%s3885_s1 + $0x220] sm:$0xff] }
  0x40   : > { %1275 = vmatpush.bf16.msrb.mxu0 %v3198_v14  ;;  %499 = vst [vmem:[#allocation4 + $0x3c] sm:$0x3] %v498_v61  ;;  %v492_v10 = vld [vmem:[#allocation2 + $0xc] sm:$0x6]  ;;  %v434_v11 = vrot.slane %v432_v9, 7  ;;  %v3230_v4 = vld [vmem:[%s3885_s1 + $0x210] sm:$0xff] }
  0x41   : > { %1303 = vmatpush.bf16.msrb.mxu2 %v3214_v19  ;;  %565 = vst [vmem:[#allocation4 + $0x3c] sm:$0xc] %v563_v2  ;;  %v2495_v12 = vrot.slane %v492_v10, 9  ;;  %v555_v13 = vld [vmem:[#allocation2 + $0x10] sm:$0x6]  ;;  %1264 = vmatmul.bf16.vlgmr.msra.gmra.mxu3 %v2512_v8  ;;  %v3231_v58 = vld [vmem:[%s3885_s1 + $0x218] sm:$0xff] }
  0x42   : > { %1289 = vmatpush.bf16.msrb.mxu1 %v3206_v21  ;;  %v2515_v14 = vld [vmem:[#allocation4 + $0x10] sm:$0xf]  ;;  %374 = vst [vmem:[#allocation4 + $0x14] sm:$0x3] %v2492_v6  ;;  %v557_v16 = vrot.slane %v555_v13, 7  ;;  %v3229_v9 = vld [vmem:[%s3885_s1 + $0x208] sm:$0xff] }
  0x43   : > { %1317 = vmatpush.bf16.msrb.mxu3 %v3222_v22  ;;  %436 = vst [vmem:[#allocation4 + $0x14] sm:$0xc] %v434_v11  ;;  %v377_v17 = vld [vmem:[#allocation2 + $0x8] sm:$0x7]  ;;  %v442_v18 = vld [vmem:[#allocation2 + $0xc] sm:$0x7] }
  0x44   : > { %1276 = vmatpush.bf16.msrb.mxu0 %v3197_v31  ;;  %v2523_v19 = vld [vmem:[#allocation4 + $0x18] sm:$0xf]  ;;  %497 = vst [vmem:[#allocation4 + $0x38] sm:$0x3] %v2495_v12  ;;  %v379_v20 = vshrl.u32 %v377_v17, 16  ;;  %v382_v21 = vshll.u32 %v377_v17, 16 }
  0x45   : > { %1304 = vmatpush.bf16.msrb.mxu2 %v3213_v35  ;;  %v3233_v22 = vld [vmem:[%s3885_s1 + $0x228] sm:$0xff]  ;;  %559 = vst [vmem:[#allocation4 + $0x38] sm:$0xc] %v557_v16  ;;  %v444_v23 = vshrl.u32 %v442_v18, 16  ;;  %v447_v24 = vshll.u32 %v442_v18, 16  ;;  %v3228_v12 = vld [vmem:[%s3885_s1 + $0x200] sm:$0xff] }
  0x46   : > { %1290 = vmatpush.bf16.msrb.mxu1 %v3205_v39  ;;  %v500_v25 = vld [vmem:[#allocation2 + $0x10] sm:$0x7]  ;;  %v3161_v26 = vld [vmem:[#allocation4 + $0x30] sm:$0xf0]  ;;  %v381_v27 = vrot.slane %v379_v20, 4  ;;  %v384_v28 = vrot.slane %v382_v21, 5 }
  0x47   : > { %1318 = vmatpush.bf16.msrb.mxu3 %v3221_v40  ;;  %v502_v29 = vshrl.u32 %v500_v25, 16  ;;  %v505_v30 = vshll.u32 %v500_v25, 16  ;;  %v2516_v31 = vor.u32 %v3161_v26, %v2515_v14  ;;  %v446_v32 = vrot.slane %v444_v23, 6  ;;  %v566_v34 = vld [vmem:[#allocation2 + $0x14] sm:$0x7]  ;;  %v3252_v20 = vld [vmem:[%s3888_s4 + $0x38] sm:$0xff] }
  0x48   : > { %1277 = vmatpush.bf16.msrb.mxu0 %v3196_v53  ;;  %v449_v33 = vrot.slane %v447_v24, 7  ;;  %v1635_v35 = vld [vmem:[#allocation3 + $0x14] sm:$0x7]  ;;  %v385_v37 = vor.u32 %v384_v28, %v381_v27  ;;  %v568_v40 = vshrl.u32 %v566_v34, 16  ;;  %v571_v43 = vshll.u32 %v566_v34, 16  ;;  %v3250_v27 = vld [vmem:[%s3888_s4 + $0x28] sm:$0xff] }
  0x49   : > { %1305 = vmatpush.bf16.msrb.mxu2 %v3212_v54  ;;  %v3162_v36 = vld [vmem:[#allocation4 + $0x38] sm:$0xf0]  ;;  %v504_v38 = vrot.slane %v502_v29, 4  ;;  %v507_v39 = vrot.slane %v505_v30, 5  ;;  %v1637_v48 = vshrl.u32 %v1635_v35, 16  ;;  %v1640_v51 = vshll.u32 %v1635_v35, 16 }
  0x4a   : > { %1291 = vmatpush.bf16.msrb.mxu1 %v3204_v59  ;;  %v2524_v41 = vor.u32 %v3162_v36, %v2523_v19  ;;  %1634 = vst [vmem:[#allocation4 + $0x3c] sm:$0xc] %v1632_v15  ;;  %v450_v42 = vor.u32 %v449_v33, %v446_v32  ;;  %v3157_v44 = vld [vmem:[#allocation4 + $0x14] sm:$0xf]  ;;  %v386_v45 = vrot.slane %v385_v37, 4  ;;  %v570_v47 = vrot.slane %v568_v40, 6 }
  0x4b   : > { %1319 = vmatpush.bf16.msrb.mxu3 %v3220_v0  ;;  %1278 = vmatmul.bf16.vlgmr.msrb.gmra.mxu0 %v2516_v31  ;;  %v508_v46 = vor.u32 %v507_v39, %v504_v38  ;;  %v573_v50 = vrot.slane %v571_v43, 7  ;;  %v389_v52 = vld [vmem:[#allocation2 + $0x8] sm:$0x6]  ;;  %v453_v60 = vld [vmem:[#allocation2 + $0xc] sm:$0x6]  ;;  %v1639_v1 = vrot.slane %v1637_v48, 6 }
  0x4c   : > { %1326 = vmatpush.bf16.msra.mxu0 %v3235_v56  ;;  %1306 = vmatmul.bf16.vlgmr.msrb.gmra.mxu2 %v2524_v41  ;;  %452 = vst [vmem:[#allocation4 + $0x1c] sm:$0xc] %v450_v42  ;;  %v2517_v53 = vld [vmem:[#allocation4 + $0x34] sm:$0xf0]  ;;  %v2493_v59 = vrot.slane %v389_v52, 9  ;;  %v455_v62 = vrot.slane %v453_v60, 7 }
  0x4d   : > { %388 = vst [vmem:[#allocation4 + $0x1c] sm:$0x3] %v386_v45  ;;  %v509_v54 = vrot.slane %v508_v46, 4  ;;  %v2520_v56 = vor.u32 %v3157_v44, %v2517_v53  ;;  %v574_v57 = vor.u32 %v573_v50, %v570_v47  ;;  %v512_v61 = vld [vmem:[#allocation2 + $0x10] sm:$0x6]  ;;  %v1642_v2 = vrot.slane %v1640_v51, 7 }
  0x4e   : > { %v2496_v63 = vrot.slane %v512_v61, 9  ;;  %v577_v0 = vld [vmem:[#allocation2 + $0x14] sm:$0x6]  ;;  %394 = vst [vmem:[#allocation4 + $0x20] sm:$0x3] %v2493_v59  ;;  %2283 = vmatpush.bf16.msra.mxu1 %v3252_v20  ;;  %v3268_v33 = vld [vmem:[%s3888_s4 + $0xb8] sm:$0xff] }
  0x4f   : > { %511 = vst [vmem:[#allocation4 + $0x40] sm:$0x3] %v509_v54  ;;  %1292 = vmatmul.bf16.vlgmr.msrb.gmra.mxu1 %v2520_v56  ;;  %v579_v3 = vrot.slane %v577_v0, 7  ;;  %v1643_v5 = vor.u32 %v1642_v2, %v1639_v1  ;;  %v3249_v30 = vld [vmem:[%s3888_s4 + $0x20] sm:$0xff]  ;;  %2311 = vmatpush.bf16.msra.mxu3 %v3268_v33  ;;  %v3276_v36 = vld [vmem:[%s3888_s4 + $0xf8] sm:$0xff]  ;;  %v3267_v42 = vld [vmem:[%s3888_s4 + $0xb0] sm:$0xff] }
  0x50   : > { %1327 = vmatpush.bf16.msra.mxu0 %v3234_v7  ;;  %576 = vst [vmem:[#allocation4 + $0x40] sm:$0xc] %v574_v57  ;;  %v1646_v7 = vld [vmem:[#allocation3 + $0x14] sm:$0x6]  ;;  %v3275_v44 = vld [vmem:[%s3888_s4 + $0xf0] sm:$0xff]  ;;  %v3274_v51 = vld [vmem:[%s3888_s4 + $0xe8] sm:$0xff] }
  0x51   : > { %457 = vst [vmem:[#allocation4 + $0x20] sm:$0xc] %v455_v62  ;;  %v1648_v11 = vrot.slane %v1646_v7, 7  ;;  %v3248_v38 = vld [vmem:[%s3888_s4 + $0x18] sm:$0xff]  ;;  %v3247_v45 = vld [vmem:[%s3888_s4 + $0x10] sm:$0xff]  ;;  %v3246_v54 = vld [vmem:[%s3888_s4 + $0x8] sm:$0xff] }
  0x52   : > { %517 = vst [vmem:[#allocation4 + $0x44] sm:$0x3] %v2496_v63  ;;  %v3260_v41 = vld [vmem:[%s3888_s4 + $0x78] sm:$0xff]  ;;  %v3259_v48 = vld [vmem:[%s3888_s4 + $0x70] sm:$0xff]  ;;  %v3326_v57 = vld [vmem:[%s3886_s2] ss:$0 sm:$0xff] }
  0x53   : > { %581 = vst [vmem:[#allocation4 + $0x44] sm:$0xc] %v579_v3  ;;  %2297 = vmatpush.bf16.msra.mxu2 %v3260_v41  ;;  %2312 = vmatpush.bf16.msra.mxu3 %v3267_v42  ;;  %v3265_v59 = vld [vmem:[%s3888_s4 + $0xa0] sm:$0xff]  ;;  %v3255_v20 = vld [vmem:[%s3888_s4 + $0x50] sm:$0xff]  ;;  %v1371_v33 = vld [vmem:[#allocation3 + $0x4] sm:$0x7] }
  0x54   : > { %1328 = vmatpush.bf16.msra.mxu0 %v3233_v22  ;;  %v3158_v6 = vld [vmem:[#allocation4 + $0x1c] sm:$0xf]  ;;  %v3251_v22 = vld [vmem:[%s3888_s4 + $0x30] sm:$0xff]  ;;  %v3327_v62 = vld [vmem:[%s3887_s3] ss:$0 sm:$0xff] }
  0x55   : > { %2284 = vmatpush.bf16.msra.mxu1 %v3251_v22  ;;  %v3273_v1 = vld [vmem:[%s3888_s4 + $0xe0] sm:$0xff]  ;;  %v3282_v22 = vld [vmem:[%s3888_s4 + $0x128] sm:$0xff]  ;;  %v3308_v41 = vld [vmem:[%s3888_s4 + $0x1f8] sm:$0xff] }
  0x56   : > { %v3245_v2 = vld [vmem:[%s3888_s4] sm:$0xff] }
  0x57   : > { %v2525_v8 = vld [vmem:[#allocation4 + $0x3c] sm:$0xf0]  ;;  %2298 = vmatpush.bf16.msra.mxu2 %v3259_v48 }
  0x58   : > { %1329 = vmatpush.bf16.msra.mxu0 %v3232_v49  ;;  %v2528_v10 = vor.u32 %v3158_v6, %v2525_v8  ;;  %1645 = vst [vmem:[#allocation4 + $0x40] sm:$0xc] %v1643_v5  ;;  %v2531_v13 = vld [vmem:[#allocation4 + $0x20] sm:$0xf]  ;;  %v3266_v49 = vld [vmem:[%s3888_s4 + $0xa8] sm:$0xff]  ;;  %v3284_v5 = vld [vmem:[%s3888_s4 + $0x138] sm:$0xff] }
  0x59   : > { %2285 = vmatpush.bf16.msra.mxu1 %v3250_v27  ;;  %2313 = vmatpush.bf16.msra.mxu3 %v3266_v49  ;;  %v3257_v3 = vld [vmem:[%s3888_s4 + $0x60] sm:$0xff]  ;;  %v3272_v8 = vld [vmem:[%s3888_s4 + $0xd8] sm:$0xff] }
  0x5a   : > { %1320 = vmatmul.bf16.vlgmr.msrb.gmra.mxu3 %v2528_v10  ;;  %v3163_v14 = vld [vmem:[#allocation4 + $0x40] sm:$0xf0]  ;;  %v3256_v10 = vld [vmem:[%s3888_s4 + $0x58] sm:$0xff] }
  0x5b   : > { %1650 = vst [vmem:[#allocation4 + $0x44] sm:$0xc] %v1648_v11  ;;  %v2532_v15 = vor.u32 %v3163_v14, %v2531_v13  ;;  %v3263_v11 = vld [vmem:[%s3888_s4 + $0x90] sm:$0xff]  ;;  %v3289_v55 = vld [vmem:[%s3888_s4 + $0x160] sm:$0xff] }
  0x5c   : > { %1330 = vmatpush.bf16.msra.mxu0 %v3231_v58  ;;  %v3258_v58 = vld [vmem:[%s3888_s4 + $0x68] sm:$0xff]  ;;  %v3283_v13 = vld [vmem:[%s3888_s4 + $0x130] sm:$0xff] }
  0x5d   : > { %2286 = vmatpush.bf16.msra.mxu1 %v3249_v30  ;;  %2299 = vmatpush.bf16.msra.mxu2 %v3258_v58  ;;  %v3279_v58 = vld [vmem:[%s3888_s4 + $0x110] sm:$0xff] }
  0x5e   : > { %2314 = vmatpush.bf16.msra.mxu3 %v3265_v59  ;;  %v3291_v59 = vld [vmem:[%s3888_s4 + $0x170] sm:$0xff] }
  0x60   : > { %1331 = vmatpush.bf16.msra.mxu0 %v3230_v4  ;;  %v3264_v4 = vld [vmem:[%s3888_s4 + $0x98] sm:$0xff] }
  0x61   : > { %2287 = vmatpush.bf16.msra.mxu1 %v3248_v38  ;;  %2300 = vmatpush.bf16.msra.mxu2 %v3257_v3 }
  0x62   : > { %2315 = vmatpush.bf16.msra.mxu3 %v3264_v4 }
  0x64   : > { %1332 = vmatpush.bf16.msra.mxu0 %v3229_v9 }
  0x65   : > { %2288 = vmatpush.bf16.msra.mxu1 %v3247_v45  ;;  %2301 = vmatpush.bf16.msra.mxu2 %v3256_v10  ;;  %v3253_v45 = vld [vmem:[%s3888_s4 + $0x40] sm:$0xff] }
  0x66   : > { %2316 = vmatpush.bf16.msra.mxu3 %v3263_v11 }
  0x68   : > { %1333 = vmatpush.bf16.msra.mxu0 %v3228_v12 }
  0x69   : > { %2289 = vmatpush.bf16.msra.mxu1 %v3246_v54  ;;  %2302 = vmatpush.bf16.msra.mxu2 %v3255_v20 }
  0x6b   : > { %1334 = vmatmul.bf16.vlgmr.msra.gmra.mxu0 %v2532_v15 }
  0x6c   : > { %2325 = vmatpush.bf16.msrb.mxu0 %v3276_v36 }
  0x6d   : > { %2290 = vmatpush.bf16.msra.mxu1 %v3245_v2 }
  0x70   : > { %2326 = vmatpush.bf16.msrb.mxu0 %v3275_v44 }
  0x71   : > { %2339 = vmatpush.bf16.msrb.mxu1 %v3284_v5  ;;  %v3290_v5 = vld [vmem:[%s3888_s4 + $0x168] sm:$0xff] }
  0x74   : > { %2327 = vmatpush.bf16.msrb.mxu0 %v3274_v51  ;;  %v3299_v51 = vld [vmem:[%s3888_s4 + $0x1b0] sm:$0xff] }
  0x75   : > { %2340 = vmatpush.bf16.msrb.mxu1 %v3283_v13 }
  0x78   : > { %2328 = vmatpush.bf16.msrb.mxu0 %v3273_v1  ;;  %v3278_v1 = vld [vmem:[%s3888_s4 + $0x108] sm:$0xff] }
  0x79   : > { %2341 = vmatpush.bf16.msrb.mxu1 %v3282_v22  ;;  %v3296_v22 = vld [vmem:[%s3888_s4 + $0x198] sm:$0xff] }
  0x7c   : > { %2329 = vmatpush.bf16.msrb.mxu0 %v3272_v8 }
  0xb2   : > { %v1223_v16 = vpop.f32.mrf.mxu0 }
  0xba   : > { %v1237_v17 = vpop.f32.mrf.mxu1  ;;  %v1225_v19 = vpop.f32.mrf.mxu0 }
  0xbb   : > { %v1251_v18 = vpop.f32.mrf.mxu2  ;;  %v1238_v21 = vadd.f32 %v1237_v17, %v1223_v16  ;;  %v3271_v16 = vld [vmem:[%s3888_s4 + $0xd0] sm:$0xff] }
  0xbc   : > { %2330 = vmatpush.bf16.msrb.mxu0 %v3271_v16  ;;  %v3277_v16 = vld [vmem:[%s3888_s4 + $0x100] sm:$0xff] }
  0xbd   : > { %v1252_v25 = vadd.f32 %v1251_v18, %v1238_v21  ;;  %v3262_v21 = vld [vmem:[%s3888_s4 + $0x88] sm:$0xff] }
  0xbe   : > { %2317 = vmatpush.bf16.msra.mxu3 %v3262_v21 }
  0xc2   : > { %v1239_v24 = vpop.f32.mrf.mxu1 }
  0xc3   : > { %v1253_v26 = vpop.f32.mrf.mxu2  ;;  %v1240_v31 = vadd.f32 %v1239_v24, %v1225_v19 }
  0xc4   : > { %v1265_v23 = vpop.f32.mrf.mxu3 }
  0xc5   : > { %v1266_v29 = vadd.f32 %v1265_v23, %v1252_v25  ;;  %v1254_v39 = vadd.f32 %v1253_v26, %v1240_v31  ;;  %v3270_v26 = vld [vmem:[%s3888_s4 + $0xc8] sm:$0xff] }
  0xc6   : > { %v3254_v31 = vld [vmem:[%s3888_s4 + $0x48] sm:$0xff]  ;;  %2331 = vmatpush.bf16.msrb.mxu0 %v3270_v26 }
  0xc7   : > { %2303 = vmatpush.bf16.msra.mxu2 %v3254_v31 }
  0xc8   : > { %v1279_v28 = vpop.f32.mrf.mxu0 }
  0xc9   : > { %v1280_v32 = vadd.f32 %v1279_v28, %v1266_v29 }
  0xcb   : > { %2304 = vmatpush.bf16.msra.mxu2 %v3253_v45  ;;  %v3287_v45 = vld [vmem:[%s3888_s4 + $0x150] sm:$0xff] }
  0xcc   : > { %v1267_v34 = vpop.f32.mrf.mxu3  ;;  %v1293_v35 = vpop.f32.mrf.mxu1 }
  0xcd   : > { %v1294_v40 = vadd.f32 %v1293_v35, %v1280_v32  ;;  %v1268_v46 = vadd.f32 %v1267_v34, %v1254_v39  ;;  %v3261_v32 = vld [vmem:[%s3888_s4 + $0x80] sm:$0xff]  ;;  %v3300_v35 = vld [vmem:[%s3888_s4 + $0x1b8] sm:$0xff] }
  0xce   : > { %v3281_v34 = vld [vmem:[%s3888_s4 + $0x120] sm:$0xff]  ;;  %2318 = vmatpush.bf16.msra.mxu3 %v3261_v32  ;;  %v3295_v32 = vld [vmem:[%s3888_s4 + $0x190] sm:$0xff] }
  0xcf   : > { %v1307_v37 = vpop.f32.mrf.mxu2  ;;  %v3269_v39 = vld [vmem:[%s3888_s4 + $0xc0] sm:$0xff]  ;;  %2342 = vmatpush.bf16.msrb.mxu1 %v3281_v34 }
  0xd0   : > { %v1281_v43 = vpop.f32.mrf.mxu0  ;;  %v1308_v47 = vadd.f32 %v1307_v37, %v1294_v40  ;;  %v1380_v40 = vld [vmem:[#allocation3 + $0x8] sm:$0x7]  ;;  %2332 = vmatpush.bf16.msrb.mxu0 %v3269_v39 }
  0xd1   : > { %v1282_v50 = vadd.f32 %v1281_v43, %v1268_v46  ;;  %v3280_v46 = vld [vmem:[%s3888_s4 + $0x118] sm:$0xff] }
  0xd2   : > { %2367 = vmatpush.bf16.msrb.mxu3 %v3300_v35 }
  0xd3   : > { %2343 = vmatpush.bf16.msrb.mxu1 %v3280_v46 }
  0xd4   : > { %v1295_v53 = vpop.f32.mrf.mxu1  ;;  %2381 = vmatpush.bf16.msra.mxu0 %v3308_v41 }
  0xd5   : > { %v1296_v63 = vadd.f32 %v1295_v53, %v1282_v50 }
  0xd6   : > { %2368 = vmatpush.bf16.msrb.mxu3 %v3299_v51 }
  0xd7   : > { %v1309_v60 = vpop.f32.mrf.mxu2  ;;  %2344 = vmatpush.bf16.msrb.mxu1 %v3279_v58 }
  0xd8   : > { %v1310_v6 = vadd.f32 %v1309_v60, %v1296_v63  ;;  %v1401_v63 = vld [vmem:[#allocation3 + $0x10] sm:$0x7] }
  0xdb   : > { %2345 = vmatpush.bf16.msrb.mxu1 %v3278_v1  ;;  %v3286_v1 = vld [vmem:[%s3888_s4 + $0x148] sm:$0xff] }
  0xdd   : > { %v1321_v52 = vpop.f32.mrf.mxu3 }
  0xde   : > { %v1322_v56 = vadd.f32 %v1321_v52, %v1308_v47  ;;  %v3292_v47 = vld [vmem:[%s3888_s4 + $0x178] sm:$0xff]  ;;  %v3307_v52 = vld [vmem:[%s3888_s4 + $0x1f0] sm:$0xff] }
  0xdf   : > { %2353 = vmatpush.bf16.msrb.mxu2 %v3292_v47  ;;  %2382 = vmatpush.bf16.msra.mxu0 %v3307_v52 }
  0xe0   : > { %2346 = vmatpush.bf16.msrb.mxu1 %v3277_v16 }
  0xe3   : > { %2354 = vmatpush.bf16.msrb.mxu2 %v3291_v59 }
  0xe5   : > { %v1323_v12 = vpop.f32.mrf.mxu3 }
  0xe6   : > { %v1324_v14 = vadd.f32 %v1323_v12, %v1310_v6  ;;  %v3297_v6 = vld [vmem:[%s3888_s4 + $0x1a0] sm:$0xff] }
  0xe7   : > { %2355 = vmatpush.bf16.msrb.mxu2 %v3290_v5 }
  0xe8   : > { %v1335_v61 = vpop.f32.mrf.mxu0 }
  0xe9   : > { %v1336_v0 = vadd.f32 %v1335_v61, %v1322_v56 }
  0xeb   : > { %v1344_v7 = vmul.f32 %v3326_v57, %v1336_v0  ;;  %v3306_v0 = vld [vmem:[%s3888_s4 + $0x1e8] sm:$0xff]  ;;  %2356 = vmatpush.bf16.msrb.mxu2 %v3289_v55 }
  0xec   : > { %2383 = vmatpush.bf16.msra.mxu0 %v3306_v0 }
  0xed   : > { %v1350_v9 = vadd.f32 %v3327_v62, %v1344_v7 }
  0xef   : > { %v1352_v15 = vmax.f32 %v1350_v9, 0.0 }
  0xf0   : > { %v1337_v17 = vpop.f32.mrf.mxu0 }
  0xf1   : > { %v1360_v18 = vpack.c.bf16 %v1352_v15, %v1352_v15  ;;  %v1338_v19 = vadd.f32 %v1337_v17, %v1324_v14  ;;  %v3305_v14 = vld [vmem:[%s3888_s4 + $0x1e0] sm:$0xff] }
  0xf2   : > { %2384 = vmatpush.bf16.msra.mxu0 %v3305_v14 }
  0xf3   : > { %v1363_v23 = vshrl.u32 %v1360_v18, 16  ;;  %v1366_v24 = vshll.u32 %v1360_v18, 16  ;;  %v1345_v25 = vmul.f32 %v3326_v57, %v1338_v19  ;;  %v1392_v57 = vld [vmem:[#allocation3 + $0xc] sm:$0x7] }
  0xf5   : > { %v1365_v27 = vrot.slane %v1363_v23, 7  ;;  %v1374_v28 = vrot.slane %v1363_v23, 5  ;;  %v1375_v29 = vrot.slane %v1366_v24, 6  ;;  %v1351_v30 = vadd.f32 %v3327_v62, %v1345_v25  ;;  %v3298_v62 = vld [vmem:[%s3888_s4 + $0x1a8] sm:$0xff]  ;;  %v3304_v25 = vld [vmem:[%s3888_s4 + $0x1d8] sm:$0xff] }
  0xf6   : > { %2369 = vmatpush.bf16.msrb.mxu3 %v3298_v62  ;;  %2385 = vmatpush.bf16.msra.mxu0 %v3304_v25 }
  0xf7   : > { %v1368_v36 = vor.u32 %v1366_v24, %v1365_v27  ;;  %v1376_v37 = vor.u32 %v1375_v29, %v1374_v28  ;;  %v1353_v38 = vmax.f32 %v1351_v30, 0.0  ;;  %v3288_v28 = vld [vmem:[%s3888_s4 + $0x158] sm:$0xff] }
  0xf8   : > { %2357 = vmatpush.bf16.msrb.mxu2 %v3288_v28 }
  0xf9   : > { %v1372_v42 = vsel %vm3487_vm2, %v1368_v36, %v1371_v33  ;;  %v1377_v43 = vrot.slane %v1376_v37, 4  ;;  %v1361_v44 = vpack.c.bf16 %v1353_v38, %v1353_v38  ;;  %v3303_v37 = vld [vmem:[%s3888_s4 + $0x1d0] sm:$0xff] }
  0xfa   : > { %1373 = vst [vmem:[#allocation3 + $0x4] sm:$0x7] %v1372_v42  ;;  %2370 = vmatpush.bf16.msrb.mxu3 %v3297_v6  ;;  %2386 = vmatpush.bf16.msra.mxu0 %v3303_v37  ;;  %v3316_v6 = vld [vmem:[%s3888_s4 + $0x238] sm:$0xff] }
  0xfb   : > { %v1381_v48 = vsel %vm3487_vm2, %v1377_v43, %v1380_v40  ;;  %v1384_v49 = vshrl.u32 %v1361_v44, 16  ;;  %v1387_v50 = vshll.u32 %v1361_v44, 16 }
  0xfc   : > { %1382 = vst [vmem:[#allocation3 + $0x8] sm:$0x7] %v1381_v48  ;;  %2358 = vmatpush.bf16.msrb.mxu2 %v3287_v45 }
  0xfd   : > { %v1386_v53 = vrot.slane %v1384_v49, 7  ;;  %v1395_v54 = vrot.slane %v1384_v49, 5  ;;  %v1396_v56 = vrot.slane %v1387_v50, 6 }
  0xfe   : > { %2371 = vmatpush.bf16.msrb.mxu3 %v3296_v22 }
  0xff   : > { %v1389_v60 = vor.u32 %v1387_v50, %v1386_v53  ;;  %v1397_v61 = vor.u32 %v1396_v56, %v1395_v54  ;;  %v3294_v50 = vld [vmem:[%s3888_s4 + $0x188] sm:$0xff] }
 0x100   : > { %2359 = vmatpush.bf16.msrb.mxu2 %v3286_v1 }
 0x101   : > { %v1469_v2 = vld [vmem:[#allocation3 + $0x4] sm:$0x7]  ;;  %v1393_v3 = vsel %vm3487_vm2, %v1389_v60, %v1392_v57  ;;  %v1398_v4 = vrot.slane %v1397_v61, 4 }
 0x102   : > { %1394 = vst [vmem:[#allocation3 + $0xc] sm:$0x7] %v1393_v3  ;;  %v1464_v7 = vld [vmem:[#allocation3 + $0x4] sm:$0x3]  ;;  %v1471_v17 = vshrl.u32 %v1469_v2, 16  ;;  %v1474_v19 = vshll.u32 %v1469_v2, 16  ;;  %2372 = vmatpush.bf16.msrb.mxu3 %v3295_v32 }
 0x103   : > { %v1480_v8 = vld [vmem:[#allocation3 + $0x4] sm:$0x6]  ;;  %v1402_v9 = vsel %vm3487_vm2, %v1398_v4, %v1401_v63  ;;  %v1466_v10 = vrot.slane %v1464_v7, 6  ;;  %v1527_v11 = vld [vmem:[#allocation3 + $0x8] sm:$0x3] }
 0x104   : > { %v1482_v12 = vrot.slane %v1480_v8, 7  ;;  %v1541_v13 = vld [vmem:[#allocation3 + $0x8] sm:$0x6]  ;;  %1403 = vst [vmem:[#allocation3 + $0x10] sm:$0x7] %v1402_v9  ;;  %v1473_v26 = vrot.slane %v1471_v17, 6 }
 0x105   : > { %v2824_v15 = vrot.slane %v1541_v13, 9  ;;  %1468 = vst [vmem:[#allocation4] sm:$0xc] %v1466_v10  ;;  %v1485_v18 = vld [vmem:[#allocation3 + $0x8] sm:$0x3]  ;;  %v1476_v27 = vrot.slane %v1474_v19, 7 }
 0x106   : > { %v1426_v20 = vld [vmem:[#allocation3 + $0x4] sm:$0x7]  ;;  %1528 = vst [vmem:[#allocation4 + $0x24] sm:$0x3] %v1527_v11  ;;  %v1529_v21 = vld [vmem:[#allocation3 + $0x8] sm:$0x7]  ;;  %2373 = vmatpush.bf16.msrb.mxu3 %v3294_v50 }
 0x107   : > { %1484 = vst [vmem:[#allocation4 + $0x8] sm:$0xc] %v1482_v12  ;;  %v1424_v23 = vld [vmem:[#allocation3 + $0x4] sm:$0x3]  ;;  %v1487_v24 = vrot.slane %v1485_v18, 6  ;;  %v1531_v30 = vshrl.u32 %v1529_v21, 16  ;;  %v1477_v44 = vor.u32 %v1476_v27, %v1473_v26 }
 0x108   : > { %1546 = vst [vmem:[#allocation4 + $0x2c] sm:$0x3] %v2824_v15  ;;  %v1534_v31 = vshll.u32 %v1529_v21, 16  ;;  %v1428_v33 = vshrl.u32 %v1426_v20, 16  ;;  %v1431_v34 = vshll.u32 %v1426_v20, 16  ;;  %v3302_v57 = vld [vmem:[%s3888_s4 + $0x1c8] sm:$0xff] }
 0x109   : > { %v1592_v29 = vld [vmem:[#allocation3 + $0xc] sm:$0x7]  ;;  %1425 = vst [vmem:[#allocation4 + $0xc] sm:$0x3] %v1424_v23  ;;  %v1490_v38 = vld [vmem:[#allocation3 + $0x8] sm:$0x7]  ;;  %2387 = vmatpush.bf16.msra.mxu0 %v3302_v57 }
 0x10a   : > { %v1587_v35 = vld [vmem:[#allocation3 + $0xc] sm:$0x3]  ;;  %1489 = vst [vmem:[#allocation4 + $0xc] sm:$0xc] %v1487_v24  ;;  %v1533_v47 = vrot.slane %v1531_v30, 4  ;;  %v1536_v48 = vrot.slane %v1534_v31, 5 }
 0x10b   : > { %v1603_v36 = vld [vmem:[#allocation3 + $0xc] sm:$0x6]  ;;  %v1589_v39 = vrot.slane %v1587_v35, 6  ;;  %v1608_v43 = vld [vmem:[#allocation3 + $0x10] sm:$0x3]  ;;  %v1594_v49 = vshrl.u32 %v1592_v29, 16 }
 0x10c   : > { %v1605_v40 = vrot.slane %v1603_v36, 7  ;;  %v1547_v41 = vld [vmem:[#allocation3 + $0xc] sm:$0x3]  ;;  %v1610_v46 = vrot.slane %v1608_v43, 6  ;;  %v1597_v52 = vshll.u32 %v1592_v29, 16  ;;  %v1430_v53 = vrot.slane %v1428_v33, 4 }
 0x10d   : > { %v1549_v42 = vld [vmem:[#allocation3 + $0xc] sm:$0x7]  ;;  %1548 = vst [vmem:[#allocation4 + $0x30] sm:$0x3] %v1547_v41  ;;  %v1537_v54 = vor.u32 %v1536_v48, %v1533_v47  ;;  %v1596_v56 = vrot.slane %v1594_v49, 6  ;;  %v1433_v58 = vrot.slane %v1431_v34, 5 }
 0x10e   : > { %1591 = vst [vmem:[#allocation4 + $0x24] sm:$0xc] %v1589_v39  ;;  %v3825_v51 = vld [vmem:[#allocation3 + $0xc] sm:$0x7]  ;;  %v1492_v59 = vshrl.u32 %v1490_v38, 16  ;;  %v1599_v60 = vrot.slane %v1597_v52, 7 }
 0x10f   : > { %1607 = vst [vmem:[#allocation4 + $0x2c] sm:$0xc] %v1605_v40  ;;  %v1495_v61 = vshll.u32 %v1490_v38, 16  ;;  %v1551_v62 = vshrl.u32 %v1549_v42, 16  ;;  %v1554_v63 = vshll.u32 %v1549_v42, 16  ;;  %v1538_v0 = vrot.slane %v1537_v54, 4 }
 0x110   : > { %1612 = vst [vmem:[#allocation4 + $0x30] sm:$0xc] %v1610_v46  ;;  %v1434_v2 = vor.u32 %v1433_v58, %v1430_v53  ;;  %v1494_v3 = vrot.slane %v1492_v59, 6  ;;  %v1613_v4 = vld [vmem:[#allocation3 + $0x10] sm:$0x7]  ;;  %v1600_v7 = vor.u32 %v1599_v60, %v1596_v56  ;;  %v3293_v8 = vld [vmem:[%s3888_s4 + $0x180] sm:$0xff] }
 0x111   : > { %1479 = vst [vmem:[#allocation4 + $0x4] sm:$0xc] %v1477_v44  ;;  %v2829_v5 = vld [vmem:[#allocation4] sm:$0xf]  ;;  %v1497_v9 = vrot.slane %v1495_v61, 7  ;;  %v1553_v10 = vrot.slane %v1551_v62, 4  ;;  %2374 = vmatpush.bf16.msrb.mxu3 %v3293_v8 }
 0x112   : > { %v1556_v11 = vrot.slane %v1554_v63, 5  ;;  %v1444_v12 = vld [vmem:[#allocation3 + $0x8] sm:$0x3]  ;;  %v2837_v13 = vld [vmem:[#allocation4 + $0x8] sm:$0xf]  ;;  %v1435_v14 = vrot.slane %v1434_v2, 4 }
 0x113   : > { %1540 = vst [vmem:[#allocation4 + $0x28] sm:$0x3] %v1538_v0  ;;  %v1615_v15 = vshrl.u32 %v1613_v4, 16  ;;  %v1618_v16 = vshll.u32 %v1613_v4, 16  ;;  %v1513_v17 = vshrl.u32 %v3825_v51, 16  ;;  %v3301_v19 = vld [vmem:[%s3888_s4 + $0x1c0] sm:$0xff]  ;;  %v1498_v20 = vor.u32 %v1497_v9, %v1494_v3 }
 0x114   : > { %v3237_v18 = vld [vmem:[#allocation4 + $0xc] sm:$0xf]  ;;  %1602 = vst [vmem:[#allocation4 + $0x28] sm:$0xc] %v1600_v7  ;;  %v1557_v21 = vor.u32 %v1556_v11, %v1553_v10  ;;  %v1506_v22 = vld [vmem:[#allocation3 + $0xc] sm:$0x3]  ;;  %2388 = vmatpush.bf16.msra.mxu0 %v3301_v19 }
 0x115   : > { %v3240_v55 = vld [vmem:[#allocation4 + $0x20] sm:$0xf0]  ;;  %1437 = vst [vmem:[#allocation4 + $0x10] sm:$0x3] %v1435_v14  ;;  %v1617_v26 = vrot.slane %v1615_v15, 6  ;;  %v1620_v27 = vrot.slane %v1618_v16, 7 }
 0x116   : > { %v3285_v23 = vld [vmem:[%s3888_s4 + $0x140] sm:$0xff]  ;;  %v2830_v24 = vor.u32 %v3240_v55, %v2829_v5  ;;  %v3241_v25 = vld [vmem:[#allocation4 + $0x28] sm:$0xf0]  ;;  %1500 = vst [vmem:[#allocation4 + $0x10] sm:$0xc] %v1498_v20  ;;  %v1558_v30 = vrot.slane %v1557_v21, 4 }
 0x117   : > { %v2838_v28 = vor.u32 %v3241_v25, %v2837_v13  ;;  %v2839_v29 = vld [vmem:[#allocation4 + $0x2c] sm:$0xf0]  ;;  %v1508_v31 = vrot.slane %v1506_v22, 6  ;;  %v1621_v34 = vor.u32 %v1620_v27, %v1617_v26  ;;  %1445 = vst [vmem:[#allocation4 + $0x18] sm:$0x3] %v1444_v12  ;;  %v1515_v37 = vrot.slane %v1513_v17, 6  ;;  %2360 = vmatpush.bf16.msrb.mxu2 %v3285_v23 }
 0x118   : > { %2291 = vmatmul.bf16.vlgmr.msra.gmra.mxu1 %v2830_v24  ;;  %v2842_v32 = vor.u32 %v3237_v18, %v2839_v29  ;;  %v3315_v33 = vld [vmem:[%s3888_s4 + $0x230] sm:$0xff]  ;;  %v1567_v35 = vld [vmem:[#allocation3 + $0x10] sm:$0x3]  ;;  %1560 = vst [vmem:[#allocation4 + $0x34] sm:$0x3] %v1558_v30  ;;  %v1516_v38 = vshll.u32 %v3825_v51, 16 }
 0x119   : > { %2319 = vmatmul.bf16.vlgmr.msra.gmra.mxu3 %v2838_v28  ;;  %2395 = vmatpush.bf16.msra.mxu1 %v3316_v6  ;;  %v1446_v36 = vld [vmem:[#allocation3 + $0x8] sm:$0x7]  ;;  %v3236_v39 = vld [vmem:[#allocation4 + $0x4] sm:$0xf]  ;;  %1623 = vst [vmem:[#allocation4 + $0x34] sm:$0xc] %v1621_v34 }
 0x11a   : > { %2333 = vmatmul.bf16.vlgmr.msrb.gmra.mxu0 %v2842_v32  ;;  %v1448_v40 = vshrl.u32 %v1446_v36, 16  ;;  %v1451_v41 = vshll.u32 %v1446_v36, 16  ;;  %v1569_v42 = vld [vmem:[#allocation3 + $0x10] sm:$0x7]  ;;  %v3314_v43 = vld [vmem:[%s3888_s4 + $0x228] sm:$0xff]  ;;  %v1518_v44 = vrot.slane %v1516_v38, 7 }
 0x11b   : > { %1510 = vst [vmem:[#allocation4 + $0x18] sm:$0xc] %v1508_v31  ;;  %v1571_v45 = vshrl.u32 %v1569_v42, 16  ;;  %v1574_v46 = vshll.u32 %v1569_v42, 16  ;;  %v2831_v47 = vld [vmem:[#allocation4 + $0x24] sm:$0xf0] }
 0x11c   : > { %1568 = vst [vmem:[#allocation4 + $0x3c] sm:$0x3] %v1567_v35  ;;  %v1450_v48 = vrot.slane %v1448_v40, 4  ;;  %v1453_v49 = vrot.slane %v1451_v41, 5  ;;  %v2834_v50 = vor.u32 %v3236_v39, %v2831_v47  ;;  %v1519_v51 = vor.u32 %v1518_v44, %v1515_v37  ;;  %v1438_v54 = vld [vmem:[#allocation3 + $0x4] sm:$0x6] }
 0x11d   : > { %2396 = vmatpush.bf16.msra.mxu1 %v3315_v33  ;;  %v1573_v52 = vrot.slane %v1571_v45, 4  ;;  %v1576_v53 = vrot.slane %v1574_v46, 5  ;;  %v1501_v56 = vld [vmem:[#allocation3 + $0x8] sm:$0x6]  ;;  %v2822_v58 = vrot.slane %v1438_v54, 9  ;;  %v3313_v63 = vld [vmem:[%s3888_s4 + $0x220] sm:$0xff] }
 0x11e   : > { %v1454_v57 = vor.u32 %v1453_v49, %v1450_v48  ;;  %v1503_v59 = vrot.slane %v1501_v56, 7  ;;  %v1561_v60 = vld [vmem:[#allocation3 + $0xc] sm:$0x6]  ;;  %2305 = vmatmul.bf16.vlgmr.msra.gmra.mxu2 %v2834_v50  ;;  %1521 = vst [vmem:[#allocation4 + $0x1c] sm:$0xc] %v1519_v51  ;;  %v3312_v8 = vld [vmem:[%s3888_s4 + $0x218] sm:$0xff] }
 0x11f   : > { %v1577_v61 = vor.u32 %v1576_v53, %v1573_v52  ;;  %v1624_v62 = vld [vmem:[#allocation3 + $0x10] sm:$0x6]  ;;  %1443 = vst [vmem:[#allocation4 + $0x14] sm:$0x3] %v2822_v58  ;;  %v2825_v1 = vrot.slane %v1561_v60, 9  ;;  %v3311_v17 = vld [vmem:[%s3888_s4 + $0x210] sm:$0xff] }
 0x120   : > { %v1455_v0 = vrot.slane %v1454_v57, 4  ;;  %v3242_v2 = vld [vmem:[#allocation4 + $0x30] sm:$0xf0]  ;;  %1505 = vst [vmem:[#allocation4 + $0x14] sm:$0xc] %v1503_v59  ;;  %v1626_v4 = vrot.slane %v1624_v62, 7 }
 0x121   : > { %2397 = vmatpush.bf16.msra.mxu1 %v3314_v43  ;;  %v1578_v3 = vrot.slane %v1577_v61, 4  ;;  %v1458_v6 = vld [vmem:[#allocation3 + $0x8] sm:$0x6]  ;;  %1566 = vst [vmem:[#allocation4 + $0x38] sm:$0x3] %v2825_v1  ;;  %v3310_v23 = vld [vmem:[%s3888_s4 + $0x208] sm:$0xff] }
 0x122   : > { %v2853_v5 = vld [vmem:[#allocation4 + $0x18] sm:$0xf]  ;;  %1457 = vst [vmem:[#allocation4 + $0x1c] sm:$0x3] %v1455_v0  ;;  %v2823_v9 = vrot.slane %v1458_v6, 9  ;;  %v3309_v24 = vld [vmem:[%s3888_s4 + $0x200] sm:$0xff] }
 0x123   : > { %v3243_v7 = vld [vmem:[#allocation4 + $0x38] sm:$0xf0]  ;;  %1580 = vst [vmem:[#allocation4 + $0x40] sm:$0x3] %v1578_v3  ;;  %v1522_v10 = vld [vmem:[#allocation3 + $0xc] sm:$0x6] }
 0x124   : > { %v1581_v11 = vld [vmem:[#allocation3 + $0x10] sm:$0x6]  ;;  %v2845_v12 = vld [vmem:[#allocation4 + $0x10] sm:$0xf]  ;;  %1628 = vst [vmem:[#allocation4 + $0x38] sm:$0xc] %v1626_v4  ;;  %v2854_v16 = vor.u32 %v3243_v7, %v2853_v5 }
 0x125   : > { %2398 = vmatpush.bf16.msra.mxu1 %v3313_v63  ;;  %v1524_v13 = vrot.slane %v1522_v10, 7  ;;  %v2826_v14 = vrot.slane %v1581_v11, 9  ;;  %v2846_v15 = vor.u32 %v3242_v2, %v2845_v12  ;;  %1463 = vst [vmem:[#allocation4 + $0x20] sm:$0x3] %v2823_v9  ;;  %v3328_v52 = vld [vmem:[%s3889_s5] ss:$0 sm:$0xff] }
 0x126   : > { %v3329_v56 = vld [vmem:[%s3890_s6] ss:$0 sm:$0xff] }
 0x127   : > { %1526 = vst [vmem:[#allocation4 + $0x20] sm:$0xc] %v1524_v13  ;;  %v3238_v20 = vld [vmem:[#allocation4 + $0x14] sm:$0xf]  ;;  %v3330_v1 = vld [vmem:[%s3445_s17] sm:$0xff] }
 0x128   : > { %2347 = vmatmul.bf16.vlgmr.msrb.gmra.mxu1 %v2846_v15  ;;  %1586 = vst [vmem:[#allocation4 + $0x44] sm:$0x3] %v2826_v14 }
 0x129   : > { %2375 = vmatmul.bf16.vlgmr.msrb.gmra.mxu3 %v2854_v16  ;;  %2399 = vmatpush.bf16.msra.mxu1 %v3312_v8  ;;  %v3239_v55 = vld [vmem:[#allocation4 + $0x1c] sm:$0xf]  ;;  %v3331_v8 = vld [vmem:[%s3445_s17 + $0x8] sm:$0xff] }
 0x12a   : > { %v2855_v18 = vld [vmem:[#allocation4 + $0x3c] sm:$0xf0] }
 0x12b   : > { %v2858_v19 = vor.u32 %v3239_v55, %v2855_v18  ;;  %v2847_v21 = vld [vmem:[#allocation4 + $0x34] sm:$0xf0] }
 0x12c   : > { %v2850_v22 = vor.u32 %v3238_v20, %v2847_v21 }
 0x12d   : > { %2389 = vmatmul.bf16.vlgmr.msra.gmra.mxu0 %v2858_v19  ;;  %2400 = vmatpush.bf16.msra.mxu1 %v3311_v17 }
 0x12e   : > { %2361 = vmatmul.bf16.vlgmr.msrb.gmra.mxu2 %v2850_v22  ;;  %v2861_v26 = vld [vmem:[#allocation4 + $0x20] sm:$0xf] }
 0x12f   : > { %v3244_v25 = vld [vmem:[#allocation4 + $0x40] sm:$0xf0] }
 0x130   : > { %v2862_v27 = vor.u32 %v3244_v25, %v2861_v26 }
 0x131   : > { %2401 = vmatpush.bf16.msra.mxu1 %v3310_v23 }
 0x135   : > { %2402 = vmatpush.bf16.msra.mxu1 %v3309_v24 }
 0x138   : > { %2403 = vmatmul.bf16.vlgmr.msra.gmra.mxu1 %v2862_v27 }
 0x195   : > { %v2292_v28 = vpop.f32.mrf.mxu1 }
 0x197   : > { %v2334_v31 = vpop.f32.mrf.mxu0 }
 0x19c   : > { %v2320_v30 = vpop.f32.mrf.mxu3 }
 0x19d   : > { %v2294_v29 = vpop.f32.mrf.mxu1 }
 0x19f   : > { %v2336_v37 = vpop.f32.mrf.mxu0 }
 0x1a1   : > { %v2306_v32 = vpop.f32.mrf.mxu2 }
 0x1a2   : > { %v2307_v33 = vadd.f32 %v2306_v32, %v2292_v28 }
 0x1a4   : > { %v2322_v35 = vpop.f32.mrf.mxu3  ;;  %v2321_v36 = vadd.f32 %v2320_v30, %v2307_v33 }
 0x1a5   : > { %v2348_v34 = vpop.f32.mrf.mxu1 }
 0x1a6   : > { %v2335_v39 = vadd.f32 %v2334_v31, %v2321_v36 }
 0x1a8   : > { %v2349_v42 = vadd.f32 %v2348_v34, %v2335_v39 }
 0x1a9   : > { %v2308_v38 = vpop.f32.mrf.mxu2 }
 0x1aa   : > { %v2309_v40 = vadd.f32 %v2308_v38, %v2294_v29  ;;  %v2390_v47 = vpop.f32.mrf.mxu0 }
 0x1ac   : > { %v2323_v43 = vadd.f32 %v2322_v35, %v2309_v40  ;;  %v2376_v44 = vpop.f32.mrf.mxu3 }
 0x1ad   : > { %v2350_v41 = vpop.f32.mrf.mxu1 }
 0x1ae   : > { %v2337_v48 = vadd.f32 %v2336_v37, %v2323_v43 }
 0x1b0   : > { %v2351_v53 = vadd.f32 %v2350_v41, %v2337_v48 }
 0x1b1   : > { %v2362_v45 = vpop.f32.mrf.mxu2 }
 0x1b2   : > { %v2363_v46 = vadd.f32 %v2362_v45, %v2349_v42  ;;  %v2392_v63 = vpop.f32.mrf.mxu0 }
 0x1b4   : > { %v2377_v49 = vadd.f32 %v2376_v44, %v2363_v46  ;;  %v2378_v60 = vpop.f32.mrf.mxu3 }
 0x1b5   : > { %v2404_v50 = vpop.f32.mrf.mxu1 }
 0x1b6   : > { %v2391_v51 = vadd.f32 %v2390_v47, %v2377_v49 }
 0x1b8   : > { %v2405_v54 = vadd.f32 %v2404_v50, %v2391_v51 }
 0x1b9   : > { %v2364_v57 = vpop.f32.mrf.mxu2 }
 0x1ba   : > { %v2413_v58 = vmul.f32 %v3328_v52, %v2405_v54  ;;  %v2365_v59 = vadd.f32 %v2364_v57, %v2351_v53 }
 0x1bc   : > { %v2419_v61 = vadd.f32 %v3329_v56, %v2413_v58  ;;  %v2379_v62 = vadd.f32 %v2378_v60, %v2365_v59 }
 0x1bd   : > { %v2406_v0 = vpop.f32.mrf.mxu1 }
 0x1be   : > { %v2421_v2 = vadd.f32 %v3330_v1, %v2419_v61  ;;  %v2393_v3 = vadd.f32 %v2392_v63, %v2379_v62 }
 0x1c0   : > { %v2423_v4 = vmax.f32 %v2421_v2, 0.0  ;;  %v2407_v5 = vadd.f32 %v2406_v0, %v2393_v3 }
 0x1c2   : > { %2425 = vst [vmem:[%s278_s18] sm:$0xff] %v2423_v4  ;;  %v2414_v6 = vmul.f32 %v3328_v52, %v2407_v5 }
 0x1c4   : > { %v2420_v7 = vadd.f32 %v3329_v56, %v2414_v6 }
 0x1c6   : > { %v2422_v9 = vadd.f32 %v3331_v8, %v2420_v7 }
 0x1c8   : > { %v2424_v10 = vmax.f32 %v2422_v9, 0.0 }
 0x1ca   : > { %2426 = vst [vmem:[%s278_s18 + $0x8] sm:$0xff] %v2424_v10 }
 0x1cb PF: > { %s17_s24 = sadd.s32 1, %s3338_s24  }
 0x1cc   : > { %p14_p4 = scmp.ge.s32.totalorder %s17_s24, 4  }
 0x1ce   :  { %16 = sbr.rel (!%p14_p4) target bundleno = 1 (0x1), region = 88 }

// kernel: _lambda_.5
= control target key start
LH: loop header
LB: loop body
LE: loop exit
PB: predicated region body
PF: predicated region fallthrough
CT: control target
= control target key end

     0   :  { %s4253_s0 = inlined_call_operand.vmem [shape: f32[2,16,128], index: 0, kind: input, shape index: {}]   ;;  %s4254_s1 = inlined_call_operand.vmem [shape: bf16[1152,128], index: 1, kind: input, shape index: {}]   ;;  %s4255_s2 = inlined_call_operand.vmem [shape: f32[1,128], index: 2, kind: input, shape index: {}, may-alias: {2,5,8}]   ;;  %s4256_s3 = inlined_call_operand.vmem [shape: f32[1,128], index: 3, kind: input, shape index: {}, may-alias: {3,6,9}]   ;;  %s4257_s4 = inlined_call_operand.vmem [shape: bf16[1152,128], index: 4, kind: input, shape index: {}]   ;;  %s4258_s5 = inlined_call_operand.vmem [shape: f32[1,128], index: 5, kind: input, shape index: {}, may-alias: {2,5,8}]   ;;  %s4259_s6 = inlined_call_operand.vmem [shape: f32[1,128], index: 6, kind: input, shape index: {}, may-alias: {3,6,9}]   ;;  %s4260_s7 = inlined_call_operand.vmem [shape: bf16[128,128], index: 7, kind: input, shape index: {}]   ;;  %s4261_s8 = inlined_call_operand.vmem [shape: f32[1,128], index: 8, kind: input, shape index: {}, may-alias: {2,5,8}]   ;;  %s4262_s9 = inlined_call_operand.vmem [shape: f32[1,128], index: 9, kind: input, shape index: {}, may-alias: {3,6,9}]   ;;  %s4263_s10 = inlined_call_operand.hbm [shape: f32[2,4,128], index: 10, kind: output, shape index: {}]  }
   0x1   :  { %4264 = sst [smem:[#allocation8_spill]] %s4253_s0 }
   0x2   :  { %4265 = sst [smem:[#allocation9_spill]] %s4254_s1 }
   0x3   :  { %15 = vsyncpa [#allocation6], 0 }
   0x4   :  { %17 = vsyncpa [#allocation6 + $0x1], 0  ;;  %s3545_s13 = smov 0   ;;  %s3547_s14 = smov 0  }
   0x5   :  { %s3549_s15 = smov 0   ;;  %s3551_s16 = smov 0  }
   0x6 LB: > { %s3566_s17 = sadd.s32 4294967295, %s3487_s16   ;;  %s2590_s18 = sadd.s32 4294967294, %s3487_s16   ;;  %s3487_s16 = sphi %s3551_s16, %s4285_s16   ;;  %s3483_s15 = sphi %s3549_s15, %s4284_s15   ;;  %s3479_s14 = sphi %s3547_s14, %s4283_s14   ;;  %s3475_s13 = sphi %s3545_s13, %s4282_s13  }
   0x7   : > { %s3570_s19 = sadd.s32 1, %s3487_s16   ;;  %s245_s20 = sadd.s32 1, %s3483_s15 }
   0x8   : > { %s242_s21 = ssub.s32 %s3487_s16, %s3570_s19  ;;  %p255_p0 = scmp.ne.s32.totalorder %s3483_s15, %s3479_s14 }
   0x9   : > { %p243_p1 = scmp.eq.s32.totalorder %s242_s21, 0  ;;  %p256_p2 = scmp.eq.s32.totalorder %s3566_s17, 1 }
   0xa   : > { %p261_p3 = scmp.ne.s32.totalorder %s3479_s14, %s3475_s13  ;;  %p262_p4 = scmp.eq.s32.totalorder %s2590_s18, 1 }
   0xb   : > { %s3581_s22 = scalar_select %p243_p1, %s3483_s15, %s245_s20  }
   0xc   : > { %p3583_p5 = por %p256_p2, %p255_p0  ;;  %p3587_p6 = por %p262_p4, %p261_p3 }
   0xd   : > { %p2593_p7 = scmp.ge.s32.totalorder %s3487_s16, 1  ;;  %p315_p8 = scmp.lt.s32.totalorder %s3487_s16, 3 }
   0xf   : > { %p316_p9 = pnand %p2593_p7, %p315_p8 }
  0x10   : > { %s4268_s1 = sld [smem:[#allocation9_spill]] (!%p316_p9)  ;;  %p353_p10 = scmp.lt.s32.totalorder (!%p316_p9), %s3566_s17, 1 }
  0x11   : > { %319 = sbr.rel (%p316_p9) target bundleno = 500 (0x1f4), region = 60  ;;  %s4269_s0 = sld [smem:[#allocation8_spill]] (!%p316_p9) }
  0x12   : > { %s3221_s21 = sshll.u32 (!%p316_p9), %s3566_s17, 2 }
  0x13   : > { %s2526_s11 = scalar_lea.hbm (!%p316_p9), %s4263_s10, %s3221_s21 }
  0x14   : > { %s2530_s12 = sshll.u32 (!%p316_p9), %s2526_s11, 4  ;;  %s2531_s12 = int_to_ptr.hbm [resolvable:$true] %s2530_s12 }
  0x15   : > { %s3439_s25 = sshra.s32 (!%p316_p9), %s2531_s12, 4  ;;  %s3440_s25 = int_to_ptr.hbm [resolvable:$true] %s3439_s25 }
  0x16   : > { %v3232_v0 = vld [vmem:[%s4268_s1 + $0x38] sm:$0xff]  ;;  %v3489_v3 = vmov 0   ;;  %v3231_v4 = vld [vmem:[%s4268_s1 + $0x30] sm:$0xff]  ;;  %s354_s28 = scalar_select %p353_p10, %s3566_s17, 1  ;;  %v3230_v9 = vld [vmem:[%s4268_s1 + $0x28] sm:$0xff]  ;;  %vm378_vm0 = vcmask 1042432  }
  0x17   : > { %v3248_v1 = vld [vmem:[%s4268_s1 + $0xb8] sm:$0xff]  ;;  %359 = vst [vmem:[#allocation2] sm:$0x7] %v3489_v3  ;;  %1407 = vmatpush.bf16.msra.mxu0 %v3232_v0  ;;  %v3247_v6 = vld [vmem:[%s4268_s1 + $0xb0] sm:$0xff]  ;;  %v3246_v10 = vld [vmem:[%s4268_s1 + $0xa8] sm:$0xff]  ;;  %vm415_vm3 = vcmask 1040384   ;;  %p3446_p0 = scmp.lt.s32.totalorder %s3440_s25, %s4263_s10 }
  0x18   : > { %v3256_v2 = vld [vmem:[%s4268_s1 + $0xf8] sm:$0xff]  ;;  %360 = vst [vmem:[#allocation2 + $0x4] sm:$0x7] %v3489_v3  ;;  %1433 = vmatpush.bf16.msra.mxu2 %v3248_v1  ;;  %v3255_v7 = vld [vmem:[%s4268_s1 + $0xf0] sm:$0xff]  ;;  %v3254_v11 = vld [vmem:[%s4268_s1 + $0xe8] sm:$0xff]  ;;  %s3224_s26 = sshll.u32 %s354_s28, 4 }
  0x19   : > { %v3240_v5 = vld [vmem:[%s4268_s1 + $0x78] sm:$0xff]  ;;  %1446 = vmatpush.bf16.msra.mxu3 %v3256_v2  ;;  %361 = vst [vmem:[#allocation2 + $0x8] sm:$0x7] %v3489_v3  ;;  %v3239_v8 = vld [vmem:[%s4268_s1 + $0x70] sm:$0xff]  ;;  %v3238_v12 = vld [vmem:[%s4268_s1 + $0x68] sm:$0xff]  ;;  %s3637_s20 = scalar_lea.vmem %s4269_s0, %s3224_s26  ;;  %vm424_vm6 = vcmask 1041408  }
  0x1a   : > { %1420 = vmatpush.bf16.msra.mxu1 %v3240_v5  ;;  %362 = vst [vmem:[#allocation2 + $0xc] sm:$0x7] %v3489_v3  ;;  %v3229_v13 = vld [vmem:[%s4268_s1 + $0x20] sm:$0xff]  ;;  %v366_v18 = vld [vmem:[%s3637_s20 + $0x8] sm:$0xff]  ;;  %v3228_v19 = vld [vmem:[%s4268_s1 + $0x18] sm:$0xff]  ;;  %vm636_vm10 = vcmask 1041409  }
  0x1b   : > { %363 = vst [vmem:[#allocation2 + $0x10] sm:$0x7] %v3489_v3  ;;  %1408 = vmatpush.bf16.msra.mxu0 %v3231_v4  ;;  %v3245_v14 = vld [vmem:[%s4268_s1 + $0xa0] sm:$0xff]  ;;  %v368_v21 = vpack.c.bf16 %v366_v18, %v366_v18  ;;  %v3244_v22 = vld [vmem:[%s4268_s1 + $0x98] sm:$0xff]  ;;  %vm379_vm1 = vsmask.f32 2306 }
  0x1c   : > { %1434 = vmatpush.bf16.msra.mxu2 %v3247_v6  ;;  %1535 = vst [vmem:[#allocation3] sm:$0x3] %v3489_v3  ;;  %v3253_v15 = vld [vmem:[%s4268_s1 + $0xe0] sm:$0xff]  ;;  %v3252_v23 = vld [vmem:[%s4268_s1 + $0xd8] sm:$0xff]  ;;  %v3227_v29 = vld [vmem:[%s4268_s1 + $0x10] sm:$0xff]  ;;  %s3441_s27 = scalar_lea.hbm %s3440_s25, 4 }
  0x1d   : > { %1447 = vmatpush.bf16.msra.mxu3 %v3255_v7  ;;  %1536 = vst [vmem:[#allocation3 + $0x2] sm:$0x3] %v3489_v3  ;;  %v3237_v16 = vld [vmem:[%s4268_s1 + $0x60] sm:$0xff]  ;;  %v3236_v24 = vld [vmem:[%s4268_s1 + $0x58] sm:$0xff]  ;;  %v394_v27 = vshrl.u32 %v368_v21, 16  ;;  %v397_v28 = vshll.u32 %v368_v21, 16  ;;  %vm3676_vm2 = vmand %vm378_vm0, %vm379_vm1  ;;  %p3442_p11 = scmp.ne.s32.totalorder %s3440_s25, %s3441_s27 }
  0x1e   : > { %1421 = vmatpush.bf16.msra.mxu1 %v3239_v8  ;;  %1537 = vst [vmem:[#allocation3 + $0x4] sm:$0x3] %v3489_v3  ;;  %v365_v17 = vld [vmem:[%s3637_s20] sm:$0xff]  ;;  %v3243_v30 = vld [vmem:[%s4268_s1 + $0x90] sm:$0xff]  ;;  %v414_v46 = vld [vmem:[#allocation2] sm:$0x1] }
  0x1f   : > { %1409 = vmatpush.bf16.msra.mxu0 %v3230_v9  ;;  %1538 = vst [vmem:[#allocation3 + $0x6] sm:$0x3] %v3489_v3  ;;  %v367_v20 = vpack.c.bf16 %v365_v17, %v365_v17  ;;  %v3251_v31 = vld [vmem:[%s4268_s1 + $0xd0] sm:$0xff]  ;;  %v381_v33 = vld [vmem:[#allocation2 + $0x4] sm:$0x7]  ;;  %v396_v36 = vrot.slane %v394_v27, 7  ;;  %p3443_p12 = pnand %p3442_p11, %p3583_p5 }
  0x20   : > { %1435 = vmatpush.bf16.msra.mxu2 %v3246_v10  ;;  %v3235_v37 = vld [vmem:[%s4268_s1 + $0x50] sm:$0xff]  ;;  %v390_v39 = vld [vmem:[#allocation2 + $0x8] sm:$0x7]  ;;  %v405_v41 = vrot.slane %v394_v27, 5  ;;  %v406_v42 = vrot.slane %v397_v28, 6  ;;  %v3226_v53 = vld [vmem:[%s4268_s1 + $0x8] sm:$0xff] }
  0x21   : > { %1448 = vmatpush.bf16.msra.mxu3 %v3254_v11  ;;  %v370_v25 = vshrl.u32 %v367_v20, 16  ;;  %v373_v26 = vshll.u32 %v367_v20, 16  ;;  %v402_v40 = vld [vmem:[#allocation2 + $0xc] sm:$0x7]  ;;  %v399_v45 = vor.u32 %v397_v28, %v396_v36  ;;  %vm416_vm4 = vsmask.f32 256  ;;  %p3444_p13 = pneg %p3443_p12 }
  0x22   : > { %1422 = vmatpush.bf16.msra.mxu1 %v3238_v12  ;;  %v421_v47 = vld [vmem:[#allocation2] sm:$0x2]  ;;  %v407_v48 = vor.u32 %v406_v42, %v405_v41  ;;  %vm3681_vm5 = vmand %vm415_vm3, %vm416_vm4  ;;  %v418_v50 = vld [vmem:[#allocation4] sm:$0x1]  ;;  %vm433_vm7 = vsmask.f32 7938 }
  0x23   : > { %1410 = vmatpush.bf16.msra.mxu0 %v3229_v13  ;;  %v372_v32 = vrot.slane %v370_v25, 7  ;;  %v384_v34 = vrot.slane %v370_v25, 5  ;;  %v385_v35 = vrot.slane %v373_v26, 6  ;;  %v423_v51 = vrot.slane %v421_v47, 2  ;;  %v438_v52 = vld [vmem:[#allocation2] sm:$0x1]  ;;  %vm3755_vm9 = vmand %vm415_vm3, %vm433_vm7 }
  0x24   : > { %1436 = vmatpush.bf16.msra.mxu2 %v3245_v14  ;;  %v3242_v54 = vld [vmem:[%s4268_s1 + $0x88] sm:$0xff]  ;;  %v403_v57 = vsel %vm3676_vm2, %v399_v45, %v402_v40  ;;  %v408_v60 = vrot.slane %v407_v48, 4  ;;  %v452_v62 = vld [vmem:[#allocation2] sm:$0x2]  ;;  %v3225_v63 = vld [vmem:[%s4268_s1] sm:$0xff]  ;;  %v419_v2 = vsel %vm3681_vm5, %v414_v46, %v418_v50  ;;  %v440_v3 = vrot.slane %v438_v52, 2 }
  0x25   : > { %1449 = vmatpush.bf16.msra.mxu3 %v3253_v15  ;;  %v375_v43 = vor.u32 %v373_v26, %v372_v32  ;;  %v386_v44 = vor.u32 %v385_v35, %v384_v34  ;;  %v411_v58 = vld [vmem:[#allocation2 + $0x10] sm:$0x7]  ;;  %v427_v61 = vsel %vm424_vm6, %v421_v47, %v423_v51  ;;  %404 = vst [vmem:[#allocation2 + $0xc] sm:$0x7] %v403_v57  ;;  %v449_v4 = vld [vmem:[#allocation4 + $0x2] sm:$0x1] }
  0x26   : > { %1423 = vmatpush.bf16.msra.mxu1 %v3237_v16  ;;  %v3250_v59 = vld [vmem:[%s4268_s1 + $0xc8] sm:$0xff]  ;;  %v3264_v5 = vld [vmem:[%s4268_s1 + $0x138] sm:$0xff]  ;;  %v3241_v6 = vld [vmem:[%s4268_s1 + $0x80] sm:$0xff]  ;;  %v412_v7 = vsel %vm3676_vm2, %v408_v60, %v411_v58  ;;  %v428_v8 = vshll.u32 %v427_v61, 16  ;;  %v443_v11 = vsel %vm424_vm6, %v438_v52, %v440_v3  ;;  %v454_v12 = vrot.slane %v452_v62, 2 }
  0x27   : > { %1411 = vmatpush.bf16.msra.mxu0 %v3228_v19  ;;  %v382_v55 = vsel %vm3676_vm2, %v375_v43, %v381_v33  ;;  %v387_v56 = vrot.slane %v386_v44, 4  ;;  %v3234_v0 = vld [vmem:[%s4268_s1 + $0x48] sm:$0xff]  ;;  %v465_v9 = vld [vmem:[#allocation2] sm:$0x2]  ;;  %v3249_v10 = vld [vmem:[%s4268_s1 + $0xc0] sm:$0xff]  ;;  %v444_v16 = vshrl.u32 %v443_v11, 16 }
  0x28   : > { %1437 = vmatpush.bf16.msra.mxu2 %v3244_v22  ;;  %383 = vst [vmem:[#allocation2 + $0x4] sm:$0x7] %v382_v55  ;;  %v467_v13 = vrot.slane %v465_v9, 2  ;;  %v478_v14 = vld [vmem:[#allocation2] sm:$0x4]  ;;  %v3263_v21 = vld [vmem:[%s4268_s1 + $0x130] sm:$0xff]  ;;  %v457_v28 = vsel %vm424_vm6, %v452_v62, %v454_v12 }
  0x29   : > { %1450 = vmatpush.bf16.msra.mxu3 %v3252_v23  ;;  %v391_v1 = vsel %vm3676_vm2, %v387_v56, %v390_v39  ;;  %413 = vst [vmem:[#allocation2 + $0x10] sm:$0x7] %v412_v7  ;;  %v3280_v15 = vld [vmem:[%s4268_s1 + $0x1b8] sm:$0xff]  ;;  %v3233_v22 = vld [vmem:[%s4268_s1 + $0x40] sm:$0xff]  ;;  %v450_v25 = vsel %vm3681_vm5, %v444_v16, %v449_v4  ;;  %v3279_v27 = vld [vmem:[%s4268_s1 + $0x1b0] sm:$0xff]  ;;  %v2599_v42 = vrot.slane %v457_v28, 9 }
  0x2a   : > { %1424 = vmatpush.bf16.msra.mxu1 %v3236_v24  ;;  %392 = vst [vmem:[#allocation2 + $0x8] sm:$0x7] %v391_v1  ;;  %v475_v17 = vld [vmem:[#allocation4 + $0x4] sm:$0x1]  ;;  %v470_v19 = vsel %vm424_vm6, %v465_v9, %v467_v13  ;;  %v490_v20 = vld [vmem:[#allocation4 + $0x6] sm:$0x1] }
  0x2b   : > { %1412 = vmatpush.bf16.msra.mxu0 %v3227_v29  ;;  %420 = vst [vmem:[#allocation4] sm:$0x1] %v419_v2  ;;  %v3288_v18 = vld [vmem:[%s4268_s1 + $0x1f8] sm:$0xff]  ;;  %v2597_v24 = vrot.slane %v428_v8, 9  ;;  %v2600_v26 = vrot.slane %v470_v19, 9  ;;  %v3271_v36 = vld [vmem:[%s4268_s1 + $0x170] sm:$0xff] }
  0x2c   : > { %1438 = vmatpush.bf16.msra.mxu2 %v3243_v30  ;;  %480 = vst.sshfl [vmem:[#allocation1] sm:$0xff pattern:$0x75643120] %v478_v14  ;;  %v3272_v23 = vld [vmem:[%s4268_s1 + $0x178] sm:$0xff]  ;;  %vm637_vm8 = vsmask.f32 1280 }
  0x2d   : > { %1451 = vmatpush.bf16.msra.mxu3 %v3251_v31  ;;  %451 = vst [vmem:[#allocation4 + $0x2] sm:$0x1] %v450_v25  ;;  %v3287_v31 = vld [vmem:[%s4268_s1 + $0x1f0] sm:$0xff]  ;;  %v476_v32 = vsel %vm3681_vm5, %v2600_v26, %v475_v17  ;;  %v544_v39 = vld [vmem:[#allocation4 + $0xa] sm:$0x1]  ;;  %v3262_v41 = vld [vmem:[%s4268_s1 + $0x128] sm:$0xff] }
  0x2e   : > { %1425 = vmatpush.bf16.msra.mxu1 %v3235_v37  ;;  %477 = vst [vmem:[#allocation4 + $0x4] sm:$0x1] %v476_v32  ;;  %v3278_v46 = vld [vmem:[%s4268_s1 + $0x1a8] sm:$0xff]  ;;  %v639_v61 = vld [vmem:[#allocation4] sm:$0x2]  ;;  %vm3778_vm11 = vmand %vm636_vm10, %vm637_vm8 }
  0x2f   : > { %1413 = vmatpush.bf16.msra.mxu0 %v3226_v53  ;;  %v489_v29 = vld [vmem:[#allocation2 + $0x4] sm:$0x1]  ;;  %v493_v30 = vld [vmem:[#allocation2 + $0x4] sm:$0x2]  ;;  %v547_v44 = vld [vmem:[#allocation2 + $0x4] sm:$0x4] }
  0x30   : > { %1439 = vmatpush.bf16.msra.mxu2 %v3242_v54  ;;  %v491_v33 = vsel %vm3681_vm5, %v489_v29, %v490_v20  ;;  %v495_v34 = vrot.slane %v493_v30, 2  ;;  %v534_v35 = vld [vmem:[#allocation2 + $0x4] sm:$0x2]  ;;  %v3286_v52 = vld [vmem:[%s4268_s1 + $0x1e8] sm:$0xff]  ;;  %v3261_v8 = vld [vmem:[%s4268_s1 + $0x120] sm:$0xff] }
  0x31   : > { %1452 = vmatpush.bf16.msra.mxu3 %v3250_v59  ;;  %v536_v38 = vrot.slane %v534_v35, 2  ;;  %v603_v40 = vld [vmem:[#allocation2 + $0x8] sm:$0x2]  ;;  %492 = vst [vmem:[#allocation4 + $0x6] sm:$0x1] %v491_v33  ;;  %v3270_v3 = vld [vmem:[%s4268_s1 + $0x168] sm:$0xff] }
  0x32   : > { %1426 = vmatpush.bf16.msra.mxu1 %v3234_v0  ;;  %v498_v43 = vsel %vm424_vm6, %v493_v30, %v495_v34  ;;  %v605_v45 = vrot.slane %v603_v40, 2  ;;  %v435_v47 = vld [vmem:[#allocation4] sm:$0x1]  ;;  %v627_v51 = vld [vmem:[#allocation2 + $0x8] sm:$0x1]  ;;  %v3259_v32 = vld [vmem:[%s4268_s1 + $0x110] sm:$0xff] }
  0x33   : > { %1414 = vmatpush.bf16.msra.mxu0 %v3225_v63  ;;  %v499_v48 = vshll.u32 %v498_v43, 16  ;;  %v539_v50 = vsel %vm424_vm6, %v534_v35, %v536_v38  ;;  %v436_v53 = vsel %vm3755_vm9, %v2597_v24, %v435_v47  ;;  %v482_v54 = vld [vmem:[#allocation1 + $0x1] ss:$2 sm:$0xff]  ;;  %v613_v57 = vld [vmem:[#allocation4 + $0x10] sm:$0x1]  ;;  %v629_v58 = vrot.slane %v627_v51, 2 }
  0x34   : > { %1440 = vmatpush.bf16.msra.mxu2 %v3241_v6  ;;  %v2604_v55 = vrot.slane %v539_v50, 9  ;;  %v608_v56 = vsel %vm424_vm6, %v603_v40, %v605_v45  ;;  %437 = vst [vmem:[#allocation4] sm:$0x1] %v436_v53  ;;  %v483_v59 = vshll.u32 %v482_v54, 16  ;;  %v462_v62 = vld [vmem:[#allocation4 + $0x2] sm:$0x1] }
  0x35   : > { %1453 = vmatpush.bf16.msra.mxu3 %v3249_v10  ;;  %v2608_v60 = vrot.slane %v608_v56, 9  ;;  %v2601_v63 = vrot.slane %v499_v48, 9  ;;  %549 = vst.sshfl [vmem:[#allocation1] sm:$0xff pattern:$0x75643120] %v547_v44  ;;  %v632_v1 = vsel %vm424_vm6, %v627_v51, %v629_v58  ;;  %v463_v4 = vsel %vm3755_vm9, %v2599_v42, %v462_v62  ;;  %v3277_v11 = vld [vmem:[%s4268_s1 + $0x1a0] sm:$0xff] }
  0x36   : > { %1427 = vmatpush.bf16.msra.mxu1 %v3233_v22  ;;  %v545_v0 = vsel %vm3681_vm5, %v2604_v55, %v544_v39  ;;  %v634_v6 = vrot.slane %v632_v1, 7  ;;  %v642_v7 = vld [vmem:[#allocation2 + $0x8] sm:$0x2]  ;;  %464 = vst [vmem:[#allocation4 + $0x2] sm:$0x1] %v463_v4  ;;  %v3258_v51 = vld [vmem:[%s4268_s1 + $0x108] sm:$0xff] }
  0x37   : > { %1459 = vmatpush.bf16.msrb.mxu0 %v3264_v5  ;;  %546 = vst [vmem:[#allocation4 + $0xa] sm:$0x1] %v545_v0  ;;  %v614_v5 = vsel %vm3681_vm5, %v2608_v60, %v613_v57  ;;  %v486_v9 = vld [vmem:[#allocation4 + $0x4] sm:$0x1]  ;;  %v644_v10 = vrot.slane %v642_v7, 2  ;;  %v3285_v16 = vld [vmem:[%s4268_s1 + $0x1e0] sm:$0xff] }
  0x38   : > { %1485 = vmatpush.bf16.msrb.mxu2 %v3280_v15  ;;  %v487_v12 = vsel %vm3755_vm9, %v483_v59, %v486_v9  ;;  %v504_v13 = vld [vmem:[#allocation4 + $0x6] sm:$0x1]  ;;  %615 = vst [vmem:[#allocation4 + $0x10] sm:$0x1] %v614_v5  ;;  %v640_v14 = vsel %vm3778_vm11, %v634_v6, %v639_v61  ;;  %v3269_v19 = vld [vmem:[%s4268_s1 + $0x160] sm:$0xff]  ;;  %v3294_v2 = vld [vmem:[%s4268_s1 + $0x228] sm:$0xff] }
  0x39   : > { %1498 = vmatpush.bf16.msrb.mxu3 %v3288_v18  ;;  %v3260_v15 = vld [vmem:[%s4268_s1 + $0x118] sm:$0xff]  ;;  %488 = vst [vmem:[#allocation4 + $0x4] sm:$0x1] %v487_v12  ;;  %v505_v17 = vsel %vm3755_vm9, %v2601_v63, %v504_v13  ;;  %v656_v18 = vld [vmem:[#allocation2 + $0x8] sm:$0x1]  ;;  %v647_v22 = vsel %vm424_vm6, %v642_v7, %v644_v10 }
  0x3a   : > { %1472 = vmatpush.bf16.msrb.mxu1 %v3272_v23  ;;  %506 = vst [vmem:[#allocation4 + $0x6] sm:$0x1] %v505_v17  ;;  %v616_v20 = vld [vmem:[#allocation2 + $0x8] sm:$0x4]  ;;  %v673_v23 = vld [vmem:[#allocation2 + $0x8] sm:$0x2] }
  0x3b   : > { %1460 = vmatpush.bf16.msrb.mxu0 %v3263_v21  ;;  %v658_v21 = vrot.slane %v656_v18, 2  ;;  %641 = vst [vmem:[#allocation4] sm:$0x2] %v640_v14  ;;  %v674_v24 = vld [vmem:[#allocation4 + $0x4] sm:$0x2]  ;;  %v648_v33 = vshll.u32 %v647_v22, 16 }
  0x3c   : > { %1486 = vmatpush.bf16.msrb.mxu2 %v3279_v27  ;;  %v551_v25 = vld [vmem:[#allocation1 + $0x1] ss:$2 sm:$0xff]  ;;  %vm651_vm12 = vsmask.f32 7942  ;;  %v675_v27 = vsel %vm3778_vm11, %v673_v23, %v674_v24  ;;  %v689_v28 = vld [vmem:[#allocation2 + $0xc] sm:$0x1] }
  0x3d   : > { %1499 = vmatpush.bf16.msrb.mxu3 %v3287_v31  ;;  %v661_v26 = vsel %vm424_vm6, %v656_v18, %v658_v21  ;;  %v552_v29 = vshll.u32 %v551_v25, 16  ;;  %618 = vst.sshfl [vmem:[#allocation1] sm:$0xff pattern:$0x75643120] %v616_v20  ;;  %v666_v31 = vld [vmem:[#allocation4 + $0x2] sm:$0x2]  ;;  %vm3821_vm13 = vmand %vm636_vm10, %vm651_vm12 }
  0x3e   : > { %1473 = vmatpush.bf16.msrb.mxu1 %v3271_v36  ;;  %v555_v30 = vld [vmem:[#allocation4 + $0xa] sm:$0x1]  ;;  %v662_v34 = vshrl.u32 %v661_v26, 16  ;;  %676 = vst [vmem:[#allocation4 + $0x4] sm:$0x2] %v675_v27  ;;  %v691_v35 = vrot.slane %v689_v28, 2 }
  0x3f   : > { %1461 = vmatpush.bf16.msrb.mxu0 %v3262_v41  ;;  %v556_v36 = vsel %vm3755_vm9, %v552_v29, %v555_v30  ;;  %v698_v38 = vld [vmem:[#allocation4 + $0x6] sm:$0x2]  ;;  %v701_v39 = vld [vmem:[#allocation2 + $0xc] sm:$0x2]  ;;  %v731_v44 = vld [vmem:[#allocation4 + $0xa] sm:$0x2] }
  0x40   : > { %1487 = vmatpush.bf16.msrb.mxu2 %v3278_v46  ;;  %v730_v40 = vld [vmem:[#allocation2 + $0xc] sm:$0x2]  ;;  %557 = vst [vmem:[#allocation4 + $0xa] sm:$0x1] %v556_v36  ;;  %v664_v42 = vrot.slane %v662_v34, 7  ;;  %v694_v43 = vsel %vm424_vm6, %v689_v28, %v691_v35  ;;  %v703_v54 = vrot.slane %v701_v39, 2 }
  0x41   : > { %1500 = vmatpush.bf16.msrb.mxu3 %v3286_v52  ;;  %v696_v45 = vrot.slane %v694_v43, 7  ;;  %v732_v46 = vsel %vm3778_vm11, %v730_v40, %v731_v44  ;;  %v677_v50 = vld [vmem:[#allocation2 + $0x8] sm:$0x4]  ;;  %v624_v56 = vld [vmem:[#allocation4 + $0x10] sm:$0x1]  ;;  %v3276_v1 = vld [vmem:[%s4268_s1 + $0x198] sm:$0xff] }
  0x42   : > { %1474 = vmatpush.bf16.msrb.mxu1 %v3270_v3  ;;  %v653_v47 = vld [vmem:[#allocation4] sm:$0x2]  ;;  %v667_v48 = vsel %vm3778_vm11, %v664_v42, %v666_v31  ;;  %733 = vst [vmem:[#allocation4 + $0xa] sm:$0x2] %v732_v46  ;;  %v669_v58 = vld [vmem:[#allocation2 + $0x8] sm:$0x2]  ;;  %v706_v62 = vsel %vm424_vm6, %v701_v39, %v703_v54 }
  0x43   : > { %1462 = vmatpush.bf16.msrb.mxu0 %v3261_v8  ;;  %v654_v52 = vsel %vm3821_vm13, %v648_v33, %v653_v47  ;;  %668 = vst [vmem:[#allocation4 + $0x2] sm:$0x2] %v667_v48  ;;  %v699_v53 = vsel %vm3778_vm11, %v696_v45, %v698_v38  ;;  %v3257_v59 = vld [vmem:[%s4268_s1 + $0x100] sm:$0xff]  ;;  %v507_v60 = vld [vmem:[#allocation2 + $0x4] sm:$0x1]  ;;  %v3275_v8 = vld [vmem:[%s4268_s1 + $0x190] sm:$0xff] }
  0x44   : > { %1488 = vmatpush.bf16.msrb.mxu2 %v3277_v11  ;;  %v620_v55 = vld [vmem:[#allocation1 + $0x1] ss:$2 sm:$0xff]  ;;  %655 = vst [vmem:[#allocation4] sm:$0x2] %v654_v52  ;;  %v787_v63 = vld [vmem:[#allocation2 + $0x10] sm:$0x2] }
  0x45   : > { %1501 = vmatpush.bf16.msrb.mxu3 %v3285_v16  ;;  %v621_v57 = vshll.u32 %v620_v55, 16  ;;  %679 = vst.sshfl [vmem:[#allocation1] sm:$0xff pattern:$0x75643120] %v677_v50  ;;  %v788_v0 = vld [vmem:[#allocation4 + $0x10] sm:$0x2] }
  0x46   : > { %1475 = vmatpush.bf16.msrb.mxu1 %v3269_v19  ;;  %700 = vst [vmem:[#allocation4 + $0x6] sm:$0x2] %v699_v53  ;;  %v1570_v3 = vld [vmem:[#allocation3] sm:$0x3]  ;;  %v789_v4 = vsel %vm3778_vm11, %v787_v63, %v788_v0  ;;  %v3284_v5 = vld [vmem:[%s4268_s1 + $0x1d8] sm:$0xff]  ;;  %v707_v10 = vshll.u32 %v706_v62, 16 }
  0x47   : > { %1463 = vmatpush.bf16.msrb.mxu0 %v3260_v15  ;;  %v625_v61 = vsel %vm3755_vm9, %v621_v57, %v624_v56  ;;  %v734_v6 = vld [vmem:[#allocation2 + $0xc] sm:$0x4]  ;;  %790 = vst [vmem:[#allocation4 + $0x10] sm:$0x2] %v789_v4  ;;  %v3268_v7 = vld [vmem:[%s4268_s1 + $0x158] sm:$0xff]  ;;  %v3283_v11 = vld [vmem:[%s4268_s1 + $0x1d0] sm:$0xff] }
  0x48   : > { %626 = vst [vmem:[#allocation4 + $0x10] sm:$0x1] %v625_v61  ;;  %1489 = vmatpush.bf16.msrb.mxu2 %v3276_v1  ;;  %v509_v12 = vrot.slane %v507_v60, 2  ;;  %v1572_v14 = vshrl.u32 %v1570_v3, 16  ;;  %v3267_v15 = vld [vmem:[%s4268_s1 + $0x150] sm:$0xff]  ;;  %v1575_v18 = vshll.u32 %v1570_v3, 16 }
  0x49   : > { %1502 = vmatpush.bf16.msrb.mxu3 %v3284_v5  ;;  %v518_v16 = vld [vmem:[#allocation4 + $0x8] sm:$0x1]  ;;  %v3274_v19 = vld [vmem:[%s4268_s1 + $0x188] sm:$0xff]  ;;  %v686_v23 = vld [vmem:[#allocation4 + $0x4] sm:$0x2] }
  0x4a   : > { %v670_v9 = vld [vmem:[#allocation4 + $0x2] sm:$0x2]  ;;  %1476 = vmatpush.bf16.msrb.mxu1 %v3268_v7  ;;  %v512_v20 = vsel %vm424_vm6, %v507_v60, %v509_v12  ;;  %v3282_v25 = vld [vmem:[%s4268_s1 + $0x1c8] sm:$0xff]  ;;  %v1574_v30 = vrot.slane %v1572_v14, 6  ;;  %v1577_v31 = vrot.slane %v1575_v18, 7  ;;  %v3281_v36 = vld [vmem:[%s4268_s1 + $0x1c0] sm:$0xff] }
  0x4b   : > { %1464 = vmatpush.bf16.msrb.mxu0 %v3259_v32  ;;  %v671_v13 = vsel %vm3821_vm13, %v669_v58, %v670_v9  ;;  %v513_v26 = vshrl.u32 %v512_v20, 16  ;;  %v3266_v28 = vld [vmem:[%s4268_s1 + $0x148] sm:$0xff]  ;;  %v3273_v32 = vld [vmem:[%s4268_s1 + $0x180] sm:$0xff]  ;;  %v521_v34 = vld [vmem:[#allocation2 + $0x4] sm:$0x2] }
  0x4c   : > { %672 = vst [vmem:[#allocation4 + $0x2] sm:$0x2] %v671_v13  ;;  %v681_v17 = vld [vmem:[#allocation1 + $0x1] ss:$2 sm:$0xff]  ;;  %1490 = vmatpush.bf16.msrb.mxu2 %v3275_v8  ;;  %v791_v29 = vld [vmem:[#allocation2 + $0x10] sm:$0x4]  ;;  %v1578_v48 = vor.u32 %v1577_v31, %v1574_v30 }
  0x4d   : > { %v682_v21 = vshll.u32 %v681_v17, 16  ;;  %v710_v22 = vld [vmem:[#allocation4 + $0x6] sm:$0x2]  ;;  %736 = vst.sshfl [vmem:[#allocation1] sm:$0xff pattern:$0x75643120] %v734_v6  ;;  %1503 = vmatpush.bf16.msrb.mxu3 %v3283_v11  ;;  %v519_v33 = vsel %vm3681_vm5, %v513_v26, %v518_v16 }
  0x4e   : > { %v711_v24 = vsel %vm3821_vm13, %v707_v10, %v710_v22  ;;  %1477 = vmatpush.bf16.msrb.mxu1 %v3267_v15  ;;  %520 = vst [vmem:[#allocation4 + $0x8] sm:$0x1] %v519_v33  ;;  %v523_v38 = vrot.slane %v521_v34, 2  ;;  %v558_v39 = vld [vmem:[#allocation2 + $0x8] sm:$0x1]  ;;  %v1579_v62 = vrot.slane %v1578_v48, 2 }
  0x4f   : > { %1465 = vmatpush.bf16.msrb.mxu0 %v3258_v51  ;;  %v684_v27 = vrot.slane %v682_v21, 7  ;;  %712 = vst [vmem:[#allocation4 + $0x6] sm:$0x2] %v711_v24  ;;  %v559_v40 = vld [vmem:[#allocation4 + $0xc] sm:$0x1]  ;;  %v3290_v41 = vld [vmem:[%s4268_s1 + $0x208] sm:$0xff] }
  0x50   : > { %1491 = vmatpush.bf16.msrb.mxu2 %v3274_v19  ;;  %v562_v42 = vld [vmem:[#allocation2 + $0x8] sm:$0x2]  ;;  %v560_v44 = vsel %vm3681_vm5, %v558_v39, %v559_v40  ;;  %v576_v46 = vld [vmem:[#allocation2 + $0x8] sm:$0x1]  ;;  %v1582_v52 = vld [vmem:[#allocation3] sm:$0x2]  ;;  %v526_v53 = vsel %vm424_vm6, %v521_v34, %v523_v38 }
  0x51   : > { %v687_v35 = vsel %vm3821_vm13, %v684_v27, %v686_v23  ;;  %1504 = vmatpush.bf16.msrb.mxu3 %v3282_v25  ;;  %v3265_v43 = vld [vmem:[%s4268_s1 + $0x140] sm:$0xff]  ;;  %v564_v45 = vrot.slane %v562_v42, 2  ;;  %561 = vst [vmem:[#allocation4 + $0xc] sm:$0x1] %v560_v44  ;;  %v578_v50 = vrot.slane %v576_v46, 2  ;;  %v2897_v63 = vrot.slane %v1582_v52, 9 }
  0x52   : > { %688 = vst [vmem:[#allocation4 + $0x4] sm:$0x2] %v687_v35  ;;  %1478 = vmatpush.bf16.msrb.mxu1 %v3266_v28  ;;  %v743_v55 = vld [vmem:[#allocation4 + $0xa] sm:$0x2]  ;;  %v713_v57 = vld [vmem:[#allocation2 + $0xc] sm:$0x1] }
  0x53   : > { %1466 = vmatpush.bf16.msrb.mxu0 %v3257_v59  ;;  %v567_v54 = vsel %vm424_vm6, %v562_v42, %v564_v45  ;;  %v1568_v59 = vld [vmem:[#allocation3] sm:$0x1]  ;;  %v581_v60 = vsel %vm424_vm6, %v576_v46, %v578_v50  ;;  %v715_v61 = vrot.slane %v713_v57, 2  ;;  %v2603_v0 = vrot.slane %v526_v53, 9  ;;  %v746_v1 = vld [vmem:[#allocation2 + $0x10] sm:$0x1] }
  0x54   : > { %v738_v47 = vld [vmem:[#allocation1 + $0x1] ss:$2 sm:$0xff]  ;;  %1492 = vmatpush.bf16.msrb.mxu2 %v3273_v32  ;;  %v568_v56 = vshll.u32 %v567_v54, 16  ;;  %v587_v7 = vld [vmem:[#allocation4 + $0xe] sm:$0x1]  ;;  %v582_v9 = vshrl.u32 %v581_v60, 16 }
  0x55   : > { %v739_v51 = vshll.u32 %v738_v47, 16  ;;  %793 = vst.sshfl [vmem:[#allocation1] sm:$0xff pattern:$0x75643120] %v791_v29  ;;  %1505 = vmatpush.bf16.msrb.mxu3 %v3281_v36  ;;  %v531_v5 = vld [vmem:[#allocation4 + $0x8] sm:$0x1]  ;;  %v718_v10 = vsel %vm424_vm6, %v713_v57, %v715_v61 }
  0x56   : > { %1479 = vmatpush.bf16.msrb.mxu1 %v3265_v43  ;;  %v2605_v6 = vrot.slane %v568_v56, 9  ;;  %v590_v8 = vld [vmem:[#allocation2 + $0x8] sm:$0x2]  ;;  %v748_v11 = vrot.slane %v746_v1, 2  ;;  %v770_v12 = vld [vmem:[#allocation2 + $0x10] sm:$0x1]  ;;  %v532_v18 = vsel %vm3755_vm9, %v2603_v0, %v531_v5  ;;  %v588_v25 = vsel %vm3681_vm5, %v582_v9, %v587_v7 }
  0x57   : > { %v741_v58 = vrot.slane %v739_v51, 7  ;;  %v719_v14 = vshrl.u32 %v718_v10, 16  ;;  %v772_v15 = vrot.slane %v770_v12, 2  ;;  %v800_v17 = vld [vmem:[#allocation4 + $0x10] sm:$0x2]  ;;  %v592_v26 = vrot.slane %v590_v8, 2 }
  0x58   : > { %v573_v13 = vld [vmem:[#allocation4 + $0xc] sm:$0x1]  ;;  %v723_v19 = vld [vmem:[#allocation4 + $0x8] sm:$0x2]  ;;  %v751_v20 = vsel %vm424_vm6, %v746_v1, %v748_v11  ;;  %v758_v24 = vld [vmem:[#allocation2 + $0x10] sm:$0x2] }
  0x59   : > { %v744_v3 = vsel %vm3821_vm13, %v741_v58, %v743_v55  ;;  %v803_v4 = vld [vmem:[#allocation4] sm:$0xff]  ;;  %v574_v22 = vsel %vm3755_vm9, %v2605_v6, %v573_v13  ;;  %v721_v23 = vrot.slane %v719_v14, 7  ;;  %v753_v27 = vrot.slane %v751_v20, 7  ;;  %533 = vst [vmem:[#allocation4 + $0x8] sm:$0x1] %v532_v18  ;;  %v3295_v46 = vld [vmem:[%s4268_s1 + $0x230] sm:$0xff] }
  0x5a   : > { %745 = vst [vmem:[#allocation4 + $0xa] sm:$0x2] %v744_v3  ;;  %v775_v28 = vsel %vm424_vm6, %v770_v12, %v772_v15  ;;  %v755_v30 = vld [vmem:[#allocation4 + $0xc] sm:$0x2]  ;;  %v3296_v32 = vld [vmem:[%s4268_s1 + $0x238] sm:$0xff]  ;;  %v760_v35 = vrot.slane %v758_v24, 2  ;;  %v595_v40 = vsel %vm424_vm6, %v590_v8, %v592_v26 }
  0x5b   : > { %951 = vst [vmem:[#allocation1] ss:$4 sm:$0xff] %v803_v4  ;;  %v776_v31 = vshrl.u32 %v775_v28, 16  ;;  %v780_v33 = vld [vmem:[#allocation4 + $0xe] sm:$0x2]  ;;  %v724_v49 = vsel %vm3778_vm11, %v721_v23, %v723_v19  ;;  %v756_v42 = vsel %vm3778_vm11, %v753_v27, %v755_v30  ;;  %v2607_v47 = vrot.slane %v595_v40, 9 }
  0x5c   : > { %1569 = vst [vmem:[#allocation4] sm:$0x1] %v1568_v59  ;;  %v795_v16 = vld [vmem:[#allocation1 + $0x1] ss:$2 sm:$0xff]  ;;  %v763_v48 = vsel %vm424_vm6, %v758_v24, %v760_v35  ;;  %v726_v53 = vld [vmem:[#allocation2 + $0xc] sm:$0x2] }
  0x5d   : > { %1581 = vst [vmem:[#allocation4 + $0x2] sm:$0x1] %v1579_v62  ;;  %v796_v21 = vshll.u32 %v795_v16, 16  ;;  %v778_v36 = vrot.slane %v776_v31, 7  ;;  %v1678_v51 = vld [vmem:[#allocation3 + $0x6] sm:$0x2] }
  0x5e   : > { %1587 = vst [vmem:[#allocation4 + $0x4] sm:$0x1] %v2897_v63  ;;  %v764_v54 = vshll.u32 %v763_v48, 16  ;;  %v1668_v56 = vld [vmem:[#allocation3 + $0x6] sm:$0x3]  ;;  %v3293_v59 = vld [vmem:[%s4268_s1 + $0x220] sm:$0xff] }
  0x5f   : > { %v798_v29 = vrot.slane %v796_v21, 7  ;;  %575 = vst [vmem:[#allocation4 + $0xc] sm:$0x1] %v574_v22  ;;  %v781_v44 = vsel %vm3778_vm11, %v778_v36, %v780_v33  ;;  %v783_v58 = vld [vmem:[#allocation2 + $0x10] sm:$0x2]  ;;  %v1670_v63 = vshrl.u32 %v1668_v56, 16 }
  0x60   : > { %589 = vst [vmem:[#allocation4 + $0xe] sm:$0x1] %v588_v25  ;;  %v3292_v1 = vld [vmem:[%s4268_s1 + $0x218] sm:$0xff]  ;;  %v1663_v3 = vld [vmem:[#allocation3 + $0x6] sm:$0x1]  ;;  %v1673_v5 = vshll.u32 %v1668_v56, 16 }
  0x61   : > { %v801_v34 = vsel %vm3821_vm13, %v798_v29, %v800_v17  ;;  %725 = vst [vmem:[#allocation4 + $0x8] sm:$0x2] %v724_v49  ;;  %v1672_v4 = vrot.slane %v1670_v63, 7  ;;  %v1665_v6 = vrot.slane %v1663_v3, 7  ;;  %v3291_v7 = vld [vmem:[%s4268_s1 + $0x210] sm:$0xff]  ;;  %v3289_v10 = vld [vmem:[%s4268_s1 + $0x200] sm:$0xff] }
  0x62   : > { %v955_v38 = vld.sshfl [vmem:[#allocation1] sm:$0xff pattern:$0x73625140]  ;;  %v956_v39 = vld.sshfl [vmem:[#allocation1 + $0x8] sm:$0xff pattern:$0x73625140] }
  0x63   : > { %1415 = vmatmul.bf16.vlgmr.msra.gmra.mxu0 %v955_v38  ;;  %1428 = vmatmul.bf16.vlgmr.msra.gmra.mxu1 %v956_v39  ;;  %v957_v43 = vld.sshfl [vmem:[#allocation1 + $0x10] sm:$0xff pattern:$0x73625140]  ;;  %802 = vst [vmem:[#allocation4 + $0x10] sm:$0x2] %v801_v34  ;;  %v1675_v8 = vor.u32 %v1673_v5, %v1672_v4  ;;  %v3304_v18 = vld [vmem:[%s4257_s4 + $0x38] sm:$0xff] }
  0x64   : > { %1441 = vmatmul.bf16.vlgmr.msra.gmra.mxu2 %v957_v43  ;;  %v958_v45 = vld.sshfl [vmem:[#allocation1 + $0x18] sm:$0xff pattern:$0x73625140]  ;;  %1511 = vmatpush.bf16.msra.mxu0 %v3296_v32  ;;  %757 = vst [vmem:[#allocation4 + $0xc] sm:$0x2] %v756_v42  ;;  %v3312_v19 = vld [vmem:[%s4257_s4 + $0x78] sm:$0xff] }
  0x65   : > { %1454 = vmatmul.bf16.vlgmr.msra.gmra.mxu3 %v958_v45  ;;  %782 = vst [vmem:[#allocation4 + $0xe] sm:$0x2] %v781_v44  ;;  %2284 = vmatpush.bf16.msra.mxu1 %v3304_v18  ;;  %v3303_v24 = vld [vmem:[%s4257_s4 + $0x30] sm:$0xff]  ;;  %v3302_v28 = vld [vmem:[%s4257_s4 + $0x28] sm:$0xff]  ;;  %v3301_v31 = vld [vmem:[%s4257_s4 + $0x20] sm:$0xff]  ;;  %s350_s1 = sand.u32 1, %s3479_s14  }
  0x66   : > { %2297 = vmatpush.bf16.msra.mxu2 %v3312_v19  ;;  %v3311_v25 = vld [vmem:[%s4257_s4 + $0x70] sm:$0xff]  ;;  %v3310_v29 = vld [vmem:[%s4257_s4 + $0x68] sm:$0xff]  ;;  %v3309_v32 = vld [vmem:[%s4257_s4 + $0x60] sm:$0xff]  ;;  %vm1554_vm14 = vsmask.f32 1282  ;;  %s2594_s28 = sshll.u32 %s350_s1, 2 }
  0x67   : > { %v600_v50 = vld [vmem:[#allocation4 + $0xe] sm:$0x1]  ;;  %v3320_v34 = vld [vmem:[%s4257_s4 + $0xb8] sm:$0xff]  ;;  %v3319_v42 = vld [vmem:[%s4257_s4 + $0xb0] sm:$0xff]  ;;  %s352_s17 = scalar_lea.vmem [#allocation5], %s2594_s28  ;;  %s2516_s18 = scalar_lea.sflag [#allocation6], %s350_s1 }
  0x68   : > { %1512 = vmatpush.bf16.msra.mxu0 %v3295_v46  ;;  %v601_v52 = vsel %vm3755_vm9, %v2607_v47, %v600_v50  ;;  %v727_v57 = vld [vmem:[#allocation4 + $0x8] sm:$0x2]  ;;  %v3328_v49 = vld [vmem:[%s4257_s4 + $0xf8] sm:$0xff]  ;;  %2310 = vmatpush.bf16.msra.mxu3 %v3320_v34  ;;  %v3327_v43 = vld [vmem:[%s4257_s4 + $0xf0] sm:$0xff]  ;;  %s2528_s0 = sshll.u32 %s352_s17, 4  ;;  %s3445_s28 = scalar_lea.hbm %s4263_s10, 8  ;;  %s2529_s0 = int_to_ptr.vmem [resolvable:$true] %s2528_s0 }
  0x69   : > { %602 = vst [vmem:[#allocation4 + $0xe] sm:$0x1] %v601_v52  ;;  %v728_v60 = vsel %vm3821_vm13, %v726_v53, %v727_v57  ;;  %2285 = vmatpush.bf16.msra.mxu1 %v3303_v24  ;;  %v3300_v38 = vld [vmem:[%s4257_s4 + $0x18] sm:$0xff]  ;;  %v3299_v46 = vld [vmem:[%s4257_s4 + $0x10] sm:$0xff]  ;;  %v3326_v50 = vld [vmem:[%s4257_s4 + $0xe8] sm:$0xff]  ;;  %p3447_p1 = scmp.lt.s32.totalorder %s3445_s28, %s3441_s27 }
  0x6a   : > { %v805_v55 = vld [vmem:[#allocation4 + $0x10] sm:$0x3]  ;;  %729 = vst [vmem:[#allocation4 + $0x8] sm:$0x2] %v728_v60  ;;  %2298 = vmatpush.bf16.msra.mxu2 %v3311_v25  ;;  %v3308_v39 = vld [vmem:[%s4257_s4 + $0x58] sm:$0xff]  ;;  %v3307_v47 = vld [vmem:[%s4257_s4 + $0x50] sm:$0xff] }
  0x6b   : > { %964 = vst [vmem:[#allocation1] ss:$4 sm:$0xff] %v805_v55  ;;  %v767_v61 = vld [vmem:[#allocation4 + $0xc] sm:$0x2]  ;;  %v3306_v55 = vld [vmem:[%s4257_s4 + $0x48] sm:$0xff]  ;;  %v3336_v3 = vld [vmem:[%s4257_s4 + $0x138] sm:$0xff]  ;;  %p3448_p2 = por %p3447_p1, %p3446_p0 }
  0x6c   : > { %1679 = vst [vmem:[#allocation4 + $0x10] sm:$0x2] %v1678_v51  ;;  %1513 = vmatpush.bf16.msra.mxu0 %v3294_v2  ;;  %v768_v37 = vsel %vm3821_vm13, %v764_v54, %v767_v61  ;;  %v784_v62 = vld [vmem:[#allocation4 + $0xe] sm:$0x2]  ;;  %2311 = vmatpush.bf16.msra.mxu3 %v3319_v42  ;;  %v3318_v2 = vld [vmem:[%s4257_s4 + $0xa8] sm:$0xff]  ;;  %v3344_v5 = vld [vmem:[%s4257_s4 + $0x178] sm:$0xff] }
  0x6d   : > { %769 = vst [vmem:[#allocation4 + $0xc] sm:$0x2] %v768_v37  ;;  %v785_v0 = vsel %vm3821_vm13, %v783_v58, %v784_v62  ;;  %2286 = vmatpush.bf16.msra.mxu1 %v3302_v28  ;;  %v3298_v54 = vld [vmem:[%s4257_s4 + $0x8] sm:$0xff]  ;;  %v3317_v57 = vld [vmem:[%s4257_s4 + $0xa0] sm:$0xff]  ;;  %v3352_v25 = vld [vmem:[%s4257_s4 + $0x1b8] sm:$0xff]  ;;  %p3449_p3 = pnand %p3448_p2, %p3444_p13 }
  0x6e   : > { %786 = vst [vmem:[#allocation4 + $0xe] sm:$0x2] %v785_v0  ;;  %2299 = vmatpush.bf16.msra.mxu2 %v3310_v29  ;;  %v3325_v58 = vld [vmem:[%s4257_s4 + $0xe0] sm:$0xff]  ;;  %v3316_v0 = vld [vmem:[%s4257_s4 + $0x98] sm:$0xff]  ;;  %v3342_v18 = vld [vmem:[%s4257_s4 + $0x168] sm:$0xff] }
  0x6f   : > { %v3417_v60 = vld [vmem:[%s4255_s2] ss:$0 sm:$0xff]  ;;  %vm4094_vm15 = vmand %vm424_vm6, %vm1554_vm14  ;;  %v3331_v42 = vld [vmem:[%s4257_s4 + $0x110] sm:$0xff] }
  0x70   : > { %1514 = vmatpush.bf16.msra.mxu0 %v3293_v59  ;;  %2312 = vmatpush.bf16.msra.mxu3 %v3318_v2  ;;  %v3297_v61 = vld [vmem:[%s4257_s4] sm:$0xff] }
  0x71   : > { %2287 = vmatpush.bf16.msra.mxu1 %v3301_v31  ;;  %v3305_v37 = vld [vmem:[%s4257_s4 + $0x40] sm:$0xff]  ;;  %v3340_v31 = vld [vmem:[%s4257_s4 + $0x158] sm:$0xff] }
  0x72   : > { %v965_v15 = vld.sshfl [vmem:[#allocation1] sm:$0xff pattern:$0x73625140]  ;;  %2300 = vmatpush.bf16.msra.mxu2 %v3309_v32  ;;  %v3341_v24 = vld [vmem:[%s4257_s4 + $0x160] sm:$0xff] }
  0x73   : > { %v3351_v32 = vld [vmem:[%s4257_s4 + $0x1b0] sm:$0xff] }
  0x74   : > { %1515 = vmatpush.bf16.msra.mxu0 %v3292_v1  ;;  %2313 = vmatpush.bf16.msra.mxu3 %v3317_v57  ;;  %v3324_v1 = vld [vmem:[%s4257_s4 + $0xd8] sm:$0xff] }
  0x75   : > { %v804_v9 = vld [vmem:[#allocation4 + $0x8] sm:$0xff]  ;;  %2288 = vmatpush.bf16.msra.mxu1 %v3300_v38  ;;  %v1556_v38 = vld [vmem:[#allocation3 + $0x2] sm:$0x3]  ;;  %v3356_v57 = vld [vmem:[%s4257_s4 + $0x1d8] sm:$0xff] }
  0x76   : > { %954 = vst [vmem:[#allocation1 + $0x20] ss:$4 sm:$0xff] %v804_v9  ;;  %2301 = vmatpush.bf16.msra.mxu2 %v3308_v39  ;;  %v3315_v9 = vld [vmem:[%s4257_s4 + $0x90] sm:$0xff] }
  0x77   : > { %1667 = vst [vmem:[#allocation4 + $0xc] sm:$0x2] %v1665_v6 }
  0x78   : > { %1516 = vmatpush.bf16.msra.mxu0 %v3291_v7  ;;  %1677 = vst [vmem:[#allocation4 + $0xe] sm:$0x2] %v1675_v8  ;;  %v3418_v7 = vld [vmem:[%s4256_s3] ss:$0 sm:$0xff]  ;;  %2314 = vmatpush.bf16.msra.mxu3 %v3316_v0  ;;  %v3355_v0 = vld [vmem:[%s4257_s4 + $0x1d0] sm:$0xff] }
  0x79   : > { %2289 = vmatpush.bf16.msra.mxu1 %v3299_v46  ;;  %v3358_v46 = vld [vmem:[%s4257_s4 + $0x1e8] sm:$0xff] }
  0x7a   : > { %2302 = vmatpush.bf16.msra.mxu2 %v3307_v47 }
  0x7c   : > { %1517 = vmatpush.bf16.msra.mxu0 %v3290_v41  ;;  %v3323_v41 = vld [vmem:[%s4257_s4 + $0xd0] sm:$0xff]  ;;  %2315 = vmatpush.bf16.msra.mxu3 %v3315_v9 }
  0x7d   : > { %v959_v11 = vld.sshfl [vmem:[#allocation1 + $0x20] sm:$0xff pattern:$0x73625140]  ;;  %v961_v12 = vld.sshfl [vmem:[#allocation1 + $0x30] sm:$0xff pattern:$0x73625140]  ;;  %2290 = vmatpush.bf16.msra.mxu1 %v3298_v54 }
  0x7e   : > { %1467 = vmatmul.bf16.vlgmr.msrb.gmra.mxu0 %v959_v11  ;;  %1493 = vmatmul.bf16.vlgmr.msrb.gmra.mxu2 %v961_v12  ;;  %v962_v13 = vld.sshfl [vmem:[#allocation1 + $0x38] sm:$0xff pattern:$0x73625140]  ;;  %v960_v14 = vld.sshfl [vmem:[#allocation1 + $0x28] sm:$0xff pattern:$0x73625140] }
  0x7f   : > { %1506 = vmatmul.bf16.vlgmr.msrb.gmra.mxu3 %v962_v13  ;;  %1480 = vmatmul.bf16.vlgmr.msrb.gmra.mxu1 %v960_v14  ;;  %v3343_v11 = vld [vmem:[%s4257_s4 + $0x170] sm:$0xff]  ;;  %v3314_v14 = vld [vmem:[%s4257_s4 + $0x88] sm:$0xff]  ;;  %v3329_v54 = vld [vmem:[%s4257_s4 + $0x100] sm:$0xff] }
  0x80   : > { %1518 = vmatpush.bf16.msra.mxu0 %v3289_v10  ;;  %2303 = vmatpush.bf16.msra.mxu2 %v3306_v55  ;;  %v3335_v10 = vld [vmem:[%s4257_s4 + $0x130] sm:$0xff]  ;;  %v3337_v55 = vld [vmem:[%s4257_s4 + $0x140] sm:$0xff] }
  0x81   : > { %2291 = vmatpush.bf16.msra.mxu1 %v3297_v61  ;;  %2316 = vmatpush.bf16.msra.mxu3 %v3314_v14 }
  0x84   : > { %2323 = vmatpush.bf16.msrb.mxu0 %v3328_v49  ;;  %2304 = vmatpush.bf16.msra.mxu2 %v3305_v37 }
  0x85   : > { %2336 = vmatpush.bf16.msrb.mxu1 %v3336_v3 }
  0x88   : > { %2324 = vmatpush.bf16.msrb.mxu0 %v3327_v43  ;;  %2349 = vmatpush.bf16.msrb.mxu2 %v3344_v5  ;;  %v3339_v43 = vld [vmem:[%s4257_s4 + $0x150] sm:$0xff] }
  0x89   : > { %2337 = vmatpush.bf16.msrb.mxu1 %v3335_v10 }
  0x8c   : > { %2325 = vmatpush.bf16.msrb.mxu0 %v3326_v50  ;;  %2350 = vmatpush.bf16.msrb.mxu2 %v3343_v11  ;;  %v3330_v50 = vld [vmem:[%s4257_s4 + $0x108] sm:$0xff] }
  0x8e   : > { %1519 = vmatmul.bf16.vlgmr.msra.gmra.mxu0 %v965_v15  ;;  %v3322_v15 = vld [vmem:[%s4257_s4 + $0xc8] sm:$0xff] }
  0x90   : > { %2326 = vmatpush.bf16.msrb.mxu0 %v3325_v58  ;;  %2351 = vmatpush.bf16.msrb.mxu2 %v3342_v18 }
  0x94   : > { %2327 = vmatpush.bf16.msrb.mxu0 %v3324_v1  ;;  %2352 = vmatpush.bf16.msrb.mxu2 %v3341_v24 }
  0x98   : > { %2328 = vmatpush.bf16.msrb.mxu0 %v3323_v41  ;;  %2353 = vmatpush.bf16.msrb.mxu2 %v3340_v31 }
  0x9c   : > { %2329 = vmatpush.bf16.msrb.mxu0 %v3322_v15  ;;  %2354 = vmatpush.bf16.msrb.mxu2 %v3339_v43  ;;  %v3346_v15 = vld [vmem:[%s4257_s4 + $0x188] sm:$0xff] }
  0xe0   : > { %v1416_v16 = vpop.f32.mrf.mxu0  ;;  %v1429_v17 = vpop.f32.mrf.mxu1 }
  0xe1   : > { %v1430_v30 = vadd.f32 %v1429_v17, %v1416_v16  ;;  %v3334_v16 = vld [vmem:[%s4257_s4 + $0x128] sm:$0xff] }
  0xe2   : > { %2338 = vmatpush.bf16.msrb.mxu1 %v3334_v16 }
  0xe7   : > { %v1442_v20 = vpop.f32.mrf.mxu2 }
  0xe8   : > { %v1455_v21 = vpop.f32.mrf.mxu3  ;;  %v1418_v22 = vpop.f32.mrf.mxu0  ;;  %v1443_v33 = vadd.f32 %v1442_v20, %v1430_v30  ;;  %v3332_v30 = vld [vmem:[%s4257_s4 + $0x118] sm:$0xff] }
  0xe9   : > { %v1431_v23 = vpop.f32.mrf.mxu1  ;;  %v3321_v22 = vld [vmem:[%s4257_s4 + $0xc0] sm:$0xff] }
  0xea   : > { %v1456_v40 = vadd.f32 %v1455_v21, %v1443_v33  ;;  %v3313_v21 = vld [vmem:[%s4257_s4 + $0x80] sm:$0xff]  ;;  %2330 = vmatpush.bf16.msrb.mxu0 %v3321_v22  ;;  %v3359_v33 = vld [vmem:[%s4257_s4 + $0x1f0] sm:$0xff]  ;;  %v3354_v22 = vld [vmem:[%s4257_s4 + $0x1c8] sm:$0xff] }
  0xeb   : > { %v3333_v23 = vld [vmem:[%s4257_s4 + $0x120] sm:$0xff]  ;;  %2317 = vmatpush.bf16.msra.mxu3 %v3313_v21 }
  0xec   : > { %2339 = vmatpush.bf16.msrb.mxu1 %v3333_v23 }
  0xef   : > { %v1444_v26 = vpop.f32.mrf.mxu2  ;;  %2362 = vmatpush.bf16.msrb.mxu3 %v3352_v25 }
  0xf0   : > { %v1457_v27 = vpop.f32.mrf.mxu3  ;;  %v3360_v26 = vld [vmem:[%s4257_s4 + $0x1f8] sm:$0xff]  ;;  %2340 = vmatpush.bf16.msrb.mxu1 %v3332_v30 }
  0xf1   : > { %2375 = vmatpush.bf16.msra.mxu0 %v3360_v26 }
  0xf3   : > { %2363 = vmatpush.bf16.msrb.mxu3 %v3351_v32  ;;  %v3345_v32 = vld [vmem:[%s4257_s4 + $0x180] sm:$0xff] }
  0xf4   : > { %2341 = vmatpush.bf16.msrb.mxu1 %v3331_v42 }
  0xf5   : > { %2376 = vmatpush.bf16.msra.mxu0 %v3359_v33  ;;  %v3353_v33 = vld [vmem:[%s4257_s4 + $0x1c0] sm:$0xff] }
  0xf8   : > { %2342 = vmatpush.bf16.msrb.mxu1 %v3330_v50  ;;  %v3373_v50 = vld [vmem:[%s4260_s7 + $0x20] sm:$0xff] }
  0xf9   : > { %2377 = vmatpush.bf16.msra.mxu0 %v3358_v46  ;;  %v3375_v46 = vld [vmem:[%s4260_s7 + $0x30] sm:$0xff] }
  0xfb   : > { %v1468_v35 = vpop.f32.mrf.mxu0 }
  0xfc   : > { %v1481_v36 = vpop.f32.mrf.mxu1  ;;  %v1469_v44 = vadd.f32 %v1468_v35, %v1456_v40  ;;  %2343 = vmatpush.bf16.msrb.mxu1 %v3329_v54 }
  0xfe   : > { %v1482_v52 = vadd.f32 %v1481_v36, %v1469_v44  ;;  %v1565_v44 = vld [vmem:[#allocation3 + $0x4] sm:$0x3] }
 0x101   : > { %v1494_v45 = vpop.f32.mrf.mxu2 }
 0x102   : > { %v1507_v48 = vpop.f32.mrf.mxu3  ;;  %v1495_v56 = vadd.f32 %v1494_v45, %v1482_v52  ;;  %v3350_v45 = vld [vmem:[%s4257_s4 + $0x1a8] sm:$0xff]  ;;  %v3349_v52 = vld [vmem:[%s4257_s4 + $0x1a0] sm:$0xff] }
 0x103   : > { %v1470_v51 = vpop.f32.mrf.mxu0  ;;  %2364 = vmatpush.bf16.msrb.mxu3 %v3350_v45  ;;  %v3367_v45 = vld [vmem:[%s4257_s4 + $0x230] sm:$0xff] }
 0x104   : > { %v1483_v53 = vpop.f32.mrf.mxu1  ;;  %v1508_v62 = vadd.f32 %v1507_v48, %v1495_v56  ;;  %v3338_v51 = vld [vmem:[%s4257_s4 + $0x148] sm:$0xff]  ;;  %v3348_v56 = vld [vmem:[%s4257_s4 + $0x198] sm:$0xff] }
 0x105   : > { %v3357_v53 = vld [vmem:[%s4257_s4 + $0x1e0] sm:$0xff]  ;;  %2355 = vmatpush.bf16.msrb.mxu2 %v3338_v51  ;;  %v3364_v51 = vld [vmem:[%s4257_s4 + $0x218] sm:$0xff] }
 0x106   : > { %2378 = vmatpush.bf16.msra.mxu0 %v3357_v53  ;;  %v3423_v53 = vld [vmem:[%s3637_s20] sm:$0xff] }
 0x107   : > { %2365 = vmatpush.bf16.msrb.mxu3 %v3349_v52  ;;  %v3372_v52 = vld [vmem:[%s4260_s7 + $0x18] sm:$0xff]  ;;  %v2412_v54 = vrot.slane %v3423_v53, 1 }
 0x109   : > { %v1496_v59 = vpop.f32.mrf.mxu2  ;;  %2356 = vmatpush.bf16.msrb.mxu2 %v3337_v55 }
 0x10a   : > { %v1509_v63 = vpop.f32.mrf.mxu3  ;;  %2379 = vmatpush.bf16.msra.mxu0 %v3356_v57 }
 0x10b   : > { %v1520_v4 = vpop.f32.mrf.mxu0  ;;  %v3347_v63 = vld [vmem:[%s4257_s4 + $0x190] sm:$0xff]  ;;  %2366 = vmatpush.bf16.msrb.mxu3 %v3348_v56 }
 0x10c   : > { %v1521_v6 = vadd.f32 %v1520_v4, %v1508_v62 }
 0x10e   : > { %v1528_v8 = vmul.f32 %v3417_v60, %v1521_v6  ;;  %2380 = vmatpush.bf16.msra.mxu0 %v3355_v0  ;;  %v3370_v0 = vld [vmem:[%s4260_s7 + $0x8] sm:$0xff] }
 0x10f   : > { %2367 = vmatpush.bf16.msrb.mxu3 %v3347_v63  ;;  %v3362_v63 = vld [vmem:[%s4257_s4 + $0x208] sm:$0xff] }
 0x110   : > { %v1533_v12 = vadd.f32 %v3418_v7, %v1528_v8 }
 0x112   : > { %v1534_v13 = vmax.f32 %v1533_v12, 0.0  ;;  %2381 = vmatpush.bf16.msra.mxu0 %v3354_v22 }
 0x113   : > { %v1522_v17 = vpop.f32.mrf.mxu0  ;;  %2368 = vmatpush.bf16.msrb.mxu3 %v3346_v15 }
 0x114   : > { %v1539_v19 = vpack.c.bf16 %v1534_v13, %v1534_v13 }
 0x116   : > { %v1541_v20 = vrot.slane %v1539_v19, 2  ;;  %2382 = vmatpush.bf16.msra.mxu0 %v3353_v33  ;;  %v3419_v33 = vld [vmem:[%s4258_s5] ss:$0 sm:$0xff] }
 0x117   : > { %2369 = vmatpush.bf16.msrb.mxu3 %v3345_v32 }
 0x118   : > { %v1544_v27 = vsel %vm424_vm6, %v1539_v19, %v1541_v20 }
 0x119   : > { %v1545_v28 = vshrl.u32 %v1544_v27, 16  ;;  %v1548_v29 = vshll.u32 %v1544_v27, 16 }
 0x11b   : > { %v1547_v34 = vrot.slane %v1545_v28, 7  ;;  %v1559_v49 = vrot.slane %v1545_v28, 6  ;;  %v1560_v35 = vrot.slane %v1548_v29, 7 }
 0x11d   : > { %v1550_v39 = vor.u32 %v1548_v29, %v1547_v34  ;;  %v1561_v40 = vor.u32 %v1560_v35, %v1559_v49 }
 0x11f   : > { %v1557_v47 = vsel %vm4094_vm15, %v1550_v39, %v1556_v38  ;;  %v1562_v48 = vrot.slane %v1561_v40, 2  ;;  %v3368_v38 = vld [vmem:[%s4257_s4 + $0x238] sm:$0xff] }
 0x120   : > { %1558 = vst [vmem:[#allocation3 + $0x2] sm:$0x3] %v1557_v47  ;;  %v3376_v39 = vld [vmem:[%s4260_s7 + $0x38] sm:$0xff]  ;;  %v3366_v47 = vld [vmem:[%s4257_s4 + $0x228] sm:$0xff] }
 0x121   : > { %v1566_v2 = vsel %vm4094_vm15, %v1562_v48, %v1565_v44  ;;  %v3374_v48 = vld [vmem:[%s4260_s7 + $0x28] sm:$0xff] }
 0x122   : > { %1567 = vst [vmem:[#allocation3 + $0x4] sm:$0x3] %v1566_v2  ;;  %v3365_v2 = vld [vmem:[%s4257_s4 + $0x220] sm:$0xff] }
 0x127   : > { %v1588_v58 = vld [vmem:[#allocation3 + $0x2] sm:$0x1]  ;;  %v1602_v60 = vld [vmem:[#allocation3 + $0x2] sm:$0x2] }
 0x128   : > { %v1590_v59 = vld [vmem:[#allocation3 + $0x2] sm:$0x3]  ;;  %1589 = vst [vmem:[#allocation4 + $0x6] sm:$0x1] %v1588_v58  ;;  %v2898_v62 = vrot.slane %v1602_v60, 9 }
 0x129   : > { %v1592_v61 = vshrl.u32 %v1590_v59, 16  ;;  %v1595_v37 = vshll.u32 %v1590_v59, 16  ;;  %v1608_v1 = vld [vmem:[#allocation3 + $0x4] sm:$0x1]  ;;  %v1622_v4 = vld [vmem:[#allocation3 + $0x4] sm:$0x2] }
 0x12a   : > { %v1610_v3 = vld [vmem:[#allocation3 + $0x4] sm:$0x3]  ;;  %1607 = vst [vmem:[#allocation4 + $0xa] sm:$0x1] %v2898_v62  ;;  %v2899_v9 = vrot.slane %v1622_v4, 9  ;;  %v2420_v62 = vsel %vm415_vm3, %v3423_v53, %v2412_v54  ;;  %v3361_v4 = vld [vmem:[%s4257_s4 + $0x200] sm:$0xff] }
 0x12b   : > { %v1594_v5 = vrot.slane %v1592_v61, 6  ;;  %v1597_v6 = vrot.slane %v1595_v37, 7  ;;  %v1612_v7 = vshrl.u32 %v1610_v3, 16  ;;  %v1615_v8 = vshll.u32 %v1610_v3, 16  ;;  %1609 = vst [vmem:[#allocation4 + $0xc] sm:$0x1] %v1608_v1 }
 0x12c   : > { %v1628_v41 = vld [vmem:[#allocation3 + $0x2] sm:$0x1]  ;;  %1627 = vst [vmem:[#allocation4 + $0x10] sm:$0x1] %v2899_v9  ;;  %v1643_v18 = vld [vmem:[#allocation3 + $0x2] sm:$0x2] }
 0x12d   : > { %v1598_v10 = vor.u32 %v1597_v6, %v1594_v5  ;;  %v1614_v11 = vrot.slane %v1612_v7, 6  ;;  %v1617_v12 = vrot.slane %v1615_v8, 7  ;;  %v1630_v13 = vrot.slane %v1628_v41, 7  ;;  %v1633_v14 = vld [vmem:[#allocation3 + $0x2] sm:$0x3]  ;;  %v3424_v61 = vld [vmem:[%s3637_s20 + $0x8] sm:$0xff] }
 0x12e   : > { %v1635_v16 = vshrl.u32 %v1633_v14, 16  ;;  %v1638_v17 = vshll.u32 %v1633_v14, 16  ;;  %v1645_v21 = vld [vmem:[#allocation3 + $0x4] sm:$0x1]  ;;  %1644 = vst [vmem:[#allocation4 + $0x4] sm:$0x2] %v1643_v18 }
 0x12f   : > { %v1599_v19 = vrot.slane %v1598_v10, 2  ;;  %v1618_v20 = vor.u32 %v1617_v12, %v1614_v11  ;;  %1632 = vst [vmem:[#allocation4] sm:$0x2] %v1630_v13  ;;  %v1647_v24 = vrot.slane %v1645_v21, 7  ;;  %v1650_v25 = vld [vmem:[#allocation3 + $0x4] sm:$0x3] }
 0x130   : > { %v1637_v23 = vrot.slane %v1635_v16, 7  ;;  %v1652_v27 = vshrl.u32 %v1650_v25, 16  ;;  %v1660_v29 = vld [vmem:[#allocation3 + $0x4] sm:$0x2]  ;;  %v1655_v31 = vshll.u32 %v1650_v25, 16  ;;  %v2415_v37 = vrot.slane %v3424_v61, 6 }
 0x131   : > { %1601 = vst [vmem:[#allocation4 + $0x8] sm:$0x1] %v1599_v19  ;;  %v1619_v26 = vrot.slane %v1618_v20, 2  ;;  %v3363_v59 = vld [vmem:[%s4257_s4 + $0x210] sm:$0xff]  ;;  %v2417_v1 = vrot.slane %v3424_v61, 7  ;;  %v3369_v5 = vld [vmem:[%s4260_s7] sm:$0xff] }
 0x132   : > { %v1640_v28 = vor.u32 %v1638_v17, %v1637_v23  ;;  %1649 = vst [vmem:[#allocation4 + $0x6] sm:$0x2] %v1647_v24  ;;  %v1654_v30 = vrot.slane %v1652_v27, 7  ;;  %v3371_v60 = vld [vmem:[%s4260_s7 + $0x10] sm:$0xff]  ;;  %v2421_v3 = vsel %vm424_vm6, %v2420_v62, %v2415_v37 }
 0x133   : > { %1621 = vst [vmem:[#allocation4 + $0xe] sm:$0x1] %v1619_v26  ;;  %v1682_v36 = vld [vmem:[#allocation4 + $0x10] sm:$0x3]  ;;  %v2423_v6 = vsel %vm378_vm0, %v2421_v3, %v2417_v1 }
 0x134   : > { %1642 = vst [vmem:[#allocation4 + $0x2] sm:$0x2] %v1640_v28  ;;  %v1657_v34 = vor.u32 %v1655_v31, %v1654_v30  ;;  %v2424_v7 = vpack.c.bf16 %v2423_v6, %v2423_v6 }
 0x135   : > { %1661 = vst [vmem:[#allocation4 + $0xa] sm:$0x2] %v1660_v29 }
 0x136   : > { %1659 = vst [vmem:[#allocation4 + $0x8] sm:$0x2] %v1657_v34  ;;  %v3421_v34 = vld [vmem:[%s4261_s8] ss:$0 sm:$0xff] }
 0x13b   : > { %v1680_v49 = vld [vmem:[#allocation4] sm:$0xff] }
 0x13c   : > { %1828 = vst [vmem:[#allocation1] ss:$4 sm:$0xff] %v1680_v49 }
 0x13d   : > { %v1681_v35 = vld [vmem:[#allocation4 + $0x8] sm:$0xff] }
 0x13e   : > { %1831 = vst [vmem:[#allocation1 + $0x20] ss:$4 sm:$0xff] %v1681_v35  ;;  %v3420_v35 = vld [vmem:[%s4259_s6] ss:$0 sm:$0xff] }
 0x143   : > { %v1832_v40 = vld.sshfl [vmem:[#allocation1] sm:$0xff pattern:$0x73625140]  ;;  %v1833_v42 = vld.sshfl [vmem:[#allocation1 + $0x8] sm:$0xff pattern:$0x73625140] }
 0x144   : > { %2292 = vmatmul.bf16.vlgmr.msra.gmra.mxu1 %v1832_v40  ;;  %2305 = vmatmul.bf16.vlgmr.msra.gmra.mxu2 %v1833_v42  ;;  %v1834_v43 = vld.sshfl [vmem:[#allocation1 + $0x10] sm:$0xff pattern:$0x73625140]  ;;  %v1835_v44 = vld.sshfl [vmem:[#allocation1 + $0x18] sm:$0xff pattern:$0x73625140] }
 0x145   : > { %2318 = vmatmul.bf16.vlgmr.msra.gmra.mxu3 %v1834_v43  ;;  %1841 = vst [vmem:[#allocation1] ss:$4 sm:$0xff] %v1682_v36  ;;  %2331 = vmatmul.bf16.vlgmr.msrb.gmra.mxu0 %v1835_v44  ;;  %v1836_v55 = vld.sshfl [vmem:[#allocation1 + $0x20] sm:$0xff pattern:$0x73625140] }
 0x146   : > { %2388 = vmatpush.bf16.msra.mxu1 %v3368_v38  ;;  %2489 = vmatpush.bf16.msra.mxu2 %v3376_v39  ;;  %v1837_v56 = vld.sshfl [vmem:[#allocation1 + $0x28] sm:$0xff pattern:$0x73625140]  ;;  %v1838_v57 = vld.sshfl [vmem:[#allocation1 + $0x30] sm:$0xff pattern:$0x73625140] }
 0x147   : > { %v1839_v58 = vld.sshfl [vmem:[#allocation1 + $0x38] sm:$0xff pattern:$0x73625140]  ;;  %v3422_v36 = vld [vmem:[%s4262_s9] ss:$0 sm:$0xff] }
 0x14a   : > { %2389 = vmatpush.bf16.msra.mxu1 %v3367_v45  ;;  %2490 = vmatpush.bf16.msra.mxu2 %v3375_v46 }
 0x14c   : > { %v1842_v8 = vld.sshfl [vmem:[#allocation1] sm:$0xff pattern:$0x73625140] }
 0x14e   : > { %2390 = vmatpush.bf16.msra.mxu1 %v3366_v47  ;;  %2491 = vmatpush.bf16.msra.mxu2 %v3374_v48 }
 0x152   : > { %2391 = vmatpush.bf16.msra.mxu1 %v3365_v2  ;;  %2492 = vmatpush.bf16.msra.mxu2 %v3373_v50 }
 0x154   : > { %2344 = vmatmul.bf16.vlgmr.msrb.gmra.mxu1 %v1836_v55  ;;  %2357 = vmatmul.bf16.vlgmr.msrb.gmra.mxu2 %v1837_v56 }
 0x155   : > { %2370 = vmatmul.bf16.vlgmr.msrb.gmra.mxu3 %v1838_v57  ;;  %2383 = vmatmul.bf16.vlgmr.msra.gmra.mxu0 %v1839_v58 }
 0x156   : > { %2392 = vmatpush.bf16.msra.mxu1 %v3364_v51  ;;  %2493 = vmatpush.bf16.msra.mxu2 %v3372_v52 }
 0x15a   : > { %2393 = vmatpush.bf16.msra.mxu1 %v3363_v59  ;;  %2494 = vmatpush.bf16.msra.mxu2 %v3371_v60 }
 0x15e   : > { %2394 = vmatpush.bf16.msra.mxu1 %v3362_v63  ;;  %2495 = vmatpush.bf16.msra.mxu2 %v3370_v0 }
 0x162   : > { %2395 = vmatpush.bf16.msra.mxu1 %v3361_v4  ;;  %2496 = vmatpush.bf16.msra.mxu2 %v3369_v5 }
 0x165   : > { %2396 = vmatmul.bf16.vlgmr.msra.gmra.mxu1 %v1842_v8  ;;  %2497 = vmatmul.bf16.vlgmr.msra.gmra.mxu2 %v2424_v7 }
 0x1c1   : > { %v2293_v9 = vpop.f32.mrf.mxu1 }
 0x1c2   : > { %v2332_v41 = vpop.f32.mrf.mxu0 }
 0x1c7   : > { %v2306_v10 = vpop.f32.mrf.mxu2 }
 0x1c8   : > { %v2319_v11 = vpop.f32.mrf.mxu3  ;;  %v2307_v14 = vadd.f32 %v2306_v10, %v2293_v9 }
 0x1c9   : > { %v2295_v12 = vpop.f32.mrf.mxu1 }
 0x1ca   : > { %v2334_v13 = vpop.f32.mrf.mxu0  ;;  %v2320_v17 = vadd.f32 %v2319_v11, %v2307_v14 }
 0x1cc   : > { %v2333_v20 = vadd.f32 %v2332_v41, %v2320_v17 }
 0x1cf   : > { %v2308_v15 = vpop.f32.mrf.mxu2 }
 0x1d0   : > { %v2321_v16 = vpop.f32.mrf.mxu3 }
 0x1d1   : > { %v2345_v18 = vpop.f32.mrf.mxu1 }
 0x1d2   : > { %v2384_v19 = vpop.f32.mrf.mxu0  ;;  %v2346_v21 = vadd.f32 %v2345_v18, %v2333_v20 }
 0x1d7   : > { %v2358_v22 = vpop.f32.mrf.mxu2 }
 0x1d8   : > { %v2371_v23 = vpop.f32.mrf.mxu3  ;;  %v2359_v24 = vadd.f32 %v2358_v22, %v2346_v21 }
 0x1d9   : > { %v2347_v25 = vpop.f32.mrf.mxu1 }
 0x1da   : > { %v2386_v26 = vpop.f32.mrf.mxu0  ;;  %v2372_v27 = vadd.f32 %v2371_v23, %v2359_v24 }
 0x1dc   : > { %v2385_v30 = vadd.f32 %v2384_v19, %v2372_v27 }
 0x1df   : > { %v2360_v28 = vpop.f32.mrf.mxu2 }
 0x1e0   : > { %v2373_v29 = vpop.f32.mrf.mxu3 }
 0x1e2   : > { %v2397_v31 = vpop.f32.mrf.mxu1 }
 0x1e3   : > { %v2398_v32 = vadd.f32 %v2397_v31, %v2385_v30 }
 0x1e5   : > { %v2405_v49 = vmul.f32 %v3419_v33, %v2398_v32 }
 0x1e7   : > { %v2410_v42 = vadd.f32 %v3420_v35, %v2405_v49 }
 0x1e8   : > { %v2498_v38 = vpop.f32.mrf.mxu2 }
 0x1e9   : > { %v2506_v39 = vmul.f32 %v3421_v34, %v2498_v38 }
 0x1ea   : > { %v2399_v40 = vpop.f32.mrf.mxu1 }
 0x1eb   : > { %v2511_v43 = vadd.f32 %v3422_v36, %v2506_v39 }
 0x1ed   : > { %v2512_v44 = vadd.f32 %v2511_v43, %v2410_v42 }
 0x1ef   : > { %v2513_v45 = vmax.f32 %v2512_v44, 0.0 }
 0x1f0   : > { %v2500_v46 = vpop.f32.mrf.mxu2 }
 0x1f1   : > { %2514 = vst [vmem:[%s352_s17] sm:$0xf] %v2513_v45 }
 0x1f2   : > { %3452 = shalt.err (!%p3449_p3)
}
 0x1f3   : > { %3377 = dma.vmem_to_hbm [thread:$0]  (%p3583_p5), %s2529_s0, 64, %s2531_s12, %s2516_s18  }
 0x1f4 PF: > { %p3383_p4 = scmp.ge.s32.totalorder %s3487_s16, 2  ;;  %s2542_s1 = sand.u32 1, %s3475_s13  }
 0x1f5   : > { %s2543_s26 = scalar_lea.sflag [#allocation6], %s2542_s1 }
 0x1f6   : > { %p3380_p7 = pnand %p3383_p4, %p3587_p6 }
 0x1f8   : > { %p3381_p8 = pneg %p3380_p7 }
 0x1fa   : > { %3470 = dma.done.wait (%p3381_p8), %s2543_s26, 64  }
 0x1fb   : > { %3472 = vsyncadd (%p3381_p8), %s2543_s26, 4294967232  ;;  %p20_p9 = scmp.ge.s32.totalorder %s3570_s19, 4   ;;  %s4282_s13 = smov %s3479_s14 }
 0x1fc   : > { %s4283_s14 = smov %s3483_s15  ;;  %s4284_s15 = smov %s3581_s22 }
 0x1fd   : > { %s4285_s16 = smov %s3570_s19  ;;  %22 = sbr.rel (!%p20_p9) target bundleno = 6 (0x6), region = 110 }
 0x202   :  { %2549 = vsyncpa [#allocation6], 1 }
 0x203   :  { %2551 = vsyncpa [#allocation6 + $0x1], 1 }

</bundles_post_ra>
